<compile_context>
chip_gen: v7x
topology: tpu7x:2x2x1
jax: 0.10.0
libtpu: 0.0.40
codegen_flags: <defaults>
</compile_context>

<pallas_src>
import functools

import numpy as np
import jax
import jax.numpy as jnp
from jax import lax
from jax.experimental import pallas as pl
from jax.experimental.pallas import tpu as pltpu

_LANES = 128  # pad the 55-wide head output to a full lane width


def _head_kernel(feat_ref, w_ref, b_ref, out_ref, *, n_exp, c_chunk, inv_hw):
    # feat_ref: (TB, C, HW)  backbone feature tile (bf16 or f32); C on sublanes,
    #                        HW on lanes (lane-padded in VMEM, real bytes in HBM)
    # w_ref:    (C, DP)      Linear weight, MXU-native orientation, zero-padded
    #                        to DP=128 output lanes, f32 (resident block)
    # b_ref:    (1, DP)      Linear bias, zero-padded, f32
    # out_ref:  (TB, DP)     post-activation parameters, lane-dense
    TB, C, HW = feat_ref.shape
    DP = out_ref.shape[-1]

    # adaptive_avg_pool2d((1,1)) + Linear, fused: reduce over the spatial (lane)
    # axis in f32 one channel-chunk at a time and immediately feed each pooled
    # chunk into a partial matmul against the matching weight rows.  This never
    # materializes a full (TB, C, HW) f32 temporary.
    acc = jnp.zeros((TB, DP), jnp.float32)
    for ci in range(C // c_chunk):
        sl = slice(ci * c_chunk, (ci + 1) * c_chunk)
        chunk = feat_ref[:, sl, :].astype(jnp.float32)          # (TB, CC, HW)
        pooled = jnp.sum(chunk, axis=-1) * inv_hw               # (TB, CC) f32
        # LHS: M=TB on sublanes, K=CC on lanes.  RHS: K=CC on sublanes,
        # N=DP on lanes.  Both MXU-native -> no in-kernel transposes.
        acc = acc + lax.dot_general(
            pooled, w_ref[sl, :],
            dimension_numbers=(((1,), (0,)), ((), ())),
            preferred_element_type=jnp.float32)
    params = acc + b_ref[...]                                   # (TB, DP)

    # Piecewise head (identity / clamp(0,1) / relu / clamp(-.2,.2)) as a single
    # clip against per-lane bounds built from a compile-time iota:
    #   [0, n_exp)         identity        (expression)
    #   [n_exp, n_exp+2)   clamp(0, 1)     (eyelid)
    #   n_exp+2            relu            (jaw[0])
    #   [n_exp+3, n_exp+5) clamp(-.2, .2)  (jaw[1:3])
    #   >= n_exp+5         identity        (zero-padded lanes, sliced away)
    lane = lax.broadcasted_iota(jnp.int32, (1, DP), 1)
    lo = jnp.where(lane < n_exp, -jnp.inf,
         jnp.where(lane < n_exp + 3, 0.0,
         jnp.where(lane < n_exp + 5, -0.2, -jnp.inf))).astype(jnp.float32)
    hi = jnp.where(lane < n_exp, jnp.inf,
         jnp.where(lane < n_exp + 2, 1.0,
         jnp.where(lane < n_exp + 3, jnp.inf,
         jnp.where(lane < n_exp + 5, 0.2, jnp.inf)))).astype(jnp.float32)
    out_ref[...] = jnp.clip(params, lo, hi)


def _pick_c_chunk(C):
    """Channel chunk for the fused pool+matmul: divides C, multiple of 16 so
    sliced bf16 refs stay sublane-aligned, small enough to bound the f32 temp."""
    for cc in (256, 240, 192, 160, 128, 96, 64, 32, 16, 8):
        if C % cc == 0:
            return cc
    return C  # single chunk fallback


def _pick_batch_tile(batch, itemsize):
    """Batch tile: multiple of 8, VMEM-safe on v7x (64 MiB/TC physical, 32 MiB
    scoped), and <= batch//2 when possible so the 'parallel' batch axis gives
    >= 2 grid steps (shardable across v7x's two TensorCores).
    bf16 @ TB=32: 2 x 7.5 MiB double-buffered input (lane-padded) + ~3.8 MiB
    chunk f32 temp + ~1 MiB weight  ->  ~20 MiB, comfortably under 32 MiB."""
    cap = 32 if itemsize <= 2 else 16
    if batch <= 8:
        return batch, batch                       # full-dim block (always legal)
    tb = min(cap, max(8, (batch // 2) // 8 * 8))  # >=2 grid steps when batch > 8
    padded = ((batch + tb - 1) // tb) * tb        # pad batch instead of whole-batch fallback
    return tb, padded


@functools.partial(jax.jit, static_argnames=("n_exp",))
def expression_encoder_head(features_nchw, weight, bias, *, n_exp=50):
    """features_nchw: (B, C, H, W) backbone output; weight: (D, C); bias: (D,)."""
    B, C, H, W = features_nchw.shape
    D = n_exp + 5
    assert weight.shape == (D, C) and bias.shape == (D,)
    DP = _LANES
    HW = H * W

    # Free, contiguous reshape (no transpose / extra HBM pass): NCHW -> (B, C, HW).
    feat = features_nchw.reshape(B, C, HW)

    TB, B_pad = _pick_batch_tile(B, jnp.dtype(feat.dtype).itemsize)
    if B_pad != B:
        feat = jnp.pad(feat, ((0, B_pad - B), (0, 0), (0, 0)))

    # Weight pre-transposed to MXU-native (C, DP) and zero-padded to 128 output
    # lanes; bias zero-padded.  Both fuse under jit (one-time, ~0.5 MB).
    w = jnp.pad(weight.astype(jnp.float32).T, ((0, 0), (0, DP - D)))   # (C, DP)
    b = jnp.pad(bias.astype(jnp.float32), (0, DP - D)).reshape(1, DP)  # (1, DP)

    cc = _pick_c_chunk(C)
    kernel = functools.partial(_head_kernel, n_exp=n_exp, c_chunk=cc,
                               inv_hw=float(1.0 / HW))

    params = pl.pallas_call(
        kernel,
        out_shape=jax.ShapeDtypeStruct((B_pad, DP), jnp.float32),
        grid_spec=pltpu.PrefetchScalarGridSpec(
            num_scalar_prefetch=0,
            grid=(B_pad // TB,),
            in_specs=[
                pl.BlockSpec((TB, C, HW), lambda i: (i, 0, 0)),  # feature tile
                pl.BlockSpec((C, DP), lambda i: (0, 0)),         # weight (resident)
                pl.BlockSpec((1, DP), lambda i: (0, 0)),         # bias
            ],
            out_specs=pl.BlockSpec((TB, DP), lambda i: (i, 0)),
        ),
        compiler_params=pltpu.CompilerParams(
            dimension_semantics=("parallel",),
            vmem_limit_bytes=32 * 1024 * 1024,
        ),
    )(feat, w, b)

    # Activations already applied in-kernel; slice padded lanes / batch rows away.
    return {
        "expression_params": params[:B, :n_exp],
        "eyelid_params": params[:B, n_exp:n_exp + 2],
        "jaw_params": params[:B, n_exp + 2:n_exp + 5],
    }


def _reference(features_nchw, weight, bias, n_exp=50):
    """Pure-JAX reference of the PyTorch head for validation."""
    pooled = jnp.mean(features_nchw.astype(jnp.float32), axis=(2, 3))      # (B, C)
    params = pooled @ weight.T.astype(jnp.float32) + bias.astype(jnp.float32)
    return {
        "expression_params": params[..., :n_exp],
        "eyelid_params": jnp.clip(params[..., n_exp:n_exp + 2], 0.0, 1.0),
        "jaw_params": jnp.concatenate(
            [jnp.maximum(params[..., n_exp + 2:n_exp + 3], 0.0),
             jnp.clip(params[..., n_exp + 3:n_exp + 5], -0.2, 0.2)], axis=-1),
    }


if __name__ == "__main__":
    n_exp = 50
    feature_dim = 960          # tf_mobilenetv3_large_minimal_100 last-stage channels
    B, H, W = 2, 7, 7          # feature-map spatial size for a 224x224 input
    D = n_exp + 5

    key = jax.random.PRNGKey(0)
    k_feat, k_w, k_b = jax.random.split(key, 3)

    # Stand-in for the backbone's final feature map; fed to the head in bf16
    # (halves HBM->VMEM traffic), accumulation stays f32 in-kernel.
    features = jax.random.uniform(
        k_feat, (B, feature_dim, H, W), jnp.float32).astype(jnp.bfloat16)

    # nn.Linear(feature_dim, n_exp+5) default init, then *0.1 as init_weights() does.
    bound = 1.0 / float(np.sqrt(feature_dim))
    weight = jax.random.uniform(k_w, (D, feature_dim), jnp.float32,
                                minval=-bound, maxval=bound) * 0.1
    bias = jax.random.uniform(k_b, (D,), jnp.float32,
                              minval=-bound, maxval=bound) * 0.1

    out = expression_encoder_head(features, weight, bias, n_exp=n_exp)
    out = jax.block_until_ready(out)

    ref = _reference(features, weight, bias, n_exp=n_exp)
    for k in ("expression_params", "eyelid_params", "jaw_params"):
        assert out[k].shape == ref[k].shape, (k, out[k].shape, ref[k].shape)
        assert jnp.allclose(out[k], ref[k], atol=3e-5, rtol=1e-3), k

    print("KERNEL_OK")
</pallas_src>

<mosaic_0001>
module attributes {stable_mosaic.version = 11 : i64} {
  func.func @_head_kernel(%arg0: i32, %arg1: memref<2x960x49xbf16, #tpu.memory_space<vmem>>, %arg2: memref<960x128xf32, #tpu.memory_space<vmem>>, %arg3: memref<1x128xf32, #tpu.memory_space<vmem>>, %arg4: memref<2x128xf32, #tpu.memory_space<vmem>>) attributes {dimension_semantics = [#tpu.dimension_semantics<parallel>], iteration_bounds = array<i64: 1>, scalar_prefetch = 0 : i64, scratch_operands = 0 : i64, tpu.core_type = #tpu.core_type<tc>, window_params = [{transform_indices = @transform_0, window_bounds = array<i64: 2, 960, 49>}, {pipeline_mode = #tpu.pipeline_mode<synchronous>, transform_indices = @transform_1, window_bounds = array<i64: 960, 128>}, {pipeline_mode = #tpu.pipeline_mode<synchronous>, transform_indices = @transform_2, window_bounds = array<i64: 1, 128>}, {transform_indices = @transform_3, window_bounds = array<i64: 2, 128>}]} {
    %cst = arith.constant 0.000000e+00 : f32
    %0 = vector.broadcast %cst : f32 to vector<2x128xf32>
    %c0 = arith.constant 0 : index
    %c0_0 = arith.constant 0 : index
    %c0_1 = arith.constant 0 : index
    %1 = vector.load %arg1[%c0, %c0_0, %c0_1] : memref<2x960x49xbf16, #tpu.memory_space<vmem>>, vector<2x240x49xbf16>
    %2 = arith.extf %1 : vector<2x240x49xbf16> to vector<2x240x49xf32>
    %cst_2 = arith.constant dense<0.000000e+00> : vector<2x240xf32>
    %3 = vector.multi_reduction <add>, %2, %cst_2 [2] : vector<2x240x49xf32> to vector<2x240xf32>
    %cst_3 = arith.constant 0.0204081628 : f32
    %4 = vector.broadcast %cst_3 : f32 to vector<2x240xf32>
    %5 = arith.mulf %3, %4 : vector<2x240xf32>
    %c0_4 = arith.constant 0 : index
    %c0_5 = arith.constant 0 : index
    %6 = vector.load %arg2[%c0_4, %c0_5] : memref<960x128xf32, #tpu.memory_space<vmem>>, vector<240x128xf32>
    %cst_6 = arith.constant dense<0.000000e+00> : vector<2x128xf32>
    %7 = tpu.matmul %5, %6, %cst_6 {dimension_numbers = #tpu.dot_dimension_numbers<[1], [0], [0], [1], [0, 0, 1, 1], [], []>} : vector<2x240xf32>, vector<240x128xf32>, vector<2x128xf32> -> vector<2x128xf32>
    %8 = arith.addf %0, %7 : vector<2x128xf32>
    %c0_7 = arith.constant 0 : index
    %c240 = arith.constant 240 : index
    %c0_8 = arith.constant 0 : index
    %9 = vector.load %arg1[%c0_7, %c240, %c0_8] : memref<2x960x49xbf16, #tpu.memory_space<vmem>>, vector<2x240x49xbf16>
    %10 = arith.extf %9 : vector<2x240x49xbf16> to vector<2x240x49xf32>
    %cst_9 = arith.constant dense<0.000000e+00> : vector<2x240xf32>
    %11 = vector.multi_reduction <add>, %10, %cst_9 [2] : vector<2x240x49xf32> to vector<2x240xf32>
    %cst_10 = arith.constant 0.0204081628 : f32
    %12 = vector.broadcast %cst_10 : f32 to vector<2x240xf32>
    %13 = arith.mulf %11, %12 : vector<2x240xf32>
    %c240_11 = arith.constant 240 : index
    %c0_12 = arith.constant 0 : index
    %14 = vector.load %arg2[%c240_11, %c0_12] : memref<960x128xf32, #tpu.memory_space<vmem>>, vector<240x128xf32>
    %cst_13 = arith.constant dense<0.000000e+00> : vector<2x128xf32>
    %15 = tpu.matmul %13, %14, %cst_13 {dimension_numbers = #tpu.dot_dimension_numbers<[1], [0], [0], [1], [0, 0, 1, 1], [], []>} : vector<2x240xf32>, vector<240x128xf32>, vector<2x128xf32> -> vector<2x128xf32>
    %16 = arith.addf %8, %15 : vector<2x128xf32>
    %c0_14 = arith.constant 0 : index
    %c480 = arith.constant 480 : index
    %c0_15 = arith.constant 0 : index
    %17 = vector.load %arg1[%c0_14, %c480, %c0_15] : memref<2x960x49xbf16, #tpu.memory_space<vmem>>, vector<2x240x49xbf16>
    %18 = arith.extf %17 : vector<2x240x49xbf16> to vector<2x240x49xf32>
    %cst_16 = arith.constant dense<0.000000e+00> : vector<2x240xf32>
    %19 = vector.multi_reduction <add>, %18, %cst_16 [2] : vector<2x240x49xf32> to vector<2x240xf32>
    %cst_17 = arith.constant 0.0204081628 : f32
    %20 = vector.broadcast %cst_17 : f32 to vector<2x240xf32>
    %21 = arith.mulf %19, %20 : vector<2x240xf32>
    %c480_18 = arith.constant 480 : index
    %c0_19 = arith.constant 0 : index
    %22 = vector.load %arg2[%c480_18, %c0_19] : memref<960x128xf32, #tpu.memory_space<vmem>>, vector<240x128xf32>
    %cst_20 = arith.constant dense<0.000000e+00> : vector<2x128xf32>
    %23 = tpu.matmul %21, %22, %cst_20 {dimension_numbers = #tpu.dot_dimension_numbers<[1], [0], [0], [1], [0, 0, 1, 1], [], []>} : vector<2x240xf32>, vector<240x128xf32>, vector<2x128xf32> -> vector<2x128xf32>
    %24 = arith.addf %16, %23 : vector<2x128xf32>
    %c0_21 = arith.constant 0 : index
    %c720 = arith.constant 720 : index
    %c0_22 = arith.constant 0 : index
    %25 = vector.load %arg1[%c0_21, %c720, %c0_22] : memref<2x960x49xbf16, #tpu.memory_space<vmem>>, vector<2x240x49xbf16>
    %26 = arith.extf %25 : vector<2x240x49xbf16> to vector<2x240x49xf32>
    %cst_23 = arith.constant dense<0.000000e+00> : vector<2x240xf32>
    %27 = vector.multi_reduction <add>, %26, %cst_23 [2] : vector<2x240x49xf32> to vector<2x240xf32>
    %cst_24 = arith.constant 0.0204081628 : f32
    %28 = vector.broadcast %cst_24 : f32 to vector<2x240xf32>
    %29 = arith.mulf %27, %28 : vector<2x240xf32>
    %c720_25 = arith.constant 720 : index
    %c0_26 = arith.constant 0 : index
    %30 = vector.load %arg2[%c720_25, %c0_26] : memref<960x128xf32, #tpu.memory_space<vmem>>, vector<240x128xf32>
    %cst_27 = arith.constant dense<0.000000e+00> : vector<2x128xf32>
    %31 = tpu.matmul %29, %30, %cst_27 {dimension_numbers = #tpu.dot_dimension_numbers<[1], [0], [0], [1], [0, 0, 1, 1], [], []>} : vector<2x240xf32>, vector<240x128xf32>, vector<2x128xf32> -> vector<2x128xf32>
    %32 = arith.addf %24, %31 : vector<2x128xf32>
    %c0_28 = arith.constant 0 : index
    %c0_29 = arith.constant 0 : index
    %33 = vector.load %arg3[%c0_28, %c0_29] : memref<1x128xf32, #tpu.memory_space<vmem>>, vector<1x128xf32>
    %34 = vector.broadcast %33 : vector<1x128xf32> to vector<2x128xf32>
    %35 = arith.addf %32, %34 : vector<2x128xf32>
    %36 = tpu.iota {dimensions = array<i32: 1>} : vector<1x128xi32>
    %c50_i32 = arith.constant 50 : i32
    %37 = vector.broadcast %c50_i32 : i32 to vector<1x128xi32>
    %38 = arith.cmpi slt, %36, %37 : vector<1x128xi32>
    %c53_i32 = arith.constant 53 : i32
    %39 = vector.broadcast %c53_i32 : i32 to vector<1x128xi32>
    %40 = arith.cmpi slt, %36, %39 : vector<1x128xi32>
    %c55_i32 = arith.constant 55 : i32
    %41 = vector.broadcast %c55_i32 : i32 to vector<1x128xi32>
    %42 = arith.cmpi slt, %36, %41 : vector<1x128xi32>
    %cst_30 = arith.constant -2.000000e-01 : f32
    %cst_31 = arith.constant 0xFF800000 : f32
    %43 = vector.broadcast %cst_30 : f32 to vector<1x128xf32>
    %44 = vector.broadcast %cst_31 : f32 to vector<1x128xf32>
    %45 = arith.select %42, %43, %44 : vector<1x128xi1>, vector<1x128xf32>
    %cst_32 = arith.constant 0.000000e+00 : f32
    %46 = vector.broadcast %cst_32 : f32 to vector<1x128xf32>
    %47 = arith.select %40, %46, %45 : vector<1x128xi1>, vector<1x128xf32>
    %cst_33 = arith.constant 0xFF800000 : f32
    %48 = vector.broadcast %cst_33 : f32 to vector<1x128xf32>
    %49 = arith.select %38, %48, %47 : vector<1x128xi1>, vector<1x128xf32>
    %c50_i32_34 = arith.constant 50 : i32
    %50 = vector.broadcast %c50_i32_34 : i32 to vector<1x128xi32>
    %51 = arith.cmpi slt, %36, %50 : vector<1x128xi32>
    %c52_i32 = arith.constant 52 : i32
    %52 = vector.broadcast %c52_i32 : i32 to vector<1x128xi32>
    %53 = arith.cmpi slt, %36, %52 : vector<1x128xi32>
    %c53_i32_35 = arith.constant 53 : i32
    %54 = vector.broadcast %c53_i32_35 : i32 to vector<1x128xi32>
    %55 = arith.cmpi slt, %36, %54 : vector<1x128xi32>
    %c55_i32_36 = arith.constant 55 : i32
    %56 = vector.broadcast %c55_i32_36 : i32 to vector<1x128xi32>
    %57 = arith.cmpi slt, %36, %56 : vector<1x128xi32>
    %cst_37 = arith.constant 2.000000e-01 : f32
    %cst_38 = arith.constant 0x7F800000 : f32
    %58 = vector.broadcast %cst_37 : f32 to vector<1x128xf32>
    %59 = vector.broadcast %cst_38 : f32 to vector<1x128xf32>
    %60 = arith.select %57, %58, %59 : vector<1x128xi1>, vector<1x128xf32>
    %cst_39 = arith.constant 0x7F800000 : f32
    %61 = vector.broadcast %cst_39 : f32 to vector<1x128xf32>
    %62 = arith.select %55, %61, %60 : vector<1x128xi1>, vector<1x128xf32>
    %cst_40 = arith.constant 1.000000e+00 : f32
    %63 = vector.broadcast %cst_40 : f32 to vector<1x128xf32>
    %64 = arith.select %53, %63, %62 : vector<1x128xi1>, vector<1x128xf32>
    %cst_41 = arith.constant 0x7F800000 : f32
    %65 = vector.broadcast %cst_41 : f32 to vector<1x128xf32>
    %66 = arith.select %51, %65, %64 : vector<1x128xi1>, vector<1x128xf32>
    %67 = vector.broadcast %49 : vector<1x128xf32> to vector<2x128xf32>
    %68 = arith.maximumf %67, %35 : vector<2x128xf32>
    %69 = vector.broadcast %66 : vector<1x128xf32> to vector<2x128xf32>
    %70 = arith.minimumf %69, %68 : vector<2x128xf32>
    %c0_42 = arith.constant 0 : index
    %c0_43 = arith.constant 0 : index
    %71 = vector.load %arg4[%c0_42, %c0_43] : memref<2x128xf32, #tpu.memory_space<vmem>>, vector<2x128xf32>
    tpu.vector_store %arg4[%c0_42, %c0_43], %70 {strides = array<i32>} : memref<2x128xf32, #tpu.memory_space<vmem>>, vector<2x128xf32>,
    return
  }
  func.func @transform_0(%arg0: i32) -> (i32, i32, i32) {
    %c0_i32 = arith.constant 0 : i32
    %c0_i32_0 = arith.constant 0 : i32
    %c0_i32_1 = arith.constant 0 : i32
    return %arg0, %c0_i32, %c0_i32_0 : i32, i32, i32
  }
  func.func @transform_1(%arg0: i32) -> (i32, i32) {
    %c0_i32 = arith.constant 0 : i32
    %c0_i32_0 = arith.constant 0 : i32
    %c0_i32_1 = arith.constant 0 : i32
    return %c0_i32, %c0_i32_0 : i32, i32
  }
  func.func @transform_2(%arg0: i32) -> (i32, i32) {
    %c0_i32 = arith.constant 0 : i32
    %c0_i32_0 = arith.constant 0 : i32
    %c0_i32_1 = arith.constant 0 : i32
    return %c0_i32, %c0_i32_0 : i32, i32
  }
  func.func @transform_3(%arg0: i32) -> (i32, i32) {
    %c0_i32 = arith.constant 0 : i32
    %c0_i32_0 = arith.constant 0 : i32
    return %arg0, %c0_i32 : i32, i32
  }
}

</mosaic_0001>

<bundles_post_ra>
// kernel: expression_encoder_head.1
= control target key start
LH: loop header
LB: loop body
LE: loop exit
PB: predicated region body
PF: predicated region fallthrough
CT: control target
= control target key end

     0   :  { %vm134_vm0 = vcmask 400384   ;;  %vm866_vm1 = vcmask 130112   ;;  %vm873_vm2 = vcmask 195712   ;;  %vm880_vm3 = vcmask 261312   ;;  %s6253_s0 = inlined_call_operand.vmem [shape: bf16[2,960,49], index: 0, kind: input, shape index: {}]   ;;  %s6254_s1 = inlined_call_operand.vmem [shape: f32[960,128], index: 1, kind: input, shape index: {}]   ;;  %s6255_s2 = inlined_call_operand.vmem [shape: f32[1,128], index: 2, kind: input, shape index: {}]   ;;  %s6256_s3 = inlined_call_operand.vmem [shape: f32[2,128], index: 3, kind: output, shape index: {}]  }
   0x1   :  { %v3846_v0 = vld [vmem:[%s6253_s0 + $0x8] sm:$0xff]   ;;  %v3367_v1 = vld [vmem:[%s6253_s0] sm:$0xff]   ;;  %v3847_v6 = vld [vmem:[%s6253_s0 + $0x10] sm:$0xff]   ;;  %vm887_vm4 = vcmask 326912   ;;  %vm894_vm5 = vcmask 392512   ;;  %vm6285_vm6 = vcmask 458112  }
   0x2   :  { %v3372_v2 = vunpack.c.l.bf16 %v3846_v0  ;;  %v3368_v3 = vunpack.c.l.bf16 %v3367_v1  ;;  %v3373_v4 = vunpack.c.h.bf16 %v3846_v0  ;;  %v3369_v5 = vunpack.c.h.bf16 %v3367_v1  ;;  %v3848_v13 = vld [vmem:[%s6253_s0 + $0x18] sm:$0xff]   ;;  %v3849_v18 = vld [vmem:[%s6253_s0 + $0x20] sm:$0xff]   ;;  %v3850_v23 = vld [vmem:[%s6253_s0 + $0x28] sm:$0xff]  }
   0x3   :  { %v3377_v11 = vunpack.c.h.bf16 %v3847_v6  ;;  %v3376_v12 = vunpack.c.l.bf16 %v3847_v6  ;;  %v3381_v16 = vunpack.c.h.bf16 %v3848_v13  ;;  %v3380_v17 = vunpack.c.l.bf16 %v3848_v13  ;;  %v3851_v28 = vld [vmem:[%s6253_s0 + $0x30] sm:$0xff]   ;;  %v3852_v33 = vld [vmem:[%s6253_s0 + $0x38] sm:$0xff]   ;;  %v3853_v38 = vld [vmem:[%s6253_s0 + $0x40] sm:$0xff]  }
   0x4   :  { %v141_v7 = vsel %vm134_vm0, %v3372_v2, 0.0  ;;  %v135_v8 = vsel %vm134_vm0, %v3368_v3, 0.0  ;;  %v144_v9 = vsel %vm134_vm0, %v3373_v4, 0.0  ;;  %v138_v10 = vsel %vm134_vm0, %v3369_v5, 0.0  ;;  %v3854_v43 = vld [vmem:[%s6253_s0 + $0x48] sm:$0xff]   ;;  %v3855_v48 = vld [vmem:[%s6253_s0 + $0x50] sm:$0xff]  }
   0x5   :  { %142 = vadd.xlane.f32.xlu1 %v141_v7  ;;  %136 = vadd.xlane.f32.xlu0 %v135_v8  ;;  %v150_v14 = vsel %vm134_vm0, %v3377_v11, 0.0  ;;  %v147_v15 = vsel %vm134_vm0, %v3376_v12, 0.0  ;;  %v156_v19 = vsel %vm134_vm0, %v3381_v16, 0.0  ;;  %v153_v20 = vsel %vm134_vm0, %v3380_v17, 0.0  ;;  %v3856_v53 = vld [vmem:[%s6253_s0 + $0x58] sm:$0xff]   ;;  %v3857_v58 = vld [vmem:[%s6253_s0 + $0x60] sm:$0xff]  }
   0x6   :  { %v3385_v21 = vunpack.c.h.bf16 %v3849_v18  ;;  %v3384_v22 = vunpack.c.l.bf16 %v3849_v18  ;;  %v3389_v26 = vunpack.c.h.bf16 %v3850_v23  ;;  %v3388_v27 = vunpack.c.l.bf16 %v3850_v23  ;;  %v3858_v63 = vld [vmem:[%s6253_s0 + $0x68] sm:$0xff]   ;;  %v3859_v4 = vld [vmem:[%s6253_s0 + $0x70] sm:$0xff]  }
   0x7   :  { %v3393_v31 = vunpack.c.h.bf16 %v3851_v28  ;;  %v3392_v32 = vunpack.c.l.bf16 %v3851_v28  ;;  %v3397_v36 = vunpack.c.h.bf16 %v3852_v33  ;;  %v3396_v37 = vunpack.c.l.bf16 %v3852_v33 }
   0x8   :  { %v162_v24 = vsel %vm134_vm0, %v3385_v21, 0.0  ;;  %v159_v25 = vsel %vm134_vm0, %v3384_v22, 0.0  ;;  %v168_v29 = vsel %vm134_vm0, %v3389_v26, 0.0  ;;  %v165_v30 = vsel %vm134_vm0, %v3388_v27, 0.0 }
   0x9   :  { %145 = vadd.xlane.f32.xlu1 %v144_v9  ;;  %139 = vadd.xlane.f32.xlu0 %v138_v10  ;;  %v174_v34 = vsel %vm134_vm0, %v3393_v31, 0.0  ;;  %v171_v35 = vsel %vm134_vm0, %v3392_v32, 0.0  ;;  %v180_v39 = vsel %vm134_vm0, %v3397_v36, 0.0  ;;  %v177_v40 = vsel %vm134_vm0, %v3396_v37, 0.0  ;;  %v3860_v9 = vld [vmem:[%s6253_s0 + $0x1e0] sm:$0xff]  }
   0xa   :  { %v3401_v41 = vunpack.c.h.bf16 %v3853_v38  ;;  %v3400_v42 = vunpack.c.l.bf16 %v3853_v38  ;;  %v3405_v46 = vunpack.c.h.bf16 %v3854_v43  ;;  %v3404_v47 = vunpack.c.l.bf16 %v3854_v43 }
   0xb   :  { %v3409_v51 = vunpack.c.h.bf16 %v3855_v48  ;;  %v3408_v52 = vunpack.c.l.bf16 %v3855_v48  ;;  %v3413_v56 = vunpack.c.h.bf16 %v3856_v53  ;;  %v3412_v57 = vunpack.c.l.bf16 %v3856_v53 }
   0xc   :  { %v186_v44 = vsel %vm134_vm0, %v3401_v41, 0.0  ;;  %v183_v45 = vsel %vm134_vm0, %v3400_v42, 0.0  ;;  %v192_v49 = vsel %vm134_vm0, %v3405_v46, 0.0  ;;  %v189_v50 = vsel %vm134_vm0, %v3404_v47, 0.0 }
   0xd   :  { %151 = vadd.xlane.f32.xlu1 %v150_v14  ;;  %148 = vadd.xlane.f32.xlu0 %v147_v15  ;;  %v198_v54 = vsel %vm134_vm0, %v3409_v51, 0.0  ;;  %v195_v55 = vsel %vm134_vm0, %v3408_v52, 0.0  ;;  %v204_v59 = vsel %vm134_vm0, %v3413_v56, 0.0  ;;  %v201_v60 = vsel %vm134_vm0, %v3412_v57, 0.0  ;;  %v3861_v14 = vld [vmem:[%s6253_s0 + $0x1e8] sm:$0xff]  }
   0xe   :  { %v3417_v61 = vunpack.c.h.bf16 %v3857_v58  ;;  %v3416_v62 = vunpack.c.l.bf16 %v3857_v58  ;;  %v3421_v2 = vunpack.c.h.bf16 %v3858_v63  ;;  %v3420_v3 = vunpack.c.l.bf16 %v3858_v63 }
   0xf   :  { %v3425_v7 = vunpack.c.h.bf16 %v3859_v4  ;;  %v3424_v8 = vunpack.c.l.bf16 %v3859_v4  ;;  %v3429_v12 = vunpack.c.h.bf16 %v3860_v9  ;;  %v3428_v13 = vunpack.c.l.bf16 %v3860_v9 }
  0x10   :  { %v210_v0 = vsel %vm134_vm0, %v3417_v61, 0.0  ;;  %v207_v1 = vsel %vm134_vm0, %v3416_v62, 0.0  ;;  %v216_v5 = vsel %vm134_vm0, %v3421_v2, 0.0  ;;  %v213_v6 = vsel %vm134_vm0, %v3420_v3, 0.0 }
  0x11   :  { %157 = vadd.xlane.f32.xlu1 %v156_v19  ;;  %154 = vadd.xlane.f32.xlu0 %v153_v20  ;;  %v222_v10 = vsel %vm134_vm0, %v3425_v7, 0.0  ;;  %v219_v11 = vsel %vm134_vm0, %v3424_v8, 0.0  ;;  %v228_v15 = vsel %vm134_vm0, %v3429_v12, 0.0  ;;  %v225_v16 = vsel %vm134_vm0, %v3428_v13, 0.0  ;;  %v3862_v19 = vld [vmem:[%s6253_s0 + $0x1f0] sm:$0xff]  }
  0x12   :  { %v3433_v17 = vunpack.c.h.bf16 %v3861_v14  ;;  %v3432_v18 = vunpack.c.l.bf16 %v3861_v14  ;;  %v3437_v22 = vunpack.c.h.bf16 %v3862_v19  ;;  %v3436_v23 = vunpack.c.l.bf16 %v3862_v19 }
  0x13   :  { %vm6283_vm7 = vcmask 523712   ;;  %vm6284_vm8 = vcmask 589312   ;;  %vm922_vm9 = vcmask 654912   ;;  %vm929_vm10 = vcmask 720512  }
  0x14   :  { %v234_v20 = vsel %vm134_vm0, %v3433_v17, 0.0  ;;  %v231_v21 = vsel %vm134_vm0, %v3432_v18, 0.0  ;;  %v237_v26 = vsel %vm134_vm0, %v3436_v23, 0.0  ;;  %vm936_vm11 = vcmask 786112  }
  0x15   :  { %163 = vadd.xlane.f32.xlu1 %v162_v24  ;;  %160 = vadd.xlane.f32.xlu0 %v159_v25  ;;  %v3863_v24 = vld [vmem:[%s6253_s0 + $0x1f8] sm:$0xff]   ;;  %v240_v25 = vsel %vm134_vm0, %v3437_v22, 0.0  ;;  %vm943_vm12 = vcmask 851712   ;;  %vm6257_vm13 = vcmask 917312   ;;  %vm957_vm14 = vcmask 982912  }
  0x16   :  { %v3441_v27 = vunpack.c.h.bf16 %v3863_v24  ;;  %v3440_v28 = vunpack.c.l.bf16 %v3863_v24  ;;  %vm964_vm15 = vcmask 1048512  }
  0x18   :  { %v243_v31 = vsel %vm134_vm0, %v3440_v28, 0.0 }
  0x19   :  { %169 = vadd.xlane.f32.xlu1 %v168_v29  ;;  %166 = vadd.xlane.f32.xlu0 %v165_v30  ;;  %v3864_v29 = vld [vmem:[%s6253_s0 + $0x200] sm:$0xff]   ;;  %v246_v30 = vsel %vm134_vm0, %v3441_v27, 0.0 }
  0x1a   :  { %v3445_v32 = vunpack.c.h.bf16 %v3864_v29  ;;  %v3444_v33 = vunpack.c.l.bf16 %v3864_v29 }
  0x1c   :  { %v249_v36 = vsel %vm134_vm0, %v3444_v33, 0.0 }
  0x1d   :  { %175 = vadd.xlane.f32.xlu1 %v174_v34  ;;  %172 = vadd.xlane.f32.xlu0 %v171_v35  ;;  %v3865_v34 = vld [vmem:[%s6253_s0 + $0x208] sm:$0xff]   ;;  %v252_v35 = vsel %vm134_vm0, %v3445_v32, 0.0 }
  0x1e   :  { %v3449_v37 = vunpack.c.h.bf16 %v3865_v34  ;;  %v3448_v38 = vunpack.c.l.bf16 %v3865_v34 }
  0x20   :  { %v255_v41 = vsel %vm134_vm0, %v3448_v38, 0.0 }
  0x21   :  { %181 = vadd.xlane.f32.xlu1 %v180_v39  ;;  %178 = vadd.xlane.f32.xlu0 %v177_v40  ;;  %v3866_v39 = vld [vmem:[%s6253_s0 + $0x210] sm:$0xff]   ;;  %v258_v40 = vsel %vm134_vm0, %v3449_v37, 0.0 }
  0x22   :  { %v3453_v42 = vunpack.c.h.bf16 %v3866_v39  ;;  %v3452_v43 = vunpack.c.l.bf16 %v3866_v39 }
  0x24   :  { %v261_v46 = vsel %vm134_vm0, %v3452_v43, 0.0 }
  0x25   :  { %187 = vadd.xlane.f32.xlu1 %v186_v44  ;;  %184 = vadd.xlane.f32.xlu0 %v183_v45  ;;  %v3867_v44 = vld [vmem:[%s6253_s0 + $0x218] sm:$0xff]   ;;  %v264_v45 = vsel %vm134_vm0, %v3453_v42, 0.0 }
  0x26   :  { %v3457_v47 = vunpack.c.h.bf16 %v3867_v44  ;;  %v3456_v48 = vunpack.c.l.bf16 %v3867_v44 }
  0x28   :  { %v267_v51 = vsel %vm134_vm0, %v3456_v48, 0.0 }
  0x29   :  { %193 = vadd.xlane.f32.xlu1 %v192_v49  ;;  %190 = vadd.xlane.f32.xlu0 %v189_v50  ;;  %v3868_v49 = vld [vmem:[%s6253_s0 + $0x220] sm:$0xff]   ;;  %v270_v50 = vsel %vm134_vm0, %v3457_v47, 0.0 }
  0x2a   :  { %v3461_v52 = vunpack.c.h.bf16 %v3868_v49  ;;  %v3460_v53 = vunpack.c.l.bf16 %v3868_v49 }
  0x2c   :  { %v273_v56 = vsel %vm134_vm0, %v3460_v53, 0.0 }
  0x2d   :  { %199 = vadd.xlane.f32.xlu1 %v198_v54  ;;  %196 = vadd.xlane.f32.xlu0 %v195_v55  ;;  %v3869_v54 = vld [vmem:[%s6253_s0 + $0x228] sm:$0xff]   ;;  %v276_v55 = vsel %vm134_vm0, %v3461_v52, 0.0 }
  0x2e   :  { %v3465_v57 = vunpack.c.h.bf16 %v3869_v54  ;;  %v3464_v58 = vunpack.c.l.bf16 %v3869_v54  ;;  %v3885_v52 = vld [vmem:[%s6253_s0 + $0xc8] sm:$0xff]  }
  0x30   :  { %v279_v61 = vsel %vm134_vm0, %v3464_v58, 0.0  ;;  %v4362_v58 = vld [vmem:[%s6253_s0 + $0x2a8] sm:$0xff]  }
  0x31   :  { %205 = vadd.xlane.f32.xlu1 %v204_v59  ;;  %202 = vadd.xlane.f32.xlu0 %v201_v60  ;;  %v3870_v59 = vld [vmem:[%s6253_s0 + $0x230] sm:$0xff]   ;;  %v282_v60 = vsel %vm134_vm0, %v3465_v57, 0.0 }
  0x32   :  { %v3469_v62 = vunpack.c.h.bf16 %v3870_v59  ;;  %v3468_v63 = vunpack.c.l.bf16 %v3870_v59 }
  0x34   :  { %v285_v2 = vsel %vm134_vm0, %v3468_v63, 0.0 }
  0x35   :  { %211 = vadd.xlane.f32.xlu1 %v210_v0  ;;  %208 = vadd.xlane.f32.xlu0 %v207_v1  ;;  %v3871_v0 = vld [vmem:[%s6253_s0 + $0x238] sm:$0xff]   ;;  %v288_v1 = vsel %vm134_vm0, %v3469_v62, 0.0 }
  0x36   :  { %v3473_v3 = vunpack.c.h.bf16 %v3871_v0  ;;  %v3472_v4 = vunpack.c.l.bf16 %v3871_v0 }
  0x38   :  { %v291_v7 = vsel %vm134_vm0, %v3472_v4, 0.0  ;;  %v4374_v4 = vld [vmem:[%s6253_s0 + $0x90] sm:$0xff]  }
  0x39   :  { %217 = vadd.xlane.f32.xlu1 %v216_v5  ;;  %214 = vadd.xlane.f32.xlu0 %v213_v6  ;;  %v3875_v5 = vld [vmem:[%s6253_s0 + $0x78] sm:$0xff]   ;;  %v294_v6 = vsel %vm134_vm0, %v3473_v3, 0.0 }
  0x3a   :  { %v3489_v8 = vunpack.c.h.bf16 %v3875_v5  ;;  %v3488_v9 = vunpack.c.l.bf16 %v3875_v5 }
  0x3c   :  { %v525_v12 = vsel %vm134_vm0, %v3488_v9, 0.0 }
  0x3d   :  { %223 = vadd.xlane.f32.xlu1 %v222_v10  ;;  %220 = vadd.xlane.f32.xlu0 %v219_v11  ;;  %v3890_v10 = vld [vmem:[%s6253_s0 + $0x258] sm:$0xff]   ;;  %v528_v11 = vsel %vm134_vm0, %v3489_v8, 0.0  ;;  %v3529_v8 = vunpack.c.h.bf16 %v3885_v52 }
  0x3e   :  { %v3549_v13 = vunpack.c.h.bf16 %v3890_v10  ;;  %v3548_v14 = vunpack.c.l.bf16 %v3890_v10 }
  0x40   :  { %v618_v17 = vsel %vm134_vm0, %v3549_v13, 0.0  ;;  %v615_v18 = vsel %vm134_vm0, %v3548_v14, 0.0 }
  0x41   :  { %229 = vadd.xlane.f32.xlu1 %v228_v15  ;;  %226 = vadd.xlane.f32.xlu0 %v225_v16  ;;  %v3883_v15 = vld [vmem:[%s6253_s0 + $0xb8] sm:$0xff]   ;;  %v3876_v16 = vld [vmem:[%s6253_s0 + $0x80] sm:$0xff]  }
  0x42   :  { %v3520_v19 = vunpack.c.l.bf16 %v3883_v15 }
  0x44   :  { %v573_v22 = vsel %vm134_vm0, %v3520_v19, 0.0 }
  0x45   :  { %235 = vadd.xlane.f32.xlu1 %v234_v20  ;;  %232 = vadd.xlane.f32.xlu0 %v231_v21  ;;  %v3492_v20 = vunpack.c.l.bf16 %v3876_v16  ;;  %v3891_v21 = vld [vmem:[%s6253_s0 + $0x260] sm:$0xff]  }
  0x46   :  { %v3552_v24 = vunpack.c.l.bf16 %v3891_v21 }
  0x47   :  { %v531_v23 = vsel %vm134_vm0, %v3492_v20, 0.0 }
  0x48   :  { %v621_v27 = vsel %vm134_vm0, %v3552_v24, 0.0  ;;  %v588_v24 = vsel %vm134_vm0, %v3529_v8, 0.0 }
  0x49   :  { %241 = vadd.xlane.f32.xlu1 %v240_v25  ;;  %238 = vadd.xlane.f32.xlu0 %v237_v26  ;;  %v3521_v25 = vunpack.c.h.bf16 %v3883_v15  ;;  %v3898_v26 = vld [vmem:[%s6253_s0 + $0x298] sm:$0xff]  }
  0x4a   :  { %v3581_v29 = vunpack.c.h.bf16 %v3898_v26 }
  0x4b   :  { %v576_v28 = vsel %vm134_vm0, %v3521_v25, 0.0 }
  0x4c   :  { %v666_v32 = vsel %vm134_vm0, %v3581_v29, 0.0 }
  0x4d   :  { %247 = vadd.xlane.f32.xlu1 %v246_v30  ;;  %244 = vadd.xlane.f32.xlu0 %v243_v31  ;;  %v3580_v30 = vunpack.c.l.bf16 %v3898_v26  ;;  %v3884_v31 = vld [vmem:[%s6253_s0 + $0xc0] sm:$0xff]  }
  0x4e   :  { %v3524_v34 = vunpack.c.l.bf16 %v3884_v31  ;;  %v3525_v44 = vunpack.c.h.bf16 %v3884_v31 }
  0x4f   :  { %v663_v33 = vsel %vm134_vm0, %v3580_v30, 0.0 }
  0x50   :  { %v579_v37 = vsel %vm134_vm0, %v3524_v34, 0.0  ;;  %v582_v48 = vsel %vm134_vm0, %v3525_v44, 0.0  ;;  %v3589_v34 = vunpack.c.h.bf16 %v4362_v58 }
  0x51   :  { %253 = vadd.xlane.f32.xlu1 %v252_v35  ;;  %250 = vadd.xlane.f32.xlu0 %v249_v36  ;;  %v3493_v35 = vunpack.c.h.bf16 %v3876_v16  ;;  %v3899_v36 = vld [vmem:[%s6253_s0 + $0x2a0] sm:$0xff]  }
  0x52   :  { %v3584_v39 = vunpack.c.l.bf16 %v3899_v36  ;;  %v3585_v47 = vunpack.c.h.bf16 %v3899_v36 }
  0x53   :  { %v534_v38 = vsel %vm134_vm0, %v3493_v35, 0.0 }
  0x54   :  { %v669_v42 = vsel %vm134_vm0, %v3584_v39, 0.0  ;;  %v672_v53 = vsel %vm134_vm0, %v3585_v47, 0.0 }
  0x55   :  { %259 = vadd.xlane.f32.xlu1 %v258_v40  ;;  %256 = vadd.xlane.f32.xlu0 %v255_v41  ;;  %v3553_v40 = vunpack.c.h.bf16 %v3891_v21  ;;  %v3877_v41 = vld [vmem:[%s6253_s0 + $0x88] sm:$0xff]  }
  0x56   :  { %v3497_v57 = vunpack.c.h.bf16 %v3877_v41 }
  0x57   :  { %v624_v43 = vsel %vm134_vm0, %v3553_v40, 0.0  ;;  %v4420_v40 = vld [vmem:[%s6253_s0 + $0xd0] sm:$0xff]  }
  0x59   :  { %265 = vadd.xlane.f32.xlu1 %v264_v45  ;;  %262 = vadd.xlane.f32.xlu0 %v261_v46  ;;  %v3496_v45 = vunpack.c.l.bf16 %v3877_v41  ;;  %v3892_v46 = vld [vmem:[%s6253_s0 + $0x268] sm:$0xff]  }
  0x5a   :  { %v3557_v3 = vunpack.c.h.bf16 %v3892_v46 }
  0x5b   :  { %v537_v49 = vsel %vm134_vm0, %v3496_v45, 0.0 }
  0x5d   :  { %271 = vadd.xlane.f32.xlu1 %v270_v50  ;;  %268 = vadd.xlane.f32.xlu0 %v267_v51  ;;  %v3556_v50 = vunpack.c.l.bf16 %v3892_v46  ;;  %v855_v51 = vlaneseq }
  0x5f   :  { %v627_v54 = vsel %vm134_vm0, %v3556_v50, 0.0  ;;  %v4364_v59 = vshrl.u32 %v855_v51, 7 }
  0x61   :  { %277 = vadd.xlane.f32.xlu1 %v276_v55  ;;  %274 = vadd.xlane.f32.xlu0 %v273_v56  ;;  %v4357_v55 = vand.u32 127, %v855_v51  ;;  %v3528_v56 = vunpack.c.l.bf16 %v3885_v52  ;;  %v678_v51 = vsel %vm134_vm0, %v3589_v34, 0.0 }
  0x63   :  { %6286 = vst [vmem:[#allocation2_spill] sm:$0xff] %v4357_v55  ;;  %v868_v62 = vadd.s32 4294967280, %v4357_v55  ;;  %v875_v5 = vadd.s32 4294967272, %v4357_v55  ;;  %v903_v25 = vadd.s32 4294967240, %v4357_v55  ;;  %v896_v26 = vadd.s32 4294967248, %v4357_v55 }
  0x64   :  { %v917_v44 = vadd.s32 4294967224, %v4357_v55 }
  0x65   :  { %283 = vadd.xlane.f32.xlu1 %v282_v60  ;;  %280 = vadd.xlane.f32.xlu0 %v279_v61  ;;  %v861_v60 = vadd.s32 4294967288, %v4357_v55  ;;  %v3588_v61 = vunpack.c.l.bf16 %v4362_v58  ;;  %v4388_v13 = vsub.s32 %v868_v62, %v4364_v59  ;;  %v4393_v19 = vsub.s32 %v875_v5, %v4364_v59 }
  0x66   :  { %v4446_v62 = vsub.s32 %v917_v44, %v4364_v59 }
  0x67   :  { %v4383_v10 = vsub.s32 %v861_v60, %v4364_v59  ;;  %6289 = vst [vmem:[#allocation5_spill] sm:$0xff] %v4388_v13  ;;  %6290 = vst [vmem:[#allocation6_spill] sm:$0xff] %v4393_v19  ;;  %v4442_v60 = vld [vmem:[%s6253_s0 + $0x2b0] sm:$0xff]  }
  0x69   :  { %289 = vadd.xlane.f32.xlu1 %v288_v1  ;;  %286 = vadd.xlane.f32.xlu0 %v285_v2  ;;  %v585_v1 = vsel %vm134_vm0, %v3528_v56, 0.0  ;;  %v540_v2 = vsel %vm134_vm0, %v3497_v57, 0.0  ;;  %6288 = vst [vmem:[#allocation4_spill] sm:$0xff] %v4383_v10 }
  0x6d   :  { %295 = vadd.xlane.f32.xlu1 %v294_v6  ;;  %292 = vadd.xlane.f32.xlu0 %v291_v7  ;;  %v4379_v6 = vsub.s32 %v4357_v55, %v4364_v59  ;;  %v889_v7 = vadd.s32 4294967256, %v4357_v55 }
  0x6f   :  { %6287 = vst [vmem:[#allocation3_spill] sm:$0xff] %v4379_v6 }
  0x71   :  { %529 = vadd.xlane.f32.xlu1 %v528_v11  ;;  %526 = vadd.xlane.f32.xlu0 %v525_v12  ;;  %v882_v11 = vadd.s32 4294967264, %v4357_v55  ;;  %v3500_v12 = vunpack.c.l.bf16 %v4374_v4 }
  0x73   :  { %v4409_v29 = vsub.s32 %v882_v11, %v4364_v59  ;;  %v543_v30 = vsel %vm134_vm0, %v3500_v12, 0.0 }
  0x75   :  { %619 = vadd.xlane.f32.xlu1 %v618_v17  ;;  %616 = vadd.xlane.f32.xlu0 %v615_v18  ;;  %v675_v17 = vsel %vm134_vm0, %v3588_v61, 0.0  ;;  %v630_v18 = vsel %vm134_vm0, %v3557_v3, 0.0  ;;  %6292 = vst [vmem:[#allocation8_spill] sm:$0xff] %v4409_v29  ;;  %v924_v3 = vadd.s32 4294967216, %v4357_v55 }
  0x79   :  { %574 = vadd.xlane.f32.xlu1 %v573_v22  ;;  %532 = vadd.xlane.f32.xlu0 %v531_v23  ;;  %v4398_v22 = vld [vmem:[%s6253_s0 + $0x270] sm:$0xff]   ;;  %v4401_v23 = vsub.s32 %v889_v7, %v4364_v59 }
  0x7a   :  { %v3560_v35 = vunpack.c.l.bf16 %v4398_v22  ;;  %v3561_v11 = vunpack.c.h.bf16 %v4398_v22 }
  0x7b   :  { %6291 = vst [vmem:[#allocation7_spill] sm:$0xff] %v4401_v23 }
  0x7c   :  { %v633_v52 = vsel %vm134_vm0, %v3560_v35, 0.0 }
  0x7d   :  { %622 = vadd.xlane.f32.xlu1 %v621_v27  ;;  %577 = vadd.xlane.f32.xlu0 %v576_v28 }
  0x81   :  { %667 = vadd.xlane.f32.xlu1 %v666_v32  ;;  %664 = vadd.xlane.f32.xlu0 %v663_v33 }
  0x85   :  { %580 = vadd.xlane.f32.xlu1 %v579_v37  ;;  %535 = vadd.xlane.f32.xlu0 %v534_v38 }
  0x89   :  { %670 = vadd.xlane.f32.xlu1 %v669_v42  ;;  %625 = vadd.xlane.f32.xlu0 %v624_v43  ;;  %v4424_v42 = vsub.s32 %v903_v25, %v4364_v59  ;;  %v4427_v43 = vsub.s32 %v896_v26, %v4364_v59  ;;  %v938_v25 = vadd.s32 4294967200, %v4357_v55 }
  0x8b   :  { %6293 = vst [vmem:[#allocation9_spill] sm:$0xff] %v4427_v43  ;;  %v4494_v44 = vsub.s32 %v938_v25, %v4364_v59 }
  0x8d   :  { %583 = vadd.xlane.f32.xlu1 %v582_v48  ;;  %538 = vadd.xlane.f32.xlu0 %v537_v49  ;;  %v910_v48 = vadd.s32 4294967232, %v4357_v55 }
  0x91   :  { %673 = vadd.xlane.f32.xlu1 %v672_v53  ;;  %628 = vadd.xlane.f32.xlu0 %v627_v54  ;;  %v3532_v53 = vunpack.c.l.bf16 %v4420_v40  ;;  %v3501_v54 = vunpack.c.h.bf16 %v4374_v4 }
  0x92   :  { %v143_v63 = vpop.xlane.xlu1 %142  ;;  %v137_v0 = vpop.xlane.xlu0 %136 }
  0x93   :  { %v315_v9 = vmul.f32 0.020408163, %v137_v0  ;;  %v317_v14 = vmul.f32 0.020408163, %v143_v63  ;;  %v931_v63 = vadd.s32 4294967208, %v4357_v55  ;;  %v591_v7 = vsel %vm134_vm0, %v3532_v53, 0.0 }
  0x94   :  { %v546_v8 = vsel %vm134_vm0, %v3501_v54, 0.0 }
  0x95   :  { %586 = vadd.xlane.f32.xlu1 %v585_v1  ;;  %541 = vadd.xlane.f32.xlu0 %v540_v2  ;;  %v1323_v27 = vrot.slane %v315_v9, %v4379_v6  ;;  %v1332_v31 = vrot.slane %v317_v14, %v4388_v13  ;;  %v4452_v2 = vsub.s32 %v910_v48, %v4364_v59  ;;  %v3592_v9 = vunpack.c.l.bf16 %v4442_v60 }
  0x96   :  { %v146_v15 = vpop.xlane.xlu1 %145  ;;  %v140_v16 = vpop.xlane.xlu0 %139 }
  0x97   :  { %v318_v20 = vmul.f32 0.020408163, %v146_v15  ;;  %v316_v21 = vmul.f32 0.020408163, %v140_v16  ;;  %v4463_v16 = vld [vmem:[%s6253_s0 + $0x98] sm:$0xff]  }
  0x99   :  { %v1327_v28 = vrot.slane %v316_v21, %v4383_v10  ;;  %676 = vadd.xlane.f32.xlu1 %v675_v17  ;;  %631 = vadd.xlane.f32.xlu0 %v630_v18  ;;  %v1337_v36 = vrot.slane %v318_v20, %v4393_v19  ;;  %v4467_v18 = vsub.s32 %v931_v63, %v4364_v59  ;;  %v945_v20 = vadd.s32 4294967192, %v4357_v55 }
  0x9a   :  { %v152_v32 = vpop.xlane.xlu1 %151  ;;  %v149_v33 = vpop.xlane.xlu0 %148 }
  0x9b   :  { %v1328_v37 = vsel %vm866_vm1, %v1327_v28, %v1323_v27  ;;  %v320_v38 = vmul.f32 0.020408163, %v152_v32  ;;  %v319_v39 = vmul.f32 0.020408163, %v149_v33  ;;  %v681_v28 = vsel %vm134_vm0, %v3592_v9, 0.0 }
  0x9c   :  { %v1333_v41 = vsel %vm873_vm2, %v1332_v31, %v1328_v37  ;;  %v3533_v31 = vunpack.c.h.bf16 %v4420_v40  ;;  %v3504_v32 = vunpack.c.l.bf16 %v4463_v16 }
  0x9d   :  { %v1347_v45 = vrot.slane %v320_v38, %v4401_v23  ;;  %v1338_v46 = vsel %vm880_vm3, %v1337_v36, %v1333_v41  ;;  %v1342_v47 = vrot.slane %v319_v39, %v4409_v29  ;;  %589 = vadd.xlane.f32.xlu1 %v588_v24  ;;  %544 = vadd.xlane.f32.xlu0 %v543_v30  ;;  %v636_v30 = vsel %vm134_vm0, %v3561_v11, 0.0  ;;  %v4484_v36 = vld [vmem:[%s6253_s0 + $0x278] sm:$0xff]  }
  0x9e   :  { %v158_v49 = vpop.xlane.xlu1 %157  ;;  %v155_v50 = vpop.xlane.xlu0 %154  ;;  %v4473_v24 = vsub.s32 %v924_v3, %v4364_v59  ;;  %v4488_v38 = vsub.s32 %v945_v20, %v4364_v59  ;;  %v959_v39 = vadd.s32 4294967176, %v4357_v55  ;;  %v594_v48 = vsel %vm134_vm0, %v3533_v31, 0.0 }
  0x9f   :  { %v1343_v56 = vsel %vm887_vm4, %v1342_v47, %v1338_v46  ;;  %v322_v57 = vmul.f32 0.020408163, %v158_v49  ;;  %v321_v58 = vmul.f32 0.020408163, %v155_v50  ;;  %v549_v49 = vsel %vm134_vm0, %v3504_v32, 0.0 }
  0xa0   :  { %v1348_v61 = vsel %vm894_vm5, %v1347_v45, %v1343_v56  ;;  %v952_v45 = vadd.s32 4294967184, %v4357_v55  ;;  %v3593_v50 = vunpack.c.h.bf16 %v4442_v60  ;;  %v3887_v56 = vld [vmem:[%s6253_s0 + $0xd8] sm:$0xff]   ;;  %v3565_v25 = vunpack.c.h.bf16 %v4484_v36 }
  0xa1   :  { %v1357_v0 = vrot.slane %v322_v57, %v4424_v42  ;;  %v1352_v1 = vrot.slane %v321_v58, %v4427_v43  ;;  %679 = vadd.xlane.f32.xlu1 %v678_v51  ;;  %634 = vadd.xlane.f32.xlu0 %v633_v52  ;;  %v3564_v51 = vunpack.c.l.bf16 %v4484_v36  ;;  %v4507_v58 = vsub.s32 %v959_v39, %v4364_v59 }
  0xa2   :  { %v164_v4 = vpop.xlane.xlu1 %163  ;;  %v161_v5 = vpop.xlane.xlu0 %160  ;;  %v4512_v63 = vsub.s32 %v952_v45, %v4364_v59  ;;  %v684_v3 = vsel %vm134_vm0, %v3593_v50, 0.0  ;;  %v3537_v39 = vunpack.c.h.bf16 %v3887_v56 }
  0xa3   :  { %v1353_v12 = vsel %vm6285_vm6, %v1352_v1, %v1348_v61  ;;  %v324_v14 = vmul.f32 0.020408163, %v164_v4  ;;  %v323_v15 = vmul.f32 0.020408163, %v161_v5  ;;  %6294 = vst [vmem:[#allocation10_spill] sm:$0xff] %v4507_v58  ;;  %v639_v4 = vsel %vm134_vm0, %v3564_v51, 0.0 }
  0xa4   :  { %v1358_v17 = vsel %vm6283_vm7, %v1357_v0, %v1353_v12  ;;  %6295 = vst [vmem:[#allocation11_spill] sm:$0xff] %v4512_v63  ;;  %v3536_v5 = vunpack.c.l.bf16 %v3887_v56  ;;  %v3902_v12 = vld [vmem:[%s6253_s0 + $0x2b8] sm:$0xff]  }
  0xa5   :  { %v1367_v21 = vrot.slane %v324_v14, %v4446_v62  ;;  %v1362_v22 = vrot.slane %v323_v15, %v4452_v2  ;;  %592 = vadd.xlane.f32.xlu1 %v591_v7  ;;  %547 = vadd.xlane.f32.xlu0 %v546_v8  ;;  %v3505_v7 = vunpack.c.h.bf16 %v4463_v16 }
  0xa6   :  { %v170_v26 = vpop.xlane.xlu1 %169  ;;  %v167_v27 = vpop.xlane.xlu0 %166  ;;  %v597_v20 = vsel %vm134_vm0, %v3536_v5, 0.0 }
  0xa7   :  { %v1363_v33 = vsel %vm6284_vm8, %v1362_v22, %v1358_v17  ;;  %v326_v34 = vmul.f32 0.020408163, %v170_v26  ;;  %v325_v35 = vmul.f32 0.020408163, %v167_v27  ;;  %v3596_v22 = vunpack.c.l.bf16 %v3902_v12 }
  0xa8   :  { %v1368_v37 = vsel %vm922_vm9, %v1367_v21, %v1363_v33  ;;  %v552_v21 = vsel %vm134_vm0, %v3505_v7, 0.0 }
  0xa9   :  { %v1377_v40 = vrot.slane %v326_v34, %v4467_v18  ;;  %v1372_v41 = vrot.slane %v325_v35, %v4473_v24  ;;  %682 = vadd.xlane.f32.xlu1 %v681_v28  ;;  %637 = vadd.xlane.f32.xlu0 %v636_v30  ;;  %v3880_v28 = vld [vmem:[%s6253_s0 + $0xa0] sm:$0xff]   ;;  %v687_v36 = vsel %vm134_vm0, %v3596_v22, 0.0 }
  0xaa   :  { %v176_v46 = vpop.xlane.xlu1 %175  ;;  %v173_v47 = vpop.xlane.xlu0 %172 }
  0xab   :  { %v1373_v52 = vsel %vm929_vm10, %v1372_v41, %v1368_v37  ;;  %v328_v53 = vmul.f32 0.020408163, %v176_v46  ;;  %v327_v54 = vmul.f32 0.020408163, %v173_v47  ;;  %v642_v37 = vsel %vm134_vm0, %v3565_v25, 0.0  ;;  %v3895_v47 = vld [vmem:[%s6253_s0 + $0x280] sm:$0xff]  }
  0xac   :  { %v1378_v57 = vsel %vm936_vm11, %v1377_v40, %v1373_v52  ;;  %v3508_v40 = vunpack.c.l.bf16 %v3880_v28  ;;  %v600_v52 = vsel %vm134_vm0, %v3537_v39, 0.0  ;;  %v3568_v56 = vunpack.c.l.bf16 %v3895_v47 }
  0xad   :  { %v1387_v61 = vrot.slane %v328_v53, %v4488_v38  ;;  %v1382_v60 = vrot.slane %v327_v54, %v4494_v44  ;;  %595 = vadd.xlane.f32.xlu1 %v594_v48  ;;  %550 = vadd.xlane.f32.xlu0 %v549_v49  ;;  %v3597_v54 = vunpack.c.h.bf16 %v3902_v12 }
  0xae   :  { %v182_v0 = vpop.xlane.xlu1 %181  ;;  %v179_v1 = vpop.xlane.xlu0 %178  ;;  %v555_v53 = vsel %vm134_vm0, %v3508_v40, 0.0 }
  0xaf   :  { %v1383_v8 = vsel %vm943_vm12, %v1382_v60, %v1378_v57  ;;  %v330_v9 = vmul.f32 0.020408163, %v182_v0  ;;  %v329_v11 = vmul.f32 0.020408163, %v179_v1  ;;  %v3872_v0 = vld [vmem:[%s6253_s0 + $0x240] sm:$0xff]  }
  0xb0   :  { %v1388_v59 = vsel %vm6257_vm13, %v1387_v61, %v1383_v8  ;;  %v690_v8 = vsel %vm134_vm0, %v3597_v54, 0.0  ;;  %v3476_v12 = vunpack.c.l.bf16 %v3872_v0  ;;  %v3477_v40 = vunpack.c.h.bf16 %v3872_v0  ;;  %v766_v54 = vld [vmem:[%s6254_s1 + $0xf8] sm:$0xff] }
  0xb1   :  { %v1397_v14 = vrot.slane %v330_v9, %v4507_v58  ;;  %v1392_v15 = vrot.slane %v329_v11, %v4512_v63  ;;  %685 = vadd.xlane.f32.xlu1 %v684_v3  ;;  %640 = vadd.xlane.f32.xlu0 %v639_v4  ;;  %v645_v9 = vsel %vm134_vm0, %v3568_v56, 0.0  ;;  %v3509_v11 = vunpack.c.h.bf16 %v3880_v28 }
  0xb2   :  { %v188_v17 = vpop.xlane.xlu1 %187  ;;  %v185_v16 = vpop.xlane.xlu0 %184  ;;  %v3569_v28 = vunpack.c.h.bf16 %v3895_v47 }
  0xb3   :  { %v332_v26 = vmul.f32 0.020408163, %v188_v17  ;;  %v331_v27 = vmul.f32 0.020408163, %v185_v16  ;;  %v1393_v30 = vsel %vm957_vm14, %v1392_v15, %v1388_v59  ;;  %v4559_v17 = vld [vmem:[%s6253_s0 + $0xe0] sm:$0xff]  }
  0xb4   :  { %v4532_v31 = vsel %vm964_vm15, %v1397_v14, %v1393_v30  ;;  %v3540_v30 = vunpack.c.l.bf16 %v4559_v17 }
  0xb5   :  { %v1406_v32 = vrot.slane %v332_v26, %v4383_v10  ;;  %v1402_v33 = vrot.slane %v331_v27, %v4379_v6  ;;  %598 = vadd.xlane.f32.xlu1 %v597_v20  ;;  %553 = vadd.xlane.f32.xlu0 %v552_v21  ;;  %v558_v26 = vsel %vm134_vm0, %v3509_v11, 0.0  ;;  %v297_v27 = vsel %vm134_vm0, %v3476_v12, 0.0  ;;  %v4607_v11 = vld [vmem:[%s6253_s0 + $0x288] sm:$0xff]  }
  0xb6   :  { %v194_v34 = vpop.xlane.xlu1 %193  ;;  %v191_v35 = vpop.xlane.xlu0 %190  ;;  %v603_v47 = vsel %vm134_vm0, %v3540_v30, 0.0  ;;  %v6258_v12 = vmov 0.0|0.0  }
  0xb7   :  { %v1407_v41 = vsel %vm866_vm1, %v1406_v32, %v1402_v33  ;;  %v334_v45 = vmul.f32 0.020408163, %v194_v34  ;;  %v333_v46 = vmul.f32 0.020408163, %v191_v35  ;;  %v4571_v35 = vld [vmem:[%s6253_s0 + $0x2c0] sm:$0xff]   ;;  %3965 = vmatprep.subr.bf16.mxu0 %v6258_v12  ;;  %4010 = vmatprep.subr.bf16.mxu1 %v6258_v12 }
  0xb9   :  { %v1416_v48 = vrot.slane %v334_v45, %v4393_v19  ;;  %v1411_v49 = vrot.slane %v333_v46, %v4388_v13  ;;  %688 = vadd.xlane.f32.xlu1 %v687_v36  ;;  %643 = vadd.xlane.f32.xlu0 %v642_v37  ;;  %v648_v46 = vsel %vm134_vm0, %v3569_v28, 0.0 }
  0xba   :  { %v200_v50 = vpop.xlane.xlu1 %199  ;;  %v197_v51 = vpop.xlane.xlu0 %196 }
  0xbb   :  { %v1412_v57 = vsel %vm873_vm2, %v1411_v49, %v1407_v41  ;;  %v336_v61 = vmul.f32 0.020408163, %v200_v50  ;;  %v335_v60 = vmul.f32 0.020408163, %v197_v51  ;;  %v4582_v49 = vld [vmem:[%s6253_s0 + $0xa8] sm:$0xff]  }
  0xbc   :  { %v1417_v1 = vsel %vm880_vm3, %v1416_v48, %v1412_v57  ;;  %v3600_v48 = vunpack.c.l.bf16 %v4571_v35  ;;  %v375_v57 = vld [vmem:[%s6254_s1] sm:$0xff] }
  0xbd   :  { %v1426_v3 = vrot.slane %v336_v61, %v4401_v23  ;;  %v1421_v4 = vrot.slane %v335_v60, %v4409_v29  ;;  %601 = vadd.xlane.f32.xlu1 %v600_v52  ;;  %556 = vadd.xlane.f32.xlu0 %v555_v53  ;;  %v765_v53 = vld [vmem:[%s6254_s1 + $0xf0] sm:$0xff]  ;;  %v376_v61 = vld [vmem:[%s6254_s1 + $0x8] sm:$0xff] }
  0xbe   :  { %v206_v5 = vpop.xlane.xlu1 %205  ;;  %v203_v7 = vpop.xlane.xlu0 %202 }
  0xbf   :  { %v1422_v59 = vsel %vm887_vm4, %v1421_v4, %v1417_v1  ;;  %v338_v14 = vmul.f32 0.020408163, %v206_v5  ;;  %v337_v15 = vmul.f32 0.020408163, %v203_v7  ;;  %v300_v1 = vsel %vm134_vm0, %v3477_v40, 0.0  ;;  %v4635_v40 = vld [vmem:[%s6253_s0 + $0x248] sm:$0xff]  }
  0xc0   :  { %v1427_v16 = vsel %vm894_vm5, %v1426_v3, %v1422_v59  ;;  %v3966_v3 = vpack.c.bf16 %v766_v54, %v765_v53  ;;  %v693_v7 = vsel %vm134_vm0, %v3600_v48, 0.0  ;;  %v4011_v59 = vpack.c.bf16 %v376_v61, %v375_v57 }
  0xc1   :  { %v1436_v20 = vrot.slane %v338_v14, %v4424_v42  ;;  %v1431_v21 = vrot.slane %v337_v15, %v4427_v43  ;;  %691 = vadd.xlane.f32.xlu1 %v690_v8  ;;  %646 = vadd.xlane.f32.xlu0 %v645_v9  ;;  %v3541_v8 = vunpack.c.h.bf16 %v4559_v17  ;;  %v3512_v9 = vunpack.c.l.bf16 %v4582_v49  ;;  %v767_v17 = vld [vmem:[%s6254_s1 + $0x100] sm:$0xff] }
  0xc2   :  { %v212_v22 = vpop.xlane.xlu1 %211  ;;  %v209_v25 = vpop.xlane.xlu0 %208  ;;  %3967 = vmatpush1.bf16.msra.mxu0 %v3966_v3  ;;  %4012 = vmatpush1.bf16.msra.mxu1 %v4011_v59  ;;  %v3480_v3 = vunpack.c.l.bf16 %v4635_v40 }
  0xc3   :  { %v1432_v32 = vsel %vm6285_vm6, %v1431_v21, %v1427_v16  ;;  %v340_v33 = vmul.f32 0.020408163, %v212_v22  ;;  %v339_v34 = vmul.f32 0.020408163, %v209_v25  ;;  %3968 = vmatprep.subr.bf16.mxu0 %v6258_v12  ;;  %v377_v22 = vld [vmem:[%s6254_s1 + $0x10] sm:$0xff]  ;;  %v378_v25 = vld [vmem:[%s6254_s1 + $0x18] sm:$0xff]  ;;  %4013 = vmatprep.subr.bf16.mxu1 %v6258_v12 }
  0xc4   :  { %v1437_v36 = vsel %vm6283_vm7, %v1436_v20, %v1432_v32  ;;  %v768_v20 = vld [vmem:[%s6254_s1 + $0x108] sm:$0xff]  ;;  %v4014_v30 = vpack.c.bf16 %v378_v25, %v377_v22 }
  0xc5   :  { %v1446_v37 = vrot.slane %v340_v33, %v4446_v62  ;;  %v1441_v39 = vrot.slane %v339_v34, %v4452_v2  ;;  %559 = vadd.xlane.f32.xlu1 %v558_v26  ;;  %298 = vadd.xlane.f32.xlu0 %v297_v27  ;;  %v3969_v21 = vpack.c.bf16 %v768_v20, %v767_v17  ;;  %v606_v34 = vsel %vm134_vm0, %v3541_v8, 0.0 }
  0xc6   :  { %v218_v41 = vpop.xlane.xlu1 %217  ;;  %v215_v45 = vpop.xlane.xlu0 %214  ;;  %4015 = vmatpush1.bf16.msra.mxu1 %v4014_v30  ;;  %v4690_v30 = vld [vmem:[%s6253_s0 + $0x2c8] sm:$0xff]  }
  0xc7   :  { %v1442_v50 = vsel %vm6284_vm8, %v1441_v39, %v1437_v36  ;;  %v342_v51 = vmul.f32 0.020408163, %v218_v41  ;;  %v341_v52 = vmul.f32 0.020408163, %v215_v45  ;;  %v561_v36 = vsel %vm134_vm0, %v3512_v9, 0.0  ;;  %3970 = vmatpush1.bf16.msra.mxu0 %v3969_v21  ;;  %4016 = vmatprep.subr.bf16.mxu1 %v6258_v12  ;;  %v771_v9 = vld [vmem:[%s6254_s1 + $0x120] sm:$0xff] }
  0xc8   :  { %v1447_v56 = vsel %vm922_vm9, %v1446_v37, %v1442_v50  ;;  %v3601_v37 = vunpack.c.h.bf16 %v4571_v35  ;;  %v3572_v39 = vunpack.c.l.bf16 %v4607_v11  ;;  %v770_v35 = vld [vmem:[%s6254_s1 + $0x118] sm:$0xff]  ;;  %3971 = vmatprep.subr.bf16.mxu0 %v6258_v12  ;;  %v379_v50 = vld [vmem:[%s6254_s1 + $0x20] sm:$0xff] }
  0xc9   :  { %v1456_v60 = vrot.slane %v342_v51, %v4467_v18  ;;  %v1451_v0 = vrot.slane %v341_v52, %v4473_v24  ;;  %649 = vadd.xlane.f32.xlu1 %v648_v46  ;;  %604 = vadd.xlane.f32.xlu0 %v603_v47  ;;  %v769_v46 = vld [vmem:[%s6254_s1 + $0x110] sm:$0xff]  ;;  %v380_v51 = vld [vmem:[%s6254_s1 + $0x28] sm:$0xff] }
  0xca   :  { %v224_v4 = vpop.xlane.xlu1 %223  ;;  %v221_v5 = vpop.xlane.xlu0 %220  ;;  %v3972_v48 = vpack.c.bf16 %v770_v35, %v769_v46 }
  0xcb   :  { %v1452_v14 = vsel %vm929_vm10, %v1451_v0, %v1447_v56  ;;  %v344_v15 = vmul.f32 0.020408163, %v224_v4  ;;  %v343_v16 = vmul.f32 0.020408163, %v221_v5  ;;  %v4017_v56 = vpack.c.bf16 %v380_v51, %v379_v50  ;;  %v4664_v4 = vld [vmem:[%s6253_s0 + $0xe8] sm:$0xff]  }
  0xcc   :  { %v1457_v26 = vsel %vm936_vm11, %v1456_v60, %v1452_v14  ;;  %v696_v60 = vsel %vm134_vm0, %v3601_v37, 0.0  ;;  %v651_v0 = vsel %vm134_vm0, %v3572_v39, 0.0  ;;  %3973 = vmatpush1.bf16.msra.mxu0 %v3972_v48  ;;  %v381_v14 = vld [vmem:[%s6254_s1 + $0x30] sm:$0xff] }
  0xcd   :  { %v1466_v27 = vrot.slane %v344_v15, %v4488_v38  ;;  %v1461_v28 = vrot.slane %v343_v16, %v4494_v44  ;;  %301 = vadd.xlane.f32.xlu1 %v300_v1  ;;  %694 = vadd.xlane.f32.xlu0 %v693_v7  ;;  %v3513_v1 = vunpack.c.h.bf16 %v4582_v49  ;;  %v772_v49 = vld [vmem:[%s6254_s1 + $0x128] sm:$0xff]  ;;  %v382_v15 = vld [vmem:[%s6254_s1 + $0x38] sm:$0xff] }
  0xce   :  { %v230_v32 = vpop.xlane.xlu1 %229  ;;  %v227_v33 = vpop.xlane.xlu0 %226  ;;  %4018 = vmatpush1.bf16.msra.mxu1 %v4017_v56  ;;  %3974 = vmatprep.subr.bf16.mxu0 %v6258_v12  ;;  %v3975_v59 = vpack.c.bf16 %v772_v49, %v771_v9  ;;  %v4020_v20 = vpack.c.bf16 %v382_v15, %v381_v14  ;;  %v3604_v56 = vunpack.c.l.bf16 %v4690_v30 }
  0xcf   :  { %v346_v41 = vmul.f32 0.020408163, %v230_v32  ;;  %v345_v45 = vmul.f32 0.020408163, %v227_v33  ;;  %v1462_v47 = vsel %vm943_vm12, %v1461_v28, %v1457_v26  ;;  %v564_v25 = vsel %vm134_vm0, %v3513_v1, 0.0  ;;  %4019 = vmatprep.subr.bf16.mxu1 %v6258_v12  ;;  %v775_v1 = vld [vmem:[%s6254_s1 + $0x140] sm:$0xff] }
  0xd0   :  { %v4653_v52 = vsel %vm6257_vm13, %v1466_v27, %v1462_v47  ;;  %v303_v26 = vsel %vm134_vm0, %v3480_v3, 0.0  ;;  %v3573_v27 = vunpack.c.h.bf16 %v4607_v11  ;;  %v3544_v28 = vunpack.c.l.bf16 %v4664_v4  ;;  %3976 = vmatpush1.bf16.msra.mxu0 %v3975_v59  ;;  %v774_v11 = vld [vmem:[%s6254_s1 + $0x138] sm:$0xff] }
  0xd1   :  { %6296 = vst [vmem:[#allocation12_spill] sm:$0xff] %v4653_v52  ;;  %v1475_v53 = vrot.slane %v346_v41, %v4383_v10  ;;  %v1471_v54 = vrot.slane %v345_v45, %v4379_v6  ;;  %607 = vadd.xlane.f32.xlu1 %v606_v34  ;;  %562 = vadd.xlane.f32.xlu0 %v561_v36  ;;  %v773_v36 = vld [vmem:[%s6254_s1 + $0x130] sm:$0xff]  ;;  %v383_v41 = vld [vmem:[%s6254_s1 + $0x40] sm:$0xff]  ;;  %v384_v45 = vld [vmem:[%s6254_s1 + $0x48] sm:$0xff] }
  0xd2   :  { %v236_v57 = vpop.xlane.xlu1 %235  ;;  %v233_v61 = vpop.xlane.xlu0 %232  ;;  %4021 = vmatpush1.bf16.msra.mxu1 %v4020_v20  ;;  %3977 = vmatprep.subr.bf16.mxu0 %v6258_v12  ;;  %v3978_v39 = vpack.c.bf16 %v774_v11, %v773_v36  ;;  %v4023_v47 = vpack.c.bf16 %v384_v45, %v383_v41  ;;  %v654_v51 = vsel %vm134_vm0, %v3573_v27, 0.0  ;;  %v3545_v20 = vunpack.c.h.bf16 %v4664_v4  ;;  %v778_v4 = vld [vmem:[%s6254_s1 + $0x158] sm:$0xff]  ;;  %v388_v36 = vld [vmem:[%s6254_s1 + $0x68] sm:$0xff] }
  0xd3   :  { %v1476_v5 = vsel %vm866_vm1, %v1475_v53, %v1471_v54  ;;  %v348_v7 = vmul.f32 0.020408163, %v236_v57  ;;  %v347_v8 = vmul.f32 0.020408163, %v233_v61  ;;  %v609_v53 = vsel %vm134_vm0, %v3544_v28, 0.0  ;;  %v4717_v57 = vld [vmem:[%s6253_s0 + $0xb0] sm:$0xff]   ;;  %4022 = vmatprep.subr.bf16.mxu1 %v6258_v12 }
  0xd4   :  { %v3481_v54 = vunpack.c.h.bf16 %v4635_v40  ;;  %3979 = vmatpush1.bf16.msra.mxu0 %v3978_v39  ;;  %v776_v40 = vld [vmem:[%s6254_s1 + $0x148] sm:$0xff]  ;;  %v777_v28 = vld [vmem:[%s6254_s1 + $0x150] sm:$0xff] }
  0xd5   :  { %v1485_v16 = vrot.slane %v348_v7, %v4393_v19  ;;  %v1480_v17 = vrot.slane %v347_v8, %v4388_v13  ;;  %697 = vadd.xlane.f32.xlu1 %v696_v60  ;;  %652 = vadd.xlane.f32.xlu0 %v651_v0  ;;  %v385_v7 = vld [vmem:[%s6254_s1 + $0x50] sm:$0xff]  ;;  %v386_v8 = vld [vmem:[%s6254_s1 + $0x58] sm:$0xff] }
  0xd6   :  { %v242_v21 = vpop.xlane.xlu1 %241  ;;  %v239_v22 = vpop.xlane.xlu0 %238  ;;  %4024 = vmatpush1.bf16.msra.mxu1 %v4023_v47  ;;  %3980 = vmatprep.subr.bf16.mxu0 %v6258_v12  ;;  %v4026_v59 = vpack.c.bf16 %v386_v8, %v385_v7  ;;  %v3605_v47 = vunpack.c.h.bf16 %v4690_v30  ;;  %v780_v30 = vld [vmem:[%s6254_s1 + $0x168] sm:$0xff] }
  0xd7   :  { %v1481_v32 = vsel %vm873_vm2, %v1480_v17, %v1476_v5  ;;  %v350_v33 = vmul.f32 0.020408163, %v242_v21  ;;  %v349_v34 = vmul.f32 0.020408163, %v239_v22  ;;  %v3981_v5 = vpack.c.bf16 %v776_v40, %v775_v1  ;;  %v4744_v22 = vld [vmem:[%s6253_s0 + $0x290] sm:$0xff]   ;;  %4025 = vmatprep.subr.bf16.mxu1 %v6258_v12  ;;  %v390_v1 = vld [vmem:[%s6254_s1 + $0x78] sm:$0xff] }
  0xd8   :  { %v1486_v37 = vsel %vm880_vm3, %v1485_v16, %v1481_v32  ;;  %v306_v16 = vsel %vm134_vm0, %v3481_v54, 0.0  ;;  %v699_v17 = vsel %vm134_vm0, %v3604_v56, 0.0  ;;  %v3516_v21 = vunpack.c.l.bf16 %v4717_v57  ;;  %v779_v56 = vld [vmem:[%s6254_s1 + $0x160] sm:$0xff] }
  0xd9   :  { %v1495_v46 = vrot.slane %v350_v33, %v4401_v23  ;;  %v1490_v35 = vrot.slane %v349_v34, %v4409_v29  ;;  %565 = vadd.xlane.f32.xlu1 %v564_v25  ;;  %304 = vadd.xlane.f32.xlu0 %v303_v26  ;;  %v3984_v33 = vpack.c.bf16 %v778_v4, %v777_v28  ;;  %v387_v34 = vld [vmem:[%s6254_s1 + $0x60] sm:$0xff] }
  0xda   :  { %v248_v48 = vpop.xlane.xlu1 %247  ;;  %v245_v50 = vpop.xlane.xlu0 %244  ;;  %3982 = vmatpush1.bf16.msra.mxu0 %v3981_v5  ;;  %4027 = vmatpush1.bf16.msra.mxu1 %v4026_v59  ;;  %v4029_v39 = vpack.c.bf16 %v388_v36, %v387_v34  ;;  %v3517_v59 = vunpack.c.h.bf16 %v4717_v57 }
  0xdb   :  { %v1491_v61 = vsel %vm887_vm4, %v1490_v35, %v1486_v37  ;;  %v352_v60 = vmul.f32 0.020408163, %v248_v48  ;;  %v351_v0 = vmul.f32 0.020408163, %v245_v50  ;;  %3983 = vmatprep.subr.bf16.mxu0 %v6258_v12  ;;  %v567_v35 = vsel %vm134_vm0, %v3516_v21, 0.0  ;;  %v4771_v50 = vld [vmem:[%s6253_s0 + $0x250] sm:$0xff]   ;;  %4028 = vmatprep.subr.bf16.mxu1 %v6258_v12 }
  0xdc   :  { %v1496_v3 = vsel %vm894_vm5, %v1495_v46, %v1491_v61  ;;  %v612_v46 = vsel %vm134_vm0, %v3545_v20, 0.0  ;;  %v3576_v48 = vunpack.c.l.bf16 %v4744_v22  ;;  %v781_v20 = vld [vmem:[%s6254_s1 + $0x170] sm:$0xff]  ;;  %v782_v21 = vld [vmem:[%s6254_s1 + $0x178] sm:$0xff]  ;;  %v570_v36 = vsel %vm134_vm0, %v3517_v59, 0.0 }
  0xdd   :  { %v1505_v9 = vrot.slane %v352_v60, %v4424_v42  ;;  %v1500_v49 = vrot.slane %v351_v0, %v4427_v43  ;;  %655 = vadd.xlane.f32.xlu1 %v654_v51  ;;  %610 = vadd.xlane.f32.xlu0 %v609_v53  ;;  %v3987_v60 = vpack.c.bf16 %v780_v30, %v779_v56  ;;  %v389_v0 = vld [vmem:[%s6254_s1 + $0x70] sm:$0xff] }
  0xde   :  { %v254_v14 = vpop.xlane.xlu1 %253  ;;  %v251_v15 = vpop.xlane.xlu0 %250  ;;  %3985 = vmatpush1.bf16.msra.mxu0 %v3984_v33  ;;  %4030 = vmatpush1.bf16.msra.mxu1 %v4029_v39  ;;  %v4032_v5 = vpack.c.bf16 %v390_v1, %v389_v0  ;;  %v3990_v57 = vpack.c.bf16 %v782_v21, %v781_v20  ;;  %v3577_v39 = vunpack.c.h.bf16 %v4744_v22 }
  0xdf   :  { %v1501_v25 = vsel %vm6285_vm6, %v1500_v49, %v1496_v3  ;;  %v354_v26 = vmul.f32 0.020408163, %v254_v14  ;;  %v353_v27 = vmul.f32 0.020408163, %v251_v15  ;;  %3986 = vmatprep.subr.bf16.mxu0 %v6258_v12  ;;  %v657_v49 = vsel %vm134_vm0, %v3576_v48, 0.0  ;;  %4031 = vmatprep.subr.bf16.mxu1 %v6258_v12  ;;  %v784_v48 = vld [vmem:[%s6254_s1 + $0x188] sm:$0xff] }
  0xe0   :  { %v1506_v32 = vsel %vm6283_vm7, %v1505_v9, %v1501_v25  ;;  %v702_v9 = vsel %vm134_vm0, %v3605_v47, 0.0  ;;  %v3484_v14 = vunpack.c.l.bf16 %v4771_v50  ;;  %v783_v47 = vld [vmem:[%s6254_s1 + $0x180] sm:$0xff] }
  0xe1   :  { %v1515_v11 = vrot.slane %v354_v26, %v4446_v62  ;;  %v1510_v37 = vrot.slane %v353_v27, %v4452_v2  ;;  %307 = vadd.xlane.f32.xlu1 %v306_v16  ;;  %700 = vadd.xlane.f32.xlu0 %v699_v17  ;;  %v391_v26 = vld [vmem:[%s6254_s1 + $0x80] sm:$0xff]  ;;  %v392_v27 = vld [vmem:[%s6254_s1 + $0x88] sm:$0xff]  ;;  %v3993_v22 = vpack.c.bf16 %v784_v48, %v783_v47 }
  0xe2   :  { %v260_v41 = vpop.xlane.xlu1 %259  ;;  %v257_v45 = vpop.xlane.xlu0 %256  ;;  %3988 = vmatpush1.bf16.msra.mxu0 %v3987_v60  ;;  %4033 = vmatpush1.bf16.msra.mxu1 %v4032_v5  ;;  %v3920_v5 = vld [vmem:[%s6253_s0 + $0x2d0] sm:$0xff]  }
  0xe3   :  { %v1511_v51 = vsel %vm6284_vm8, %v1510_v37, %v1506_v32  ;;  %v356_v53 = vmul.f32 0.020408163, %v260_v41  ;;  %v355_v54 = vmul.f32 0.020408163, %v257_v45  ;;  %3989 = vmatprep.subr.bf16.mxu0 %v6258_v12  ;;  %v4035_v32 = vpack.c.bf16 %v392_v27, %v391_v26  ;;  %v3905_v41 = vld [vmem:[%s6253_s0 + $0xf0] sm:$0xff]   ;;  %4034 = vmatprep.subr.bf16.mxu1 %v6258_v12 }
  0xe4   :  { %v1516_v61 = vsel %vm922_vm9, %v1515_v11, %v1511_v51  ;;  %v309_v11 = vsel %vm134_vm0, %v3484_v14, 0.0  ;;  %v3485_v37 = vunpack.c.h.bf16 %v4771_v50  ;;  %v393_v50 = vld [vmem:[%s6254_s1 + $0x90] sm:$0xff]  ;;  %v394_v51 = vld [vmem:[%s6254_s1 + $0x98] sm:$0xff]  ;;  %v3609_v30 = vunpack.c.h.bf16 %v3905_v41 }
  0xe5   :  { %v1525_v40 = vrot.slane %v356_v53, %v4467_v18  ;;  %v1520_v3 = vrot.slane %v355_v54, %v4473_v24  ;;  %613 = vadd.xlane.f32.xlu1 %v612_v46  ;;  %568 = vadd.xlane.f32.xlu0 %v567_v35 }
  0xe6   :  { %v266_v7 = vpop.xlane.xlu1 %265  ;;  %v263_v8 = vpop.xlane.xlu0 %262  ;;  %3991 = vmatpush1.bf16.msra.mxu0 %v3990_v57  ;;  %4036 = vmatpush1.bf16.msra.mxu1 %v4035_v32  ;;  %v312_v1 = vsel %vm134_vm0, %v3485_v37, 0.0  ;;  %v3668_v32 = vunpack.c.l.bf16 %v3920_v5 }
  0xe7   :  { %v1521_v15 = vsel %vm929_vm10, %v1520_v3, %v1516_v61  ;;  %v358_v16 = vmul.f32 0.020408163, %v266_v7  ;;  %v357_v17 = vmul.f32 0.020408163, %v263_v8  ;;  %3992 = vmatprep.subr.bf16.mxu0 %v6258_v12  ;;  %v4038_v61 = vpack.c.bf16 %v394_v51, %v393_v50  ;;  %4037 = vmatprep.subr.bf16.mxu1 %v6258_v12 }
  0xe8   :  { %v1526_v25 = vsel %vm936_vm11, %v1525_v40, %v1521_v15  ;;  %v660_v40 = vsel %vm134_vm0, %v3577_v39, 0.0  ;;  %v3608_v3 = vunpack.c.l.bf16 %v3905_v41  ;;  %v395_v15 = vld [vmem:[%s6254_s1 + $0xa0] sm:$0xff] }
  0xe9   :  { %v1535_v28 = vrot.slane %v358_v16, %v4488_v38  ;;  %v1530_v4 = vrot.slane %v357_v17, %v4494_v44  ;;  %703 = vadd.xlane.f32.xlu1 %v702_v9  ;;  %658 = vadd.xlane.f32.xlu0 %v657_v49  ;;  %v785_v9 = vld [vmem:[%s6254_s1 + $0x190] sm:$0xff]  ;;  %v786_v49 = vld [vmem:[%s6254_s1 + $0x198] sm:$0xff]  ;;  %v396_v16 = vld [vmem:[%s6254_s1 + $0xa8] sm:$0xff] }
  0xea   :  { %v272_v33 = vpop.xlane.xlu1 %271  ;;  %v269_v34 = vpop.xlane.xlu0 %268  ;;  %3994 = vmatpush1.bf16.msra.mxu0 %v3993_v22  ;;  %4039 = vmatpush1.bf16.msra.mxu1 %v4038_v61  ;;  %v3996_v14 = vpack.c.bf16 %v786_v49, %v785_v9  ;;  %v4041_v57 = vpack.c.bf16 %v396_v16, %v395_v15  ;;  %v787_v41 = vld [vmem:[%s6254_s1 + $0x1a0] sm:$0xff]  ;;  %v4901_v61 = vld [vmem:[%s6253_s0 + $0x2d8] sm:$0xff]   ;;  %v400_v9 = vld [vmem:[%s6254_s1 + $0xc8] sm:$0xff] }
  0xeb   :  { %v1531_v45 = vsel %vm943_vm12, %v1530_v4, %v1526_v25  ;;  %v360_v46 = vmul.f32 0.020408163, %v272_v33  ;;  %v359_v35 = vmul.f32 0.020408163, %v269_v34  ;;  %3995 = vmatprep.subr.bf16.mxu0 %v6258_v12  ;;  %v1814_v25 = vsel %vm134_vm0, %v3609_v30, 0.0  ;;  %v4866_v33 = vld [vmem:[%s6253_s0 + $0x130] sm:$0xff]   ;;  %4040 = vmatprep.subr.bf16.mxu1 %v6258_v12 }
  0xec   :  { %v1536_v53 = vsel %vm6257_vm13, %v1535_v28, %v1531_v45  ;;  %vm1183_vm13 = vcmask 1041409   ;;  %v1811_v28 = vsel %vm134_vm0, %v3608_v3, 0.0  ;;  %v3669_v4 = vunpack.c.h.bf16 %v3920_v5  ;;  %v4871_v34 = vld [vmem:[%s6253_s0 + $0xf8] sm:$0xff]   ;;  %v788_v45 = vld [vmem:[%s6254_s1 + $0x1a8] sm:$0xff] }
  0xed   :  { %v1545_v54 = vrot.slane %v360_v46, %v4507_v58  ;;  %v1540_v56 = vrot.slane %v359_v35, %v4512_v63  ;;  %571 = vadd.xlane.f32.xlu1 %v570_v36  ;;  %310 = vadd.xlane.f32.xlu0 %v309_v11  ;;  %v3999_v46 = vpack.c.bf16 %v788_v45, %v787_v41  ;;  %v398_v35 = vld [vmem:[%s6254_s1 + $0xb8] sm:$0xff]  ;;  %v3612_v30 = vunpack.c.l.bf16 %v4871_v34  ;;  %v401_v45 = vld [vmem:[%s6254_s1 + $0xd0] sm:$0xff] }
  0xee   :  { %v278_v60 = vpop.xlane.xlu1 %277  ;;  %v275_v0 = vpop.xlane.xlu0 %274  ;;  %3997 = vmatpush1.bf16.msra.mxu0 %v3996_v14  ;;  %4042 = vmatpush1.bf16.msra.mxu1 %v4041_v57  ;;  %v790_v3 = vld [vmem:[%s6254_s1 + $0x1b8] sm:$0xff]  ;;  %v3928_v57 = vld [vmem:[%s6253_s0 + $0x310] sm:$0xff]  }
  0xef   :  { %v362_v7 = vmul.f32 0.020408163, %v278_v60  ;;  %v361_v8 = vmul.f32 0.020408163, %v275_v0  ;;  %v1541_v59 = vsel %vm957_vm14, %v1540_v56, %v1536_v53  ;;  %3998 = vmatprep.subr.bf16.mxu0 %v6258_v12  ;;  %v1904_v53 = vsel %vm134_vm0, %v3669_v4, 0.0  ;;  %4043 = vmatprep.subr.bf16.mxu1 %v6258_v12 }
  0xf0   :  { %v1546_v17 = vsel %vm964_vm15, %v1545_v54, %v1541_v59  ;;  %v1901_v54 = vsel %vm134_vm0, %v3668_v32, 0.0  ;;  %v3640_v56 = vunpack.c.l.bf16 %v4866_v33  ;;  %v791_v32 = vld [vmem:[%s6254_s1 + $0x1c0] sm:$0xff] }
  0xf1   :  { %v1554_v20 = vrot.slane %v362_v7, %v4383_v10  ;;  %v1550_v21 = vrot.slane %v361_v8, %v4379_v6  ;;  %313 = vadd.xlane.f32.xlu1 %v312_v1  ;;  %661 = vadd.xlane.f32.xlu0 %v660_v40  ;;  %v4876_v36 = vsel %vm1183_vm13, %v1546_v17, %v4532_v31  ;;  %v397_v31 = vld [vmem:[%s6254_s1 + $0xb0] sm:$0xff]  ;;  %v399_v8 = vld [vmem:[%s6254_s1 + $0xc0] sm:$0xff] }
  0xf2   :  { %v284_v26 = vpop.xlane.xlu1 %283  ;;  %v281_v27 = vpop.xlane.xlu0 %280  ;;  %6297 = vst [vmem:[#allocation13_spill] sm:$0xff] %v4876_v36  ;;  %v4044_v22 = vpack.c.bf16 %v398_v35, %v397_v31  ;;  %4000 = vmatpush1.bf16.msra.mxu0 %v3999_v46  ;;  %v789_v40 = vld [vmem:[%s6254_s1 + $0x1b0] sm:$0xff]  ;;  %v4047_v14 = vpack.c.bf16 %v400_v9, %v399_v8  ;;  %v1859_v17 = vsel %vm134_vm0, %v3640_v56, 0.0  ;;  %v402_v46 = vld [vmem:[%s6254_s1 + $0xd8] sm:$0xff]  ;;  %v404_v8 = vld [vmem:[%s6254_s1 + $0xe8] sm:$0xff] }
  0xf3   :  { %v1555_v11 = vsel %vm866_vm1, %v1554_v20, %v1550_v21  ;;  %v364_v37 = vmul.f32 0.020408163, %v284_v26  ;;  %v363_v39 = vmul.f32 0.020408163, %v281_v27  ;;  %4001 = vmatprep.subr.bf16.mxu0 %v6258_v12  ;;  %v4002_v7 = vpack.c.bf16 %v790_v3, %v789_v40  ;;  %v4953_v56 = vld [vmem:[%s6253_s0 + $0x138] sm:$0xff]  }
  0xf4   :  { %4045 = vmatpush1.bf16.msra.mxu1 %v4044_v22  ;;  %v1817_v20 = vsel %vm134_vm0, %v3612_v30, 0.0  ;;  %v3672_v21 = vunpack.c.l.bf16 %v4901_v61  ;;  %v3700_v22 = vunpack.c.l.bf16 %v3928_v57 }
  0xf5   :  { %v1564_v47 = vrot.slane %v364_v37, %v4393_v19  ;;  %v1559_v48 = vrot.slane %v363_v39, %v4388_v13  ;;  %1815 = vadd.xlane.f32.xlu1 %v1814_v25  ;;  %1812 = vadd.xlane.f32.xlu0 %v1811_v28  ;;  %v3641_v25 = vunpack.c.h.bf16 %v4866_v33  ;;  %v792_v33 = vld [vmem:[%s6254_s1 + $0x1c8] sm:$0xff]  ;;  %v3701_v39 = vunpack.c.h.bf16 %v3928_v57 }
  0xf6   :  { %v290_v50 = vpop.xlane.xlu1 %289  ;;  %v287_v51 = vpop.xlane.xlu0 %286  ;;  %4046 = vmatprep.subr.bf16.mxu1 %v6258_v12  ;;  %4003 = vmatpush1.bf16.msra.mxu0 %v4002_v7  ;;  %v4005_v41 = vpack.c.bf16 %v792_v33, %v791_v32  ;;  %v403_v7 = vld [vmem:[%s6254_s1 + $0xe0] sm:$0xff]  ;;  %v3673_v33 = vunpack.c.h.bf16 %v4901_v61 }
  0xf7   :  { %v1560_v60 = vsel %vm873_vm2, %v1559_v48, %v1555_v11  ;;  %v366_v0 = vmul.f32 0.020408163, %v290_v50  ;;  %v365_v1 = vmul.f32 0.020408163, %v287_v51  ;;  %4004 = vmatprep.subr.bf16.mxu0 %v6258_v12  ;;  %v1862_v48 = vsel %vm134_vm0, %v3641_v25, 0.0  ;;  %v4982_v25 = vld [vmem:[%s6253_s0 + $0x318] sm:$0xff]  }
  0xf8   :  { %v1565_v5 = vsel %vm880_vm3, %v1564_v47, %v1560_v60  ;;  %4048 = vmatpush1.bf16.msra.mxu1 %v4047_v14  ;;  %v1907_v47 = vsel %vm134_vm0, %v3672_v21, 0.0  ;;  %v4050_v50 = vpack.c.bf16 %v402_v46, %v401_v45  ;;  %v793_v60 = vld [vmem:[%s6254_s1 + $0x1d0] sm:$0xff]  ;;  %v1952_v3 = vsel %vm134_vm0, %v3701_v39, 0.0  ;;  %v3935_v39 = vld [vmem:[%s6253_s0 + $0x168] sm:$0xff]  }
  0xf9   :  { %v1574_v49 = vrot.slane %v366_v0, %v4401_v23  ;;  %v1569_v59 = vrot.slane %v365_v1, %v4409_v29  ;;  %1905 = vadd.xlane.f32.xlu1 %v1904_v53  ;;  %1902 = vadd.xlane.f32.xlu0 %v1901_v54  ;;  %v794_v0 = vld [vmem:[%s6254_s1 + $0x1d8] sm:$0xff]  ;;  %v3644_v14 = vunpack.c.l.bf16 %v4953_v56  ;;  %v3704_v32 = vunpack.c.l.bf16 %v4982_v25 }
  0xfa   :  { %v296_v15 = vpop.xlane.xlu1 %295  ;;  %v293_v16 = vpop.xlane.xlu0 %292  ;;  %4049 = vmatprep.subr.bf16.mxu1 %v6258_v12  ;;  %4006 = vmatpush1.bf16.msra.mxu0 %v4005_v41  ;;  %v1910_v61 = vsel %vm134_vm0, %v3673_v33, 0.0  ;;  %v5025_v33 = vld [vmem:[%s6253_s0 + $0x2e0] sm:$0xff]  }
  0xfb   :  { %v1570_v26 = vsel %vm887_vm4, %v1569_v59, %v1565_v5  ;;  %v368_v27 = vmul.f32 0.020408163, %v296_v15  ;;  %v367_v28 = vmul.f32 0.020408163, %v293_v16  ;;  %4007 = vmatprep.subr.bf16.mxu0 %v6258_v12  ;;  %v4008_v5 = vpack.c.bf16 %v794_v0, %v793_v60 }
  0xfc   :  { %v1575_v4 = vsel %vm894_vm5, %v1574_v49, %v1570_v26  ;;  %4051 = vmatpush1.bf16.msra.mxu1 %v4050_v50  ;;  %v1949_v59 = vsel %vm134_vm0, %v3700_v22, 0.0  ;;  %v3613_v15 = vunpack.c.h.bf16 %v4871_v34  ;;  %v4053_v16 = vpack.c.bf16 %v404_v8, %v403_v7 }
  0xfd   :  { %v1584_v11 = vrot.slane %v368_v27, %v4424_v42  ;;  %v1579_v37 = vrot.slane %v367_v28, %v4427_v43  ;;  %1860 = vadd.xlane.f32.xlu1 %v1859_v17  ;;  %1818 = vadd.xlane.f32.xlu0 %v1817_v20  ;;  %v1865_v28 = vsel %vm134_vm0, %v3644_v14, 0.0 }
  0xfe   :  { %v530_v31 = vpop.xlane.xlu1 %529  ;;  %v527_v35 = vpop.xlane.xlu0 %526  ;;  %4052 = vmatprep.subr.bf16.mxu1 %v6258_v12  ;;  %4009 = vmatpush1.bf16.msra.mxu0 %v4008_v5 }
  0xff   :  { %v1580_v51 = vsel %vm6285_vm6, %v1579_v37, %v1575_v4  ;;  %v706_v53 = vmul.f32 0.020408163, %v530_v31  ;;  %v705_v54 = vmul.f32 0.020408163, %v527_v35  ;;  %4055 = vmatprep.subr.bf16.mxu0 %v6258_v12  ;;  %v1820_v4 = vsel %vm134_vm0, %v3613_v15, 0.0  ;;  %v5013_v15 = vld [vmem:[%s6253_s0 + $0x100] sm:$0xff]  }
 0x100   :  { %v4956_v30 = vsel %vm6283_vm7, %v1584_v11, %v1580_v51  ;;  %4054 = vmatpush1.bf16.msra.mxu1 %v4053_v16  ;;  %v1955_v35 = vsel %vm134_vm0, %v3704_v32, 0.0 }
 0x101   :  { %v865_v1 = vrot.slane %v706_v53, %v4383_v10  ;;  %v860_v40 = vrot.slane %v705_v54, %v4379_v6  ;;  %1908 = vadd.xlane.f32.xlu1 %v1907_v47  ;;  %1863 = vadd.xlane.f32.xlu0 %v1862_v48  ;;  %v3729_v47 = vunpack.c.h.bf16 %v3935_v39  ;;  %v3728_v48 = vunpack.c.l.bf16 %v3935_v39  ;;  %v3950_v53 = vld [vmem:[%s6253_s0 + $0x348] sm:$0xff]  }
 0x102   :  { %v620_v9 = vpop.xlane.xlu1 %619  ;;  %v617_v49 = vpop.xlane.xlu0 %616  ;;  %4100 = vmatprep.subr.bf16.mxu1 %v6258_v12  ;;  %v3789_v7 = vunpack.c.h.bf16 %v3950_v53  ;;  %v3788_v8 = vunpack.c.l.bf16 %v3950_v53 }
 0x103   :  { %v867_v17 = vsel %vm866_vm1, %v865_v1, %v860_v40  ;;  %v736_v20 = vmul.f32 0.020408163, %v620_v9  ;;  %v735_v21 = vmul.f32 0.020408163, %v617_v49  ;;  %v2633_v5 = vsel %vm134_vm0, %v3728_v48, 0.0 }
 0x105   :  { %v1042_v57 = vrot.slane %v736_v20, %v4383_v10  ;;  %v1038_v34 = vrot.slane %v735_v21, %v4379_v6  ;;  %1953 = vadd.xlane.f32.xlu1 %v1952_v3  ;;  %1950 = vadd.xlane.f32.xlu0 %v1949_v59  ;;  %v2636_v3 = vsel %vm134_vm0, %v3729_v47, 0.0 }
 0x106   :  { %v575_v26 = vpop.xlane.xlu1 %574  ;;  %v533_v27 = vpop.xlane.xlu0 %532 }
 0x107   :  { %v1043_v11 = vsel %vm866_vm1, %v1042_v57, %v1038_v34  ;;  %v707_v37 = vmul.f32 0.020408163, %v533_v27  ;;  %v721_v41 = vmul.f32 0.020408163, %v575_v26  ;;  %v2726_v57 = vsel %vm134_vm0, %v3789_v7, 0.0 }
 0x108   :  { %v2723_v34 = vsel %vm134_vm0, %v3788_v8, 0.0  ;;  %v3645_v26 = vunpack.c.h.bf16 %v4953_v56  ;;  %v3616_v27 = vunpack.c.l.bf16 %v5013_v15 }
 0x109   :  { %v872_v45 = vrot.slane %v707_v37, %v4388_v13  ;;  %1866 = vadd.xlane.f32.xlu1 %v1865_v28  ;;  %1821 = vadd.xlane.f32.xlu0 %v1820_v4  ;;  %v969_v54 = vrot.slane %v721_v41, %v4379_v6 }
 0x10a   :  { %v623_v46 = vpop.xlane.xlu1 %622  ;;  %v578_v31 = vpop.xlane.xlu0 %577  ;;  %v1868_v56 = vsel %vm134_vm0, %v3645_v26, 0.0 }
 0x10b   :  { %v874_v22 = vsel %vm873_vm2, %v872_v45, %v867_v17  ;;  %v737_v50 = vmul.f32 0.020408163, %v623_v46  ;;  %v722_v51 = vmul.f32 0.020408163, %v578_v31  ;;  %v1823_v45 = vsel %vm134_vm0, %v3616_v27, 0.0 }
 0x10c   :  { %v3705_v46 = vunpack.c.h.bf16 %v4982_v25  ;;  %v3676_v31 = vunpack.c.l.bf16 %v5025_v33 }
 0x10d   :  { %v1047_v60 = vrot.slane %v737_v50, %v4388_v13  ;;  %v973_v0 = vrot.slane %v722_v51, %v4383_v10  ;;  %1956 = vadd.xlane.f32.xlu1 %v1955_v35  ;;  %1911 = vadd.xlane.f32.xlu0 %v1910_v61  ;;  %v3943_v50 = vld [vmem:[%s6253_s0 + $0x1a8] sm:$0xff]   ;;  %v5041_v51 = vld [vmem:[%s6253_s0 + $0x170] sm:$0xff]  }
 0x10e   :  { %v668_v1 = vpop.xlane.xlu1 %667  ;;  %v665_v40 = vpop.xlane.xlu0 %664 }
 0x10f   :  { %v1048_v9 = vsel %vm873_vm2, %v1047_v60, %v1043_v11  ;;  %v974_v49 = vsel %vm866_vm1, %v973_v0, %v969_v54  ;;  %v752_v59 = vmul.f32 0.020408163, %v668_v1  ;;  %v751_v14 = vmul.f32 0.020408163, %v665_v40 }
 0x110   :  { %v1913_v0 = vsel %vm134_vm0, %v3676_v31, 0.0  ;;  %v3760_v1 = vunpack.c.l.bf16 %v3943_v50  ;;  %v3732_v40 = vunpack.c.l.bf16 %v5041_v51 }
 0x111   :  { %v1121_v16 = vrot.slane %v752_v59, %v4383_v10  ;;  %v1117_v17 = vrot.slane %v751_v14, %v4379_v6  ;;  %2637 = vadd.xlane.f32.xlu1 %v2636_v3  ;;  %2634 = vadd.xlane.f32.xlu0 %v2633_v5 }
 0x112   :  { %v581_v20 = vpop.xlane.xlu1 %580  ;;  %v536_v21 = vpop.xlane.xlu0 %535 }
 0x113   :  { %v1122_v28 = vsel %vm866_vm1, %v1121_v16, %v1117_v17  ;;  %v723_v4 = vmul.f32 0.020408163, %v581_v20  ;;  %v708_v32 = vmul.f32 0.020408163, %v536_v21  ;;  %v2681_v20 = vsel %vm134_vm0, %v3760_v1, 0.0 }
 0x114   :  { %v2639_v21 = vsel %vm134_vm0, %v3732_v40, 0.0  ;;  %v3617_v1 = vunpack.c.h.bf16 %v5013_v15 }
 0x115   :  { %v978_v11 = vrot.slane %v723_v4, %v4388_v13  ;;  %v879_v37 = vrot.slane %v708_v32, %v4393_v19  ;;  %2727 = vadd.xlane.f32.xlu1 %v2726_v57  ;;  %2724 = vadd.xlane.f32.xlu0 %v2723_v34  ;;  %v3761_v57 = vunpack.c.h.bf16 %v3943_v50  ;;  %v3958_v4 = vld [vmem:[%s6253_s0 + $0x388] sm:$0xff]  }
 0x116   :  { %v671_v39 = vpop.xlane.xlu1 %670  ;;  %v626_v41 = vpop.xlane.xlu0 %625 }
 0x117   :  { %v979_v35 = vsel %vm873_vm2, %v978_v11, %v974_v49  ;;  %v881_v61 = vsel %vm880_vm3, %v879_v37, %v874_v22  ;;  %v753_v47 = vmul.f32 0.020408163, %v671_v39  ;;  %v738_v48 = vmul.f32 0.020408163, %v626_v41  ;;  %v5053_v49 = vld [vmem:[%s6253_s0 + $0x350] sm:$0xff]  }
 0x118   :  { %v1958_v22 = vsel %vm134_vm0, %v3705_v46, 0.0  ;;  %v3820_v46 = vunpack.c.l.bf16 %v3958_v4 }
 0x119   :  { %v1126_v53 = vrot.slane %v753_v47, %v4388_v13  ;;  %v1052_v25 = vrot.slane %v738_v48, %v4393_v19  ;;  %1869 = vadd.xlane.f32.xlu1 %v1868_v56  ;;  %1824 = vadd.xlane.f32.xlu0 %v1823_v45  ;;  %v2684_v56 = vsel %vm134_vm0, %v3761_v57, 0.0  ;;  %v3821_v45 = vunpack.c.h.bf16 %v3958_v4  ;;  %v5074_v48 = vld [vmem:[%s6253_s0 + $0x140] sm:$0xff]  }
 0x11a   :  { %v584_v54 = vpop.xlane.xlu1 %583  ;;  %v539_v60 = vpop.xlane.xlu0 %538 }
 0x11b   :  { %v1127_v3 = vsel %vm873_vm2, %v1126_v53, %v1122_v28  ;;  %v1053_v5 = vsel %vm880_vm3, %v1052_v25, %v1048_v9  ;;  %v724_v7 = vmul.f32 0.020408163, %v584_v54  ;;  %v709_v8 = vmul.f32 0.020408163, %v539_v60 }
 0x11c   :  { %v3792_v9 = vunpack.c.l.bf16 %v5053_v49  ;;  %v2774_v60 = vsel %vm134_vm0, %v3821_v45, 0.0 }
 0x11d   :  { %v983_v59 = vrot.slane %v724_v7, %v4393_v19  ;;  %v886_v14 = vrot.slane %v709_v8, %v4409_v29  ;;  %1959 = vadd.xlane.f32.xlu1 %v1958_v22  ;;  %1914 = vadd.xlane.f32.xlu0 %v1913_v0  ;;  %v2771_v22 = vsel %vm134_vm0, %v3820_v46, 0.0  ;;  %v3648_v0 = vunpack.c.l.bf16 %v5074_v48  ;;  %v5087_v8 = vld [vmem:[%s6253_s0 + $0x320] sm:$0xff]  }
 0x11e   :  { %v674_v16 = vpop.xlane.xlu1 %673  ;;  %v629_v17 = vpop.xlane.xlu0 %628  ;;  %v2729_v41 = vsel %vm134_vm0, %v3792_v9, 0.0  ;;  %v3677_v9 = vunpack.c.h.bf16 %v5025_v33 }
 0x11f   :  { %v984_v34 = vsel %vm880_vm3, %v983_v59, %v979_v35  ;;  %v888_v26 = vsel %vm887_vm4, %v886_v14, %v881_v61  ;;  %v754_v27 = vmul.f32 0.020408163, %v674_v16  ;;  %v739_v28 = vmul.f32 0.020408163, %v629_v17 }
 0x120   :  { %v1871_v15 = vsel %vm134_vm0, %v3648_v0, 0.0 }
 0x121   :  { %v1131_v32 = vrot.slane %v754_v27, %v4393_v19  ;;  %v1057_v11 = vrot.slane %v739_v28, %v4409_v29  ;;  %2682 = vadd.xlane.f32.xlu1 %v2681_v20  ;;  %2640 = vadd.xlane.f32.xlu0 %v2639_v21  ;;  %v1826_v20 = vsel %vm134_vm0, %v3617_v1, 0.0  ;;  %v3708_v21 = vunpack.c.l.bf16 %v5087_v8  ;;  %v5100_v28 = vld [vmem:[%s6253_s0 + $0x1b0] sm:$0xff]  }
 0x122   :  { %v587_v37 = vpop.xlane.xlu1 %586  ;;  %v542_v39 = vpop.xlane.xlu0 %541 }
 0x123   :  { %v1132_v31 = vsel %vm880_vm3, %v1131_v32, %v1127_v3  ;;  %v1058_v35 = vsel %vm887_vm4, %v1057_v11, %v1053_v5  ;;  %v725_v61 = vmul.f32 0.020408163, %v587_v37  ;;  %v710_v47 = vmul.f32 0.020408163, %v542_v39 }
 0x124   :  { %v1961_v33 = vsel %vm134_vm0, %v3708_v21, 0.0  ;;  %v1916_v39 = vsel %vm134_vm0, %v3677_v9, 0.0  ;;  %v3923_v21 = vld [vmem:[%s6253_s0 + $0x2e8] sm:$0xff]  }
 0x125   :  { %v988_v50 = vrot.slane %v725_v61, %v4409_v29  ;;  %v893_v53 = vrot.slane %v710_v47, %v4401_v23  ;;  %2730 = vadd.xlane.f32.xlu1 %v2729_v41  ;;  %2685 = vadd.xlane.f32.xlu0 %v2684_v56  ;;  %v3764_v41 = vunpack.c.l.bf16 %v5100_v28  ;;  %v3733_v56 = vunpack.c.h.bf16 %v5041_v51  ;;  %v3959_v61 = vld [vmem:[%s6253_s0 + $0x390] sm:$0xff]  }
 0x126   :  { %v677_v25 = vpop.xlane.xlu1 %676  ;;  %v632_v54 = vpop.xlane.xlu0 %631 }
 0x127   :  { %v989_v40 = vsel %vm887_vm4, %v988_v50, %v984_v34  ;;  %v895_v3 = vsel %vm894_vm5, %v893_v53, %v888_v26  ;;  %v755_v5 = vmul.f32 0.020408163, %v677_v25  ;;  %v740_v7 = vmul.f32 0.020408163, %v632_v54 }
 0x128   :  { %v2687_v25 = vsel %vm134_vm0, %v3764_v41, 0.0  ;;  %v2642_v54 = vsel %vm134_vm0, %v3733_v56, 0.0 }
 0x129   :  { %v1136_v59 = vrot.slane %v755_v5, %v4409_v29  ;;  %v1062_v14 = vrot.slane %v740_v7, %v4401_v23  ;;  %2775 = vadd.xlane.f32.xlu1 %v2774_v60  ;;  %2772 = vadd.xlane.f32.xlu0 %v2771_v22  ;;  %v3824_v60 = vunpack.c.l.bf16 %v3959_v61  ;;  %v3793_v22 = vunpack.c.h.bf16 %v5053_v49 }
 0x12a   :  { %v590_v16 = vpop.xlane.xlu1 %589  ;;  %v545_v17 = vpop.xlane.xlu0 %544 }
 0x12b   :  { %v1137_v57 = vsel %vm887_vm4, %v1136_v59, %v1132_v31  ;;  %v1063_v34 = vsel %vm894_vm5, %v1062_v14, %v1058_v35  ;;  %v726_v26 = vmul.f32 0.020408163, %v590_v16  ;;  %v711_v27 = vmul.f32 0.020408163, %v545_v17 }
 0x12c   :  { %v2777_v14 = vsel %vm134_vm0, %v3824_v60, 0.0  ;;  %v2732_v49 = vsel %vm134_vm0, %v3793_v22, 0.0  ;;  %v3649_v16 = vunpack.c.h.bf16 %v5074_v48 }
 0x12d   :  { %v993_v4 = vrot.slane %v726_v26, %v4401_v23  ;;  %v900_v32 = vrot.slane %v711_v27, %v4427_v43  ;;  %1872 = vadd.xlane.f32.xlu1 %v1871_v15  ;;  %1827 = vadd.xlane.f32.xlu0 %v1826_v20  ;;  %v3709_v27 = vunpack.c.h.bf16 %v5087_v8  ;;  %v3765_v8 = vunpack.c.h.bf16 %v5100_v28  ;;  %v3916_v28 = vld [vmem:[%s6253_s0 + $0x148] sm:$0xff]  }
 0x12e   :  { %v680_v11 = vpop.xlane.xlu1 %679  ;;  %v635_v37 = vpop.xlane.xlu0 %634  ;;  %v1874_v26 = vsel %vm134_vm0, %v3649_v16, 0.0 }
 0x12f   :  { %v5109_v45 = vsel %vm894_vm5, %v993_v4, %v989_v40  ;;  %v902_v46 = vsel %vm6285_vm6, %v900_v32, %v895_v3  ;;  %v756_v31 = vmul.f32 0.020408163, %v680_v11  ;;  %v741_v35 = vmul.f32 0.020408163, %v635_v37  ;;  %v3908_v3 = vld [vmem:[%s6253_s0 + $0x108] sm:$0xff]   ;;  %v3937_v11 = vld [vmem:[%s6253_s0 + $0x178] sm:$0xff]  }
 0x130   :  { %v3620_v17 = vunpack.c.l.bf16 %v3908_v3  ;;  %v3680_v4 = vunpack.c.l.bf16 %v3923_v21  ;;  %v3736_v56 = vunpack.c.l.bf16 %v3937_v11 }
 0x131   :  { %v1141_v47 = vrot.slane %v756_v31, %v4401_v23  ;;  %v1067_v50 = vrot.slane %v741_v35, %v4427_v43  ;;  %1962 = vadd.xlane.f32.xlu1 %v1961_v33  ;;  %1917 = vadd.xlane.f32.xlu0 %v1916_v39  ;;  %v1964_v39 = vsel %vm134_vm0, %v3709_v27, 0.0 }
 0x132   :  { %v5117_v53 = vpop.xlane.xlu1 %592  ;;  %v548_v51 = vpop.xlane.xlu0 %547  ;;  %v1829_v48 = vsel %vm134_vm0, %v3620_v17, 0.0  ;;  %v1919_v41 = vsel %vm134_vm0, %v3680_v4, 0.0 }
 0x133   :  { %v5123_v0 = vsel %vm894_vm5, %v1141_v47, %v1137_v57  ;;  %v1068_v1 = vsel %vm6285_vm6, %v1067_v50, %v1063_v34  ;;  %v712_v40 = vmul.f32 0.020408163, %v548_v51  ;;  %v2690_v47 = vsel %vm134_vm0, %v3765_v8, 0.0 }
 0x134   :  { %v2645_v50 = vsel %vm134_vm0, %v3736_v56, 0.0  ;;  %v3825_v51 = vunpack.c.h.bf16 %v3959_v61  ;;  %v3931_v61 = vld [vmem:[%s6253_s0 + $0x328] sm:$0xff]  }
 0x135   :  { %v907_v5 = vrot.slane %v712_v40, %v4424_v42  ;;  %2688 = vadd.xlane.f32.xlu1 %v2687_v25  ;;  %2643 = vadd.xlane.f32.xlu0 %v2642_v54  ;;  %v3652_v40 = vunpack.c.l.bf16 %v3916_v28  ;;  %v3712_v17 = vunpack.c.l.bf16 %v3931_v61 }
 0x136   :  { %v5130_v7 = vpop.xlane.xlu1 %682  ;;  %v638_v59 = vpop.xlane.xlu0 %637  ;;  %v2780_v22 = vsel %vm134_vm0, %v3825_v51, 0.0 }
 0x137   :  { %v5136_v15 = vsel %vm6283_vm7, %v907_v5, %v902_v46  ;;  %v742_v20 = vmul.f32 0.020408163, %v638_v59  ;;  %v3952_v46 = vld [vmem:[%s6253_s0 + $0x358] sm:$0xff]   ;;  %v3621_v5 = vunpack.c.h.bf16 %v3908_v3 }
 0x138   :  { %v3796_v25 = vunpack.c.l.bf16 %v3952_v46  ;;  %v3945_v3 = vld [vmem:[%s6253_s0 + $0x1b8] sm:$0xff]   ;;  %v3797_v51 = vunpack.c.h.bf16 %v3952_v46  ;;  %v3924_v46 = vld [vmem:[%s6253_s0 + $0x2f0] sm:$0xff]  }
 0x139   :  { %v1072_v9 = vrot.slane %v742_v20, %v4424_v42  ;;  %2778 = vadd.xlane.f32.xlu1 %v2777_v14  ;;  %2733 = vadd.xlane.f32.xlu0 %v2732_v49  ;;  %v1877_v49 = vsel %vm134_vm0, %v3652_v40, 0.0  ;;  %v1832_v16 = vsel %vm134_vm0, %v3621_v5, 0.0  ;;  %v3681_v20 = vunpack.c.h.bf16 %v3923_v21  ;;  %v3960_v21 = vld [vmem:[%s6253_s0 + $0x398] sm:$0xff]  }
 0x13a   :  { %v5142_v57 = vpop.xlane.xlu1 %595  ;;  %v5144_v34 = vpop.xlane.xlu0 %550  ;;  %v3768_v4 = vunpack.c.l.bf16 %v3945_v3  ;;  %v2738_v40 = vsel %vm134_vm0, %v3797_v51, 0.0  ;;  %v3653_v5 = vunpack.c.h.bf16 %v3916_v28 }
 0x13b   :  { %v5150_v32 = vsel %vm6283_vm7, %v1072_v9, %v1068_v1  ;;  %v2735_v1 = vsel %vm134_vm0, %v3796_v25, 0.0  ;;  %v1922_v27 = vsel %vm134_vm0, %v3681_v20, 0.0  ;;  %v3938_v20 = vld [vmem:[%s6253_s0 + $0x180] sm:$0xff]  }
 0x13c   :  { %v2693_v56 = vsel %vm134_vm0, %v3768_v4, 0.0  ;;  %v1880_v4 = vsel %vm134_vm0, %v3653_v5, 0.0  ;;  %v3740_v51 = vunpack.c.l.bf16 %v3938_v20 }
 0x13d   :  { %1875 = vadd.xlane.f32.xlu1 %v1874_v26  ;;  %1830 = vadd.xlane.f32.xlu0 %v1829_v48  ;;  %v1967_v48 = vsel %vm134_vm0, %v3712_v17, 0.0  ;;  %v3684_v17 = vunpack.c.l.bf16 %v3924_v46 }
 0x13e   :  { %v5155_v37 = vpop.xlane.xlu1 %685  ;;  %v5157_v33 = vpop.xlane.xlu0 %640  ;;  %v2651_v36 = vsel %vm134_vm0, %v3740_v51, 0.0 }
 0x13f   :  { %v1925_v5 = vsel %vm134_vm0, %v3684_v17, 0.0 }
 0x141   :  { %1965 = vadd.xlane.f32.xlu1 %v1964_v39  ;;  %1920 = vadd.xlane.f32.xlu0 %v1919_v41  ;;  %v3737_v39 = vunpack.c.h.bf16 %v3937_v11  ;;  %v3909_v11 = vld [vmem:[%s6253_s0 + $0x110] sm:$0xff]  }
 0x142   :  { %v5165_v31 = vpop.xlane.xlu1 %598  ;;  %v5167_v35 = vpop.xlane.xlu0 %553  ;;  %v3625_v29 = vunpack.c.h.bf16 %v3909_v11 }
 0x145   :  { %2691 = vadd.xlane.f32.xlu1 %v2690_v47  ;;  %2646 = vadd.xlane.f32.xlu0 %v2645_v50  ;;  %v2648_v47 = vsel %vm134_vm0, %v3737_v39, 0.0  ;;  %v3828_v50 = vunpack.c.l.bf16 %v3960_v21  ;;  %v3953_v39 = vld [vmem:[%s6253_s0 + $0x360] sm:$0xff]  }
 0x146   :  { %v5174_v54 = vpop.xlane.xlu1 %688  ;;  %v5176_v60 = vpop.xlane.xlu0 %643  ;;  %v3801_v10 = vunpack.c.h.bf16 %v3953_v39 }
 0x149   :  { %2781 = vadd.xlane.f32.xlu1 %v2780_v22  ;;  %2736 = vadd.xlane.f32.xlu0 %v2735_v1  ;;  %v2783_v1 = vsel %vm134_vm0, %v3828_v50, 0.0  ;;  %v5240_v50 = vld [vmem:[%s6253_s0 + $0x1c0] sm:$0xff]  }
 0x14a   :  { %v5183_v59 = vpop.xlane.xlu1 %601  ;;  %v5185_v14 = vpop.xlane.xlu0 %556  ;;  %v3772_v13 = vunpack.c.l.bf16 %v5240_v50 }
 0x14d   :  { %1878 = vadd.xlane.f32.xlu1 %v1877_v49  ;;  %1833 = vadd.xlane.f32.xlu0 %v1832_v16  ;;  %v3624_v49 = vunpack.c.l.bf16 %v3909_v11  ;;  %v3713_v16 = vunpack.c.h.bf16 %v3931_v61  ;;  %v3917_v61 = vld [vmem:[%s6253_s0 + $0x150] sm:$0xff]  }
 0x14e   :  { %v5192_v9 = vpop.xlane.xlu1 %691  ;;  %v5194_v26 = vpop.xlane.xlu0 %646  ;;  %v3656_v12 = vunpack.c.l.bf16 %v3917_v61  ;;  %v3657_v11 = vunpack.c.h.bf16 %v3917_v61 }
 0x14f   :  { %v1835_v28 = vsel %vm134_vm0, %v3624_v49, 0.0  ;;  %v3800_v49 = vunpack.c.l.bf16 %v3953_v39  ;;  %v1838_v39 = vsel %vm134_vm0, %v3625_v29, 0.0  ;;  %v728_v29 = vmul.f32 0.020408163, %v5142_v57 }
 0x150   :  { %v1883_v58 = vsel %vm134_vm0, %v3656_v12, 0.0  ;;  %v5284_v12 = vsel %vm134_vm0, %v3772_v13, 0.0  ;;  %v743_v57 = vmul.f32 0.020408163, %v5157_v33 }
 0x151   :  { %1968 = vadd.xlane.f32.xlu1 %v1967_v48  ;;  %1923 = vadd.xlane.f32.xlu0 %v1922_v27  ;;  %v2741_v52 = vsel %vm134_vm0, %v3800_v49, 0.0 }
 0x152   :  { %v5201_v41 = vpop.xlane.xlu1 %559  ;;  %v5203_v8 = vpop.xlane.xlu0 %298 }
 0x155   :  { %2694 = vadd.xlane.f32.xlu1 %v2693_v56  ;;  %2649 = vadd.xlane.f32.xlu0 %v2648_v47  ;;  %v3769_v56 = vunpack.c.h.bf16 %v3945_v3  ;;  %v3932_v47 = vld [vmem:[%s6253_s0 + $0x330] sm:$0xff]   ;;  %v1970_v3 = vsel %vm134_vm0, %v3713_v16, 0.0 }
 0x156   :  { %v5210_v25 = vpop.xlane.xlu1 %649  ;;  %v5212_v22 = vpop.xlane.xlu0 %604  ;;  %v3716_v19 = vunpack.c.l.bf16 %v3932_v47  ;;  %v3717_v49 = vunpack.c.h.bf16 %v3932_v47 }
 0x157   :  { %v2696_v16 = vsel %vm134_vm0, %v3769_v56, 0.0 }
 0x159   :  { %2784 = vadd.xlane.f32.xlu1 %v2783_v1  ;;  %2739 = vadd.xlane.f32.xlu0 %v2738_v40  ;;  %v3829_v1 = vunpack.c.h.bf16 %v3960_v21  ;;  %v5245_v40 = vld [vmem:[%s6253_s0 + $0x3a0] sm:$0xff]   ;;  %v3685_v21 = vunpack.c.h.bf16 %v3924_v46  ;;  %v727_v46 = vmul.f32 0.020408163, %v5117_v53  ;;  %v5278_v53 = vsel %vm134_vm0, %v3716_v19, 0.0 }
 0x15a   :  { %v5222_v48 = vpop.xlane.xlu1 %301  ;;  %v5224_v27 = vpop.xlane.xlu0 %694  ;;  %6298 = vst [vmem:[#allocation14_spill] sm:$0xff] %v5245_v40  ;;  %v3832_v17 = vunpack.c.l.bf16 %v5245_v40  ;;  %v5295_v19 = vsel %vm134_vm0, %v3801_v10, 0.0  ;;  %v5310_v10 = vld [vmem:[%s6253_s0 + $0x188] sm:$0xff]  }
 0x15b   :  { %v2786_v6 = vsel %vm134_vm0, %v3829_v1, 0.0  ;;  %v5281_v61 = vsel %vm134_vm0, %v3685_v21, 0.0  ;;  %v757_v1 = vmul.f32 0.020408163, %v5130_v7  ;;  %v5298_v21 = vsel %vm134_vm0, %v3657_v11, 0.0 }
 0x15c   :  { %v713_v7 = vmul.f32 0.020408163, %v5144_v34  ;;  %v714_v11 = vmul.f32 0.020408163, %v5167_v35 }
 0x15d   :  { %1881 = vadd.xlane.f32.xlu1 %v1880_v4  ;;  %1836 = vadd.xlane.f32.xlu0 %v1835_v28  ;;  %v5257_v4 = vld [vmem:[%s6253_s0 + $0x118] sm:$0xff]   ;;  %v3741_v28 = vunpack.c.h.bf16 %v3938_v20 }
 0x15e   :  { %v5249_v55 = vpop.xlane.xlu1 %607  ;;  %v5251_v23 = vpop.xlane.xlu0 %562  ;;  %6299 = vst [vmem:[#allocation15_spill] sm:$0xff] %v5257_v4  ;;  %v3628_v63 = vunpack.c.l.bf16 %v5257_v4  ;;  %v5270_v20 = vld [vmem:[%s6253_s0 + $0x2f8] sm:$0xff]   ;;  %v998_v4 = vrot.slane %v727_v46, %v4427_v43 }
 0x15f   :  { %6300 = vst [vmem:[#allocation16_spill] sm:$0xff] %v5270_v20  ;;  %v3688_v13 = vunpack.c.l.bf16 %v5270_v20  ;;  %v1003_v20 = vrot.slane %v728_v29, %v4424_v42 }
 0x160   :  { %v5305_v47 = vsel %vm134_vm0, %v3628_v63, 0.0  ;;  %v759_v63 = vmul.f32 0.020408163, %v5174_v54  ;;  %v999_v40 = vsel %vm6285_vm6, %v998_v4, %v5109_v45 }
 0x161   :  { %1971 = vadd.xlane.f32.xlu1 %v1970_v3  ;;  %1926 = vadd.xlane.f32.xlu0 %v1925_v5  ;;  %v5288_v3 = vsel %vm134_vm0, %v3741_v28, 0.0  ;;  %v5291_v5 = vsel %vm134_vm0, %v3832_v17, 0.0  ;;  %v758_v28 = vmul.f32 0.020408163, %v5155_v37  ;;  %v729_v17 = vmul.f32 0.020408163, %v5165_v31 }
 0x162   :  { %v5272_v56 = vpop.xlane.xlu1 %697  ;;  %v5274_v51 = vpop.xlane.xlu0 %652  ;;  %v744_v37 = vmul.f32 0.020408163, %v5176_v60  ;;  %v5327_v33 = vsel %vm134_vm0, %v3688_v13, 0.0  ;;  %v730_v60 = vmul.f32 0.020408163, %v5183_v59  ;;  %v921_v13 = vrot.slane %v714_v11, %v4446_v62 }
 0x163   :  { %v1151_v54 = vrot.slane %v758_v28, %v4424_v42  ;;  %v1008_v29 = vrot.slane %v729_v17, %v4452_v2  ;;  %v715_v31 = vmul.f32 0.020408163, %v5185_v14  ;;  %v1156_v4 = vrot.slane %v759_v63, %v4452_v2 }
 0x164   :  { %v1082_v59 = vrot.slane %v744_v37, %v4446_v62  ;;  %v716_v28 = vmul.f32 0.020408163, %v5201_v41  ;;  %v369_v14 = vmul.f32 0.020408163, %v5203_v8  ;;  %v731_v11 = vmul.f32 0.020408163, %v5212_v22 }
 0x165   :  { %2697 = vadd.xlane.f32.xlu1 %v2696_v16  ;;  %2652 = vadd.xlane.f32.xlu0 %v2651_v36  ;;  %v1146_v36 = vrot.slane %v757_v1, %v4427_v43  ;;  %v5323_v16 = vsel %vm134_vm0, %v3717_v49, 0.0  ;;  %v914_v1 = vrot.slane %v713_v7, %v4452_v2  ;;  %v1077_v49 = vrot.slane %v743_v57, %v4452_v2 }
 0x166   :  { %v5315_v46 = vpop.xlane.xlu1 %565  ;;  %v5317_v34 = vpop.xlane.xlu0 %304  ;;  %v745_v7 = vmul.f32 0.020408163, %v5194_v26  ;;  %v928_v8 = vrot.slane %v715_v31, %v4473_v24  ;;  %v732_v37 = vmul.f32 0.020408163, %v5249_v55 }
 0x167   :  { %v1147_v45 = vsel %vm6285_vm6, %v1146_v36, %v5123_v0  ;;  %v916_v57 = vsel %vm6284_vm8, %v914_v1, %v5136_v15  ;;  %v1013_v0 = vrot.slane %v730_v60, %v4446_v62  ;;  %v746_v1 = vmul.f32 0.020408163, %v5210_v25 }
 0x168   :  { %v1152_v17 = vsel %vm6283_vm7, %v1151_v54, %v1147_v45  ;;  %v923_v41 = vsel %vm922_vm9, %v921_v13, %v916_v57  ;;  %v1087_v22 = vrot.slane %v745_v7, %v4473_v24  ;;  %v1018_v54 = vrot.slane %v731_v11, %v4473_v24 }
 0x169   :  { %2787 = vadd.xlane.f32.xlu1 %v2786_v6  ;;  %2742 = vadd.xlane.f32.xlu0 %v2741_v52  ;;  %v760_v6 = vmul.f32 0.020408163, %v5192_v9  ;;  %v1004_v52 = vsel %vm6283_vm7, %v1003_v20, %v999_v40  ;;  %v1078_v9 = vsel %vm6284_vm8, %v1077_v49, %v5150_v32  ;;  %v1157_v15 = vsel %vm6284_vm8, %v1156_v4, %v1152_v17 }
 0x16a   :  { %v5340_v35 = vpop.xlane.xlu1 %655  ;;  %v611_v43 = vpop.xlane.xlu0 %610  ;;  %v1009_v26 = vsel %vm6284_vm8, %v1008_v29, %v1004_v52  ;;  %v1083_v36 = vsel %vm922_vm9, %v1082_v59, %v1078_v9  ;;  %v935_v32 = vrot.slane %v716_v28, %v4467_v18  ;;  %v762_v60 = vmul.f32 0.020408163, %v5272_v56 }
 0x16b   :  { %v1161_v63 = vrot.slane %v760_v6, %v4446_v62  ;;  %v1014_v31 = vsel %vm922_vm9, %v1013_v0, %v1009_v26  ;;  %v370_v49 = vmul.f32 0.020408163, %v5222_v48  ;;  %v733_v29 = vmul.f32 0.020408163, %v611_v43 }
 0x16c   :  { %v717_v59 = vmul.f32 0.020408163, %v5251_v23  ;;  %vm1187_vm7 = vcmask 916480   ;;  %v1088_v56 = vsel %vm929_vm10, %v1087_v22, %v1083_v36  ;;  %v1023_v43 = vrot.slane %v732_v37, %v4467_v18 }
 0x16d   :  { %1884 = vadd.xlane.f32.xlu1 %v1883_v58  ;;  %1839 = vadd.xlane.f32.xlu0 %v1838_v39  ;;  %v761_v58 = vmul.f32 0.020408163, %v5224_v27  ;;  %v1589_v39 = vrot.slane %v369_v14, %v4452_v2  ;;  %v930_v27 = vsel %vm929_vm10, %v928_v8, %v923_v41  ;;  %v1162_v4 = vsel %vm922_vm9, %v1161_v63, %v1157_v15 }
 0x16e   :  { %v308_v40 = vpop.xlane.xlu1 %307  ;;  %v701_v20 = vpop.xlane.xlu0 %700  ;;  %v1092_v48 = vrot.slane %v746_v1, %v4467_v18  ;;  %v1019_v52 = vsel %vm929_vm10, %v1018_v54, %v1014_v31  ;;  %v1171_v7 = vrot.slane %v762_v60, %v4467_v18  ;;  %v747_v28 = vmul.f32 0.020408163, %v5274_v51 }
 0x16f   :  { %v763_v13 = vmul.f32 0.020408163, %v701_v20  ;;  %v1166_v25 = vrot.slane %v761_v58, %v4473_v24  ;;  %v1594_v23 = vrot.slane %v370_v49, %v4446_v62  ;;  %v371_v14 = vmul.f32 0.020408163, %v5317_v34  ;;  %v6303_v49 = vld [vmem:[#allocation11_spill] sm:$0xff] }
 0x170   :  { %v942_v9 = vrot.slane %v717_v59, %v4494_v44  ;;  %v372_v41 = vmul.f32 0.020408163, %v308_v40  ;;  %v1024_v34 = vsel %vm936_vm11, %v1023_v43, %v1019_v52  ;;  %v1097_v8 = vrot.slane %v747_v28, %v4494_v44 }
 0x171   :  { %1974 = vadd.xlane.f32.xlu1 %v5278_v53  ;;  %1929 = vadd.xlane.f32.xlu0 %v5281_v61  ;;  %v937_v53 = vsel %vm936_vm11, %v935_v32, %v930_v27  ;;  %v1590_v61 = vsel %vm6284_vm8, %v1589_v39, %v4956_v30  ;;  %v1028_v30 = vrot.slane %v733_v29, %v4494_v44  ;;  %vm6301_vm8 = vcmask 917312  }
 0x172   :  { %v614_v45 = vpop.xlane.xlu1 %613  ;;  %v569_v55 = vpop.xlane.xlu0 %568  ;;  %v1176_v57 = vrot.slane %v763_v13, %v4494_v44  ;;  %v1167_v11 = vsel %vm929_vm10, %v1166_v25, %v1162_v4  ;;  %v1599_v63 = vrot.slane %v371_v14, %v4473_v24  ;;  %vm6302_vm6 = vmmov %vm6301_vm8  ;;  %v1604_v1 = vrot.slane %v372_v41, %v4467_v18  ;;  %v6305_v25 = vld [vmem:[#allocation10_spill] sm:$0xff] }
 0x173   :  { %v734_v6 = vmul.f32 0.020408163, %v614_v45  ;;  %v719_v20 = vmul.f32 0.020408163, %v569_v55  ;;  %v1172_v36 = vsel %vm936_vm11, %v1171_v7, %v1167_v11  ;;  %v1093_v60 = vsel %vm936_vm11, %v1092_v48, %v1088_v56 }
 0x174   :  { %v1177_v40 = vsel %vm943_vm12, %v1176_v57, %v1172_v36  ;;  %v1595_v27 = vsel %vm922_vm9, %v1594_v23, %v1590_v61  ;;  %v6304_v13 = vunpack.c.h.bf16 %v5240_v50  ;;  %v944_v55 = vsel %vm943_vm12, %v942_v9, %v937_v53  ;;  %v5433_v53 = vld [vmem:[%s6253_s0 + $0x368] sm:$0xff]  }
 0x175   :  { %2700 = vadd.xlane.f32.xlu1 %v5284_v12  ;;  %2655 = vadd.xlane.f32.xlu0 %v5288_v3  ;;  %v1033_v51 = vrot.slane %v734_v6, %v4488_v38  ;;  %v718_v12 = vmul.f32 0.020408163, %v5315_v46  ;;  %v748_v3 = vmul.f32 0.020408163, %v5340_v35  ;;  %v1029_v35 = vsel %vm943_vm12, %v1028_v30, %v1024_v34 }
 0x176   :  { %v704_v17 = vpop.xlane.xlu1 %703  ;;  %v659_v0 = vpop.xlane.xlu0 %658  ;;  %v956_v29 = vrot.slane %v719_v20, %v6303_v49  ;;  %v2702_v45 = vsel %vm134_vm0, %v6304_v13, 0.0  ;;  %v6307_v7 = vunpack.c.l.bf16 %v5310_v10 }
 0x177   :  { %v764_v26 = vmul.f32 0.020408163, %v704_v17  ;;  %v749_v58 = vmul.f32 0.020408163, %v659_v0  ;;  %v1034_v37 = vsel %vm6301_vm8, %v1033_v51, %v1029_v35  ;;  %vm6306_vm8 = vmmov %vm6302_vm6  ;;  %v6308_v17 = vld [vmem:[#allocation14_spill] sm:$0xff] }
 0x178   :  { %v2657_v28 = vsel %vm134_vm0, %v6307_v7, 0.0  ;;  %v3833_v0 = vunpack.c.h.bf16 %v6308_v17 }
 0x179   :  { %v1181_v15 = vrot.slane %v764_v26, %v4488_v38  ;;  %2790 = vadd.xlane.f32.xlu1 %v5291_v5  ;;  %2745 = vadd.xlane.f32.xlu0 %v5295_v19  ;;  %v949_v5 = vrot.slane %v718_v12, %v4488_v38  ;;  %v1102_v19 = vrot.slane %v748_v3, %v4488_v38  ;;  %v3804_v3 = vunpack.c.l.bf16 %v5433_v53 }
 0x17a   :  { %v572_v46 = vpop.xlane.xlu1 %571  ;;  %v311_v22 = vpop.xlane.xlu0 %310  ;;  %v1107_v4 = vrot.slane %v749_v58, %v6303_v49 }
 0x17b   :  { %v720_v32 = vmul.f32 0.020408163, %v572_v46  ;;  %v373_v39 = vmul.f32 0.020408163, %v311_v22  ;;  %v1182_v31 = vsel %vm6302_vm6, %v1181_v15, %v1177_v40  ;;  %v951_v48 = vsel %vm6302_vm6, %v949_v5, %v944_v55  ;;  %v6309_v15 = vld [vmem:[#allocation12_spill] sm:$0xff]  ;;  %v6311_v46 = vld [vmem:[#allocation3_spill] sm:$0xff] }
 0x17c   :  { %v1185_v54 = vsel %vm1183_vm13, %v1182_v31, %v1034_v37  ;;  %v958_v57 = vsel %vm957_vm14, %v956_v29, %v951_v48  ;;  %v6312_v31 = vld [vmem:[#allocation15_spill] sm:$0xff]  ;;  %v6315_v48 = vld [vmem:[#allocation5_spill] sm:$0xff] }
 0x17d   :  { %1887 = vadd.xlane.f32.xlu1 %v5298_v21  ;;  %1842 = vadd.xlane.f32.xlu0 %v5305_v47  ;;  %v963_v59 = vrot.slane %v720_v32, %v6305_v25  ;;  %v1609_v6 = vrot.slane %v373_v39, %v4494_v44  ;;  %v1098_v21 = vsel %vm943_vm12, %v1097_v8, %v1093_v60  ;;  %v5456_v8 = vld [vmem:[%s6253_s0 + $0x158] sm:$0xff]   ;;  %v2792_v32 = vsel %vm134_vm0, %v3833_v0, 0.0 }
 0x17e   :  { %3361 = vmatprep.mubr.msk.f32.mxu0 %vm1187_vm7, %v1185_v54  ;;  %v314_v56 = vpop.xlane.xlu1 %313  ;;  %v662_v61 = vpop.xlane.xlu0 %661  ;;  %v1600_v47 = vsel %vm929_vm10, %v1599_v63, %v1595_v27  ;;  %v1103_v52 = vsel %vm6306_vm8, %v1102_v19, %v1098_v21  ;;  %v6310_v63 = vld [vmem:[#allocation4_spill] sm:$0xff]  ;;  %v2747_v39 = vsel %vm134_vm0, %v3804_v3, 0.0  ;;  %v3660_v37 = vunpack.c.l.bf16 %v5456_v8  ;;  %v6313_v54 = vld [vmem:[#allocation13_spill] sm:$0xff] }
 0x17f   :  { %v374_v43 = vmul.f32 0.020408163, %v314_v56  ;;  %v750_v50 = vmul.f32 0.020408163, %v662_v61  ;;  %v1605_v23 = vsel %vm936_vm11, %v1604_v1, %v1600_v47  ;;  %v965_v51 = vsel %vm964_vm15, %v963_v59, %v958_v57  ;;  %v5473_v27 = vld [vmem:[%s6253_s0 + $0x338] sm:$0xff]   ;;  %v6314_v56 = vld [vmem:[#allocation16_spill] sm:$0xff] }
 0x180   :  { %v1108_v26 = vsel %vm957_vm14, %v1107_v4, %v1103_v52  ;;  %v1610_v12 = vsel %vm943_vm12, %v1609_v6, %v1605_v23  ;;  %v3629_v5 = vunpack.c.h.bf16 %v6312_v31  ;;  %v1889_v4 = vsel %vm134_vm0, %v3660_v37, 0.0 }
 0x181   :  { %v1614_v14 = vrot.slane %v374_v43, %v4488_v38  ;;  %v1112_v30 = vrot.slane %v750_v50, %v6305_v25  ;;  %1977 = vadd.xlane.f32.xlu1 %v5323_v16  ;;  %1932 = vadd.xlane.f32.xlu0 %v5327_v33  ;;  %v3720_v6 = vunpack.c.l.bf16 %v5473_v27  ;;  %v3689_v61 = vunpack.c.h.bf16 %v6314_v56  ;;  %v5485_v43 = vld [vmem:[%s6253_s0 + $0x1c8] sm:$0xff]  }
 0x182   :  { %v1816_v11 = vpop.xlane.xlu1 %1815  ;;  %v1813_v9 = vpop.xlane.xlu0 %1812  ;;  %v1844_v59 = vsel %vm134_vm0, %v3629_v5, 0.0  ;;  %v3745_v57 = vunpack.c.h.bf16 %v5310_v10  ;;  %v3661_v31 = vunpack.c.h.bf16 %v5456_v8  ;;  %vm6324_vm8 = vcmask 523712  }
 0x183   :  { %v1992_v41 = vmul.f32 0.020408163, %v1816_v11  ;;  %v1991_v34 = vmul.f32 0.020408163, %v1813_v9  ;;  %v1113_v16 = vsel %vm964_vm15, %v1112_v30, %v1108_v26  ;;  %v1615_v33 = vsel %vm6302_vm6, %v1614_v14, %v1610_v12  ;;  %v5496_v9 = vld [vmem:[%s6253_s0 + $0x3a8] sm:$0xff]   ;;  %vm6326_vm6 = vmmov %vm6324_vm8 }
 0x184   :  { %v1184_v20 = vsel %vm1183_vm13, %v1113_v16, %v965_v51  ;;  %v1617_v36 = vsel %vm1183_vm13, %v1615_v33, %v6309_v15  ;;  %v1979_v23 = vsel %vm134_vm0, %v3720_v6, 0.0  ;;  %v1934_v14 = vsel %vm134_vm0, %v3689_v61, 0.0 }
 0x185   :  { %v2148_v58 = vrot.slane %v1992_v41, %v6310_v63  ;;  %v2144_v22 = vrot.slane %v1991_v34, %v6311_v46  ;;  %2703 = vadd.xlane.f32.xlu1 %v2702_v45  ;;  %2658 = vadd.xlane.f32.xlu0 %v2657_v28  ;;  %v3776_v30 = vunpack.c.l.bf16 %v5485_v43  ;;  %v2660_v34 = vsel %vm134_vm0, %v3745_v57, 0.0 }
 0x186   :  { %1255 = vmatmul.mubr.f32.vlgmr.msra.gmra.mrb[0].mxu0 %v1184_v20  ;;  %3362 = vmatprep.mubr.msk.f32.mxu1 %vm1187_vm7, %v1617_v36  ;;  %v1906_v35 = vpop.xlane.xlu1 %1905  ;;  %v1903_v40 = vpop.xlane.xlu0 %1902  ;;  %v3836_v16 = vunpack.c.l.bf16 %v5496_v9  ;;  %v3805_v33 = vunpack.c.h.bf16 %v5433_v53  ;;  %v1892_v8 = vsel %vm134_vm0, %v3661_v31, 0.0  ;;  %v3721_v6 = vunpack.c.h.bf16 %v5473_v27 }
 0x187   :  { %v2149_v19 = vsel %vm866_vm1, %v2148_v58, %v2144_v22  ;;  %v2022_v1 = vmul.f32 0.020408163, %v1906_v35  ;;  %1686 = vmatmul.mubr.f32.vlgmr.msra.gmra.mrb[0].mxu1 %v6313_v54  ;;  %v2021_v60 = vmul.f32 0.020408163, %v1903_v40  ;;  %v2705_v10 = vsel %vm134_vm0, %v3776_v30, 0.0  ;;  %v5510_v22 = vld [vmem:[%s6253_s0 + $0x120] sm:$0xff]  }
 0x188   :  { %v2795_v53 = vsel %vm134_vm0, %v3836_v16, 0.0  ;;  %v2750_v37 = vsel %vm134_vm0, %v3805_v33, 0.0  ;;  %v3632_v5 = vunpack.c.l.bf16 %v5510_v22  ;;  %v3777_v57 = vunpack.c.h.bf16 %v5485_v43 }
 0x189   :  { %v2296_v29 = vrot.slane %v2022_v1, %v6310_v63  ;;  %v2292_v13 = vrot.slane %v2021_v60, %v6311_v46  ;;  %2793 = vadd.xlane.f32.xlu1 %v2792_v32  ;;  %2748 = vadd.xlane.f32.xlu0 %v2747_v39  ;;  %v5522_v60 = vld [vmem:[%s6253_s0 + $0x300] sm:$0xff]   ;;  %v3837_v33 = vunpack.c.h.bf16 %v5496_v9  ;;  %v2052_v9 = vld [vmem:[%s6254_s1 + $0x1e8] sm:$0xff] }
 0x18a   :  { %v1861_v45 = vpop.xlane.xlu1 %1860  ;;  %v1819_v55 = vpop.xlane.xlu0 %1818  ;;  %v3692_v56 = vunpack.c.l.bf16 %v5522_v60 }
 0x18b   :  { %v2297_v21 = vsel %vm866_vm1, %v2296_v29, %v2292_v13  ;;  %v1993_v47 = vmul.f32 0.020408163, %v1819_v55  ;;  %v2007_v50 = vmul.f32 0.020408163, %v1861_v45  ;;  %v6316_v13 = vld [vmem:[#allocation6_spill] sm:$0xff] }
 0x18c   :  { %v1937_v30 = vsel %vm134_vm0, %v3692_v56, 0.0  ;;  %v6318_v56 = vld [vmem:[#allocation8_spill] sm:$0xff] }
 0x18d   :  { %v2153_v52 = vrot.slane %v1993_v47, %v6315_v48  ;;  %1890 = vadd.xlane.f32.xlu1 %v1889_v4  ;;  %1845 = vadd.xlane.f32.xlu0 %v1844_v59  ;;  %v2223_v51 = vrot.slane %v2007_v50, %v6311_v46  ;;  %v1847_v59 = vsel %vm134_vm0, %v3632_v5, 0.0  ;;  %v2798_v5 = vsel %vm134_vm0, %v3837_v33, 0.0 }
 0x18e   :  { %v1909_v7 = vpop.xlane.xlu1 %1908  ;;  %v1864_v28 = vpop.xlane.xlu0 %1863 }
 0x18f   :  { %v2154_v17 = vsel %vm873_vm2, %v2153_v52, %v2149_v19  ;;  %v2023_v0 = vmul.f32 0.020408163, %v1909_v7  ;;  %v2008_v11 = vmul.f32 0.020408163, %v1864_v28  ;;  %v5539_v52 = vld [vmem:[%s6253_s0 + $0x190] sm:$0xff]  }
 0x191   :  { %v2301_v26 = vrot.slane %v2023_v0, %v6315_v48  ;;  %v2227_v12 = vrot.slane %v2008_v11, %v6310_v63  ;;  %1980 = vadd.xlane.f32.xlu1 %v1979_v23  ;;  %1935 = vadd.xlane.f32.xlu0 %v1934_v14  ;;  %v1982_v14 = vsel %vm134_vm0, %v3721_v6, 0.0 }
 0x192   :  { %v1954_v3 = vpop.xlane.xlu1 %1953  ;;  %v1951_v41 = vpop.xlane.xlu0 %1950 }
 0x193   :  { %v2302_v20 = vsel %vm873_vm2, %v2301_v26, %v2297_v21  ;;  %v2228_v15 = vsel %vm866_vm1, %v2227_v12, %v2223_v51  ;;  %v2038_v36 = vmul.f32 0.020408163, %v1954_v3  ;;  %v2037_v58 = vmul.f32 0.020408163, %v1951_v41  ;;  %v5556_v12 = vld [vmem:[%s6253_s0 + $0x370] sm:$0xff]  }
 0x195   :  { %v2375_v35 = vrot.slane %v2038_v36, %v6310_v63  ;;  %v2371_v40 = vrot.slane %v2037_v58, %v6311_v46  ;;  %2706 = vadd.xlane.f32.xlu1 %v2705_v10  ;;  %2661 = vadd.xlane.f32.xlu0 %v2660_v34  ;;  %v2708_v34 = vsel %vm134_vm0, %v3777_v57, 0.0 }
 0x196   :  { %v1867_v32 = vpop.xlane.xlu1 %1866  ;;  %v1822_v39 = vpop.xlane.xlu0 %1821 }
 0x197   :  { %v2376_v19 = vsel %vm866_vm1, %v2375_v35, %v2371_v40  ;;  %v2009_v1 = vmul.f32 0.020408163, %v1867_v32  ;;  %v1994_v54 = vmul.f32 0.020408163, %v1822_v39  ;;  %v5570_v35 = vld [vmem:[%s6253_s0 + $0x160] sm:$0xff]  }
 0x198   :  { %v2051_v40 = vld [vmem:[%s6254_s1 + $0x1e0] sm:$0xff] }
 0x199   :  { %v2232_v29 = vrot.slane %v2009_v1, %v6315_v48  ;;  %v2158_v45 = vrot.slane %v1994_v54, %v6316_v13  ;;  %2796 = vadd.xlane.f32.xlu1 %v2795_v53  ;;  %2751 = vadd.xlane.f32.xlu0 %v2750_v37  ;;  %v4056_v53 = vpack.c.bf16 %v2052_v9, %v2051_v40  ;;  %v3664_v1 = vunpack.c.l.bf16 %v5570_v35 }
 0x19a   :  { %v1957_v55 = vpop.xlane.xlu1 %1956  ;;  %v1912_v4 = vpop.xlane.xlu0 %1911  ;;  %v3633_v54 = vunpack.c.h.bf16 %v5510_v22  ;;  %v2054_v22 = vld [vmem:[%s6254_s1 + $0x1f8] sm:$0xff] }
 0x19b   :  { %v5531_v61 = vsel %vm873_vm2, %v2232_v29, %v2228_v15  ;;  %v5534_v21 = vsel %vm880_vm3, %v2158_v45, %v2154_v17  ;;  %v2039_v47 = vmul.f32 0.020408163, %v1957_v55  ;;  %v2024_v50 = vmul.f32 0.020408163, %v1912_v4  ;;  %v5590_v4 = vld [vmem:[%s6253_s0 + $0x340] sm:$0xff]   ;;  %4057 = vmatpush1.bf16.msra.mxu0 %v4056_v53 }
 0x19c   :  { %v3748_v17 = vunpack.c.l.bf16 %v5539_v52 }
 0x19d   :  { %v2380_v7 = vrot.slane %v2039_v47, %v6315_v48  ;;  %v2306_v28 = vrot.slane %v2024_v50, %v6316_v13  ;;  %1893 = vadd.xlane.f32.xlu1 %v1892_v8  ;;  %1848 = vadd.xlane.f32.xlu0 %v1847_v59  ;;  %v6317_v8 = vmov 0.0|0.0   ;;  %v2053_v59 = vld [vmem:[%s6254_s1 + $0x1f0] sm:$0xff] }
 0x19e   :  { %v2638_v27 = vpop.xlane.xlu1 %2637  ;;  %v2635_v23 = vpop.xlane.xlu0 %2634  ;;  %v2663_v16 = vsel %vm134_vm0, %v3748_v17, 0.0  ;;  %4058 = vmatprep.subr.bf16.mxu0 %v6317_v8  ;;  %v4059_v50 = vpack.c.bf16 %v2054_v22, %v2053_v59  ;;  %v5663_v22 = vld [vmem:[%s6253_s0 + $0x128] sm:$0xff]  }
 0x19f   :  { %v5548_v0 = vsel %vm873_vm2, %v2380_v7, %v2376_v19  ;;  %v5551_v11 = vsel %vm880_vm3, %v2306_v28, %v2302_v20  ;;  %v2814_v51 = vmul.f32 0.020408163, %v2638_v27  ;;  %v2813_v26 = vmul.f32 0.020408163, %v2635_v23 }
 0x1a0   :  { %v3808_v20 = vunpack.c.l.bf16 %v5556_v12  ;;  %v1895_v27 = vsel %vm134_vm0, %v3664_v1, 0.0  ;;  %v1850_v23 = vsel %vm134_vm0, %v3633_v54, 0.0  ;;  %4060 = vmatpush1.bf16.msra.mxu0 %v4059_v50  ;;  %v3809_v54 = vunpack.c.h.bf16 %v5556_v12  ;;  %v2059_v12 = vld [vmem:[%s6254_s1 + $0x220] sm:$0xff] }
 0x1a1   :  { %v2970_v3 = vrot.slane %v2814_v51, %v6310_v63  ;;  %v2966_v41 = vrot.slane %v2813_v26, %v6311_v46  ;;  %1983 = vadd.xlane.f32.xlu1 %v1982_v14  ;;  %1938 = vadd.xlane.f32.xlu0 %v1937_v30  ;;  %v3724_v14 = vunpack.c.l.bf16 %v5590_v4  ;;  %v3693_v30 = vunpack.c.h.bf16 %v5522_v60  ;;  %v2055_v60 = vld [vmem:[%s6254_s1 + $0x200] sm:$0xff] }
 0x1a2   :  { %v2728_v43 = vpop.xlane.xlu1 %2727  ;;  %v2725_v10 = vpop.xlane.xlu0 %2724  ;;  %v2753_v19 = vsel %vm134_vm0, %v3808_v20, 0.0  ;;  %4061 = vmatprep.subr.bf16.mxu0 %v6317_v8 }
 0x1a3   :  { %v5565_v15 = vsel %vm866_vm1, %v2970_v3, %v2966_v41  ;;  %v2844_v36 = vmul.f32 0.020408163, %v2728_v43  ;;  %v2843_v58 = vmul.f32 0.020408163, %v2725_v10  ;;  %v5616_v3 = vld [vmem:[%s6253_s0 + $0x1d0] sm:$0xff]   ;;  %v1940_v33 = vsel %vm134_vm0, %v3693_v30, 0.0 }
 0x1a4   :  { %v3780_v20 = vunpack.c.l.bf16 %v5616_v3  ;;  %v2756_v30 = vsel %vm134_vm0, %v3809_v54, 0.0 }
 0x1a5   :  { %v3118_v32 = vrot.slane %v2844_v36, %v6310_v63  ;;  %v3114_v39 = vrot.slane %v2843_v58, %v6311_v46  ;;  %2709 = vadd.xlane.f32.xlu1 %v2708_v34  ;;  %2664 = vadd.xlane.f32.xlu0 %v2663_v16  ;;  %v1985_v16 = vsel %vm134_vm0, %v3724_v14, 0.0  ;;  %v3749_v36 = vunpack.c.h.bf16 %v5539_v52  ;;  %v2057_v52 = vld [vmem:[%s6254_s1 + $0x210] sm:$0xff] }
 0x1a6   :  { %v1870_v37 = vpop.xlane.xlu1 %1869  ;;  %v1825_v31 = vpop.xlane.xlu0 %1824 }
 0x1a7   :  { %v5585_v29 = vsel %vm866_vm1, %v3118_v32, %v3114_v39  ;;  %v2010_v45 = vmul.f32 0.020408163, %v1870_v37  ;;  %v1995_v55 = vmul.f32 0.020408163, %v1825_v31  ;;  %v5642_v32 = vld [vmem:[%s6253_s0 + $0x3b0] sm:$0xff]  }
 0x1a8   :  { %v3840_v1 = vunpack.c.l.bf16 %v5642_v32 }
 0x1a9   :  { %v2237_v6 = vrot.slane %v2010_v45, %v6316_v13  ;;  %v2163_v47 = vrot.slane %v1995_v55, %v6318_v56  ;;  %2799 = vadd.xlane.f32.xlu1 %v2798_v5  ;;  %2754 = vadd.xlane.f32.xlu0 %v2753_v19  ;;  %v2711_v5 = vsel %vm134_vm0, %v3780_v20, 0.0  ;;  %v2666_v19 = vsel %vm134_vm0, %v3749_v36, 0.0  ;;  %v2874_v20 = vld [vmem:[%s6254_s1 + $0x2d8] sm:$0xff] }
 0x1aa   :  { %v1960_v7 = vpop.xlane.xlu1 %1959  ;;  %v1915_v28 = vpop.xlane.xlu0 %1914  ;;  %v2801_v14 = vsel %vm134_vm0, %v3840_v1, 0.0  ;;  %v6319_v1 = vld [vmem:[#allocation7_spill] sm:$0xff] }
 0x1ab   :  { %v5607_v57 = vsel %vm880_vm3, %v2237_v6, %v5531_v61  ;;  %v5611_v17 = vsel %vm887_vm4, %v2163_v47, %v5534_v21  ;;  %v2040_v51 = vmul.f32 0.020408163, %v1960_v7  ;;  %v2025_v26 = vmul.f32 0.020408163, %v1915_v28  ;;  %v2056_v61 = vld [vmem:[%s6254_s1 + $0x208] sm:$0xff] }
 0x1ac   :  { %v4062_v43 = vpack.c.bf16 %v2056_v61, %v2055_v60  ;;  %v3665_v7 = vunpack.c.h.bf16 %v5570_v35  ;;  %v5689_v35 = vld [vmem:[%s6253_s0 + $0x308] sm:$0xff]  }
 0x1ad   :  { %v2385_v21 = vrot.slane %v2040_v51, %v6316_v13  ;;  %v2311_v41 = vrot.slane %v2025_v26, %v6318_v56  ;;  %1896 = vadd.xlane.f32.xlu1 %v1895_v27  ;;  %1851 = vadd.xlane.f32.xlu0 %v1850_v23  ;;  %v3636_v51 = vunpack.c.l.bf16 %v5663_v22 }
 0x1ae   :  { %v2683_v10 = vpop.xlane.xlu1 %2682  ;;  %v2641_v34 = vpop.xlane.xlu0 %2640  ;;  %4063 = vmatpush1.bf16.msra.mxu0 %v4062_v43  ;;  %v2873_v43 = vld [vmem:[%s6254_s1 + $0x2d0] sm:$0xff] }
 0x1af   :  { %v5633_v58 = vsel %vm880_vm3, %v2385_v21, %v5548_v0  ;;  %v5637_v40 = vsel %vm887_vm4, %v2311_v41, %v5551_v11  ;;  %v2815_v9 = vmul.f32 0.020408163, %v2641_v34  ;;  %v2829_v39 = vmul.f32 0.020408163, %v2683_v10  ;;  %4064 = vmatprep.subr.bf16.mxu0 %v6317_v8  ;;  %v2058_v0 = vld [vmem:[%s6254_s1 + $0x218] sm:$0xff]  ;;  %v2061_v41 = vld [vmem:[%s6254_s1 + $0x230] sm:$0xff] }
 0x1b0   :  { %v4065_v53 = vpack.c.bf16 %v2058_v0, %v2057_v52  ;;  %v3725_v52 = vunpack.c.h.bf16 %v5590_v4  ;;  %v3696_v0 = vunpack.c.l.bf16 %v5689_v35  ;;  %v2063_v4 = vld [vmem:[%s6254_s1 + $0x240] sm:$0xff] }
 0x1b1   :  { %v2975_v11 = vrot.slane %v2815_v9, %v6315_v48  ;;  %1986 = vadd.xlane.f32.xlu1 %v1985_v16  ;;  %1941 = vadd.xlane.f32.xlu0 %v1940_v33  ;;  %v3045_v6 = vrot.slane %v2829_v39, %v6311_v46  ;;  %v1898_v16 = vsel %vm134_vm0, %v3665_v7, 0.0  ;;  %v1853_v39 = vsel %vm134_vm0, %v3636_v51, 0.0  ;;  %v2877_v51 = vld [vmem:[%s6254_s1 + $0x2f0] sm:$0xff] }
 0x1b2   :  { %v2731_v37 = vpop.xlane.xlu1 %2730  ;;  %v2686_v31 = vpop.xlane.xlu0 %2685  ;;  %4066 = vmatpush1.bf16.msra.mxu0 %v4065_v53 }
 0x1b3   :  { %v5658_v45 = vsel %vm873_vm2, %v2975_v11, %v5565_v15  ;;  %v2845_v55 = vmul.f32 0.020408163, %v2731_v37  ;;  %v2830_v59 = vmul.f32 0.020408163, %v2686_v31  ;;  %4067 = vmatprep.subr.bf16.mxu0 %v6317_v8  ;;  %v2060_v15 = vld [vmem:[%s6254_s1 + $0x228] sm:$0xff]  ;;  %v5716_v37 = vld [vmem:[%s6253_s0 + $0x198] sm:$0xff]  }
 0x1b4   :  { %v4068_v28 = vpack.c.bf16 %v2060_v15, %v2059_v12  ;;  %v2064_v31 = vld [vmem:[%s6254_s1 + $0x248] sm:$0xff]  ;;  %v3752_v7 = vunpack.c.l.bf16 %v5716_v37 }
 0x1b5   :  { %v3123_v47 = vrot.slane %v2845_v55, %v6315_v48  ;;  %v3049_v50 = vrot.slane %v2830_v59, %v6310_v63  ;;  %2712 = vadd.xlane.f32.xlu1 %v2711_v5  ;;  %2667 = vadd.xlane.f32.xlu0 %v2666_v19  ;;  %v2875_v5 = vld [vmem:[%s6254_s1 + $0x2e0] sm:$0xff]  ;;  %v3781_v55 = vunpack.c.h.bf16 %v5616_v3  ;;  %v4074_v59 = vpack.c.bf16 %v2064_v31, %v2063_v4  ;;  %v2880_v31 = vld [vmem:[%s6254_s1 + $0x308] sm:$0xff] }
 0x1b6   :  { %v2776_v27 = vpop.xlane.xlu1 %2775  ;;  %v2773_v23 = vpop.xlane.xlu0 %2772  ;;  %4069 = vmatpush1.bf16.msra.mxu0 %v4068_v28 }
 0x1b7   :  { %v5681_v26 = vsel %vm873_vm2, %v3123_v47, %v5585_v29  ;;  %v5684_v60 = vsel %vm866_vm1, %v3049_v50, %v3045_v6  ;;  %v2860_v61 = vmul.f32 0.020408163, %v2776_v27  ;;  %v2859_v21 = vmul.f32 0.020408163, %v2773_v23  ;;  %4070 = vmatprep.subr.bf16.mxu0 %v6317_v8  ;;  %v2062_v29 = vld [vmem:[%s6254_s1 + $0x238] sm:$0xff]  ;;  %v2876_v6 = vld [vmem:[%s6254_s1 + $0x2e8] sm:$0xff] }
 0x1b8   :  { %v4071_v33 = vpack.c.bf16 %v2062_v29, %v2061_v41  ;;  %v1988_v47 = vsel %vm134_vm0, %v3725_v52, 0.0  ;;  %v1943_v50 = vsel %vm134_vm0, %v3696_v0, 0.0  ;;  %v4104_v28 = vpack.c.bf16 %v2876_v6, %v2875_v5 }
 0x1b9   :  { %v3197_v10 = vrot.slane %v2860_v61, %v6310_v63  ;;  %v3193_v34 = vrot.slane %v2859_v21, %v6311_v46  ;;  %2802 = vadd.xlane.f32.xlu1 %v2801_v14  ;;  %2757 = vadd.xlane.f32.xlu0 %v2756_v30  ;;  %v4101_v63 = vpack.c.bf16 %v2874_v20, %v2873_v43  ;;  %v5749_v30 = vld [vmem:[%s6253_s0 + $0x378] sm:$0xff]   ;;  %v2714_v41 = vsel %vm134_vm0, %v3781_v55, 0.0 }
 0x1ba   :  { %v1873_v36 = vpop.xlane.xlu1 %1872  ;;  %v1828_v9 = vpop.xlane.xlu0 %1827  ;;  %4072 = vmatpush1.bf16.msra.mxu0 %v4071_v33  ;;  %v2878_v43 = vld [vmem:[%s6254_s1 + $0x2f8] sm:$0xff]  ;;  %v3841_v33 = vunpack.c.h.bf16 %v5642_v32  ;;  %v3812_v20 = vunpack.c.l.bf16 %v5749_v30  ;;  %v2067_v32 = vld [vmem:[%s6254_s1 + $0x260] sm:$0xff] }
 0x1bb   :  { %v5711_v46 = vsel %vm866_vm1, %v3197_v10, %v3193_v34  ;;  %v2011_v11 = vmul.f32 0.020408163, %v1873_v36  ;;  %v1996_v53 = vmul.f32 0.020408163, %v1828_v9  ;;  %4102 = vmatpush1.bf16.msra.mxu1 %v4101_v63  ;;  %4073 = vmatprep.subr.bf16.mxu0 %v6317_v8  ;;  %v4107_v36 = vpack.c.bf16 %v2878_v43, %v2877_v51  ;;  %v2068_v63 = vld [vmem:[%s6254_s1 + $0x268] sm:$0xff] }
 0x1bc   :  { %4103 = vmatprep.subr.bf16.mxu1 %v6317_v8  ;;  %v4080_v4 = vpack.c.bf16 %v2068_v63, %v2067_v32  ;;  %v2759_v55 = vsel %vm134_vm0, %v3812_v20, 0.0  ;;  %v6320_v20 = vld [vmem:[#allocation9_spill] sm:$0xff]  ;;  %v2884_v32 = vld [vmem:[%s6254_s1 + $0x328] sm:$0xff]  ;;  %vm6321_vm1 = vcmask 458112  }
 0x1bd   :  { %v2242_v19 = vrot.slane %v2011_v11, %v6318_v56  ;;  %v2168_v54 = vrot.slane %v1996_v53, %v6319_v1  ;;  %1899 = vadd.xlane.f32.xlu1 %v1898_v16  ;;  %1854 = vadd.xlane.f32.xlu0 %v1853_v39  ;;  %v2669_v16 = vsel %vm134_vm0, %v3752_v7, 0.0  ;;  %v3697_v53 = vunpack.c.h.bf16 %v5689_v35 }
 0x1be   :  { %v1963_v12 = vpop.xlane.xlu1 %1962  ;;  %v1918_v15 = vpop.xlane.xlu0 %1917  ;;  %4075 = vmatpush1.bf16.msra.mxu0 %v4074_v59  ;;  %v3637_v59 = vunpack.c.h.bf16 %v5663_v22  ;;  %v2069_v22 = vld [vmem:[%s6254_s1 + $0x270] sm:$0xff] }
 0x1bf   :  { %v5740_v27 = vsel %vm887_vm4, %v2242_v19, %v5607_v57  ;;  %v5744_v3 = vsel %vm894_vm5, %v2168_v54, %v5611_v17  ;;  %v2041_v23 = vmul.f32 0.020408163, %v1963_v12  ;;  %v2026_v14 = vmul.f32 0.020408163, %v1918_v15  ;;  %4105 = vmatpush1.bf16.msra.mxu1 %v4104_v28  ;;  %4076 = vmatprep.subr.bf16.mxu0 %v6317_v8  ;;  %v2065_v57 = vld [vmem:[%s6254_s1 + $0x250] sm:$0xff]  ;;  %v2066_v17 = vld [vmem:[%s6254_s1 + $0x258] sm:$0xff] }
 0x1c0   :  { %v4077_v29 = vpack.c.bf16 %v2066_v17, %v2065_v57  ;;  %4106 = vmatprep.subr.bf16.mxu1 %v6317_v8  ;;  %v2804_v54 = vsel %vm134_vm0, %v3841_v33, 0.0  ;;  %v2882_v57 = vld [vmem:[%s6254_s1 + $0x318] sm:$0xff]  ;;  %v2072_v33 = vld [vmem:[%s6254_s1 + $0x288] sm:$0xff] }
 0x1c1   :  { %v2390_v61 = vrot.slane %v2041_v23, %v6318_v56  ;;  %v2316_v21 = vrot.slane %v2026_v14, %v6319_v1  ;;  %1989 = vadd.xlane.f32.xlu1 %v1988_v47  ;;  %1944 = vadd.xlane.f32.xlu0 %v1943_v50  ;;  %v5810_v50 = vld [vmem:[%s6253_s0 + $0x1d8] sm:$0xff]   ;;  %v1946_v23 = vsel %vm134_vm0, %v3697_v53, 0.0  ;;  %v3813_v53 = vunpack.c.h.bf16 %v5749_v30  ;;  %v2885_v30 = vld [vmem:[%s6254_s1 + $0x330] sm:$0xff] }
 0x1c2   :  { %v2689_v10 = vpop.xlane.xlu1 %2688  ;;  %v2644_v34 = vpop.xlane.xlu0 %2643  ;;  %4078 = vmatpush1.bf16.msra.mxu0 %v4077_v29 }
 0x1c3   :  { %v5773_v9 = vsel %vm887_vm4, %v2390_v61, %v5633_v58  ;;  %v5777_v39 = vsel %vm894_vm5, %v2316_v21, %v5637_v40  ;;  %v2831_v52 = vmul.f32 0.020408163, %v2689_v10  ;;  %v2816_v0 = vmul.f32 0.020408163, %v2644_v34  ;;  %4108 = vmatpush1.bf16.msra.mxu1 %v4107_v36  ;;  %4079 = vmatprep.subr.bf16.mxu0 %v6317_v8  ;;  %v2879_v58 = vld [vmem:[%s6254_s1 + $0x300] sm:$0xff] }
 0x1c4   :  { %4109 = vmatprep.subr.bf16.mxu1 %v6317_v8  ;;  %v4110_v6 = vpack.c.bf16 %v2880_v31, %v2879_v58  ;;  %v1856_v61 = vsel %vm134_vm0, %v3637_v59, 0.0  ;;  %v3784_v21 = vunpack.c.l.bf16 %v5810_v50 }
 0x1c5   :  { %v3054_v40 = vrot.slane %v2831_v52, %v6315_v48  ;;  %v2980_v11 = vrot.slane %v2816_v0, %v6316_v13  ;;  %2715 = vadd.xlane.f32.xlu1 %v2714_v41  ;;  %2670 = vadd.xlane.f32.xlu0 %v2669_v16  ;;  %v3753_v41 = vunpack.c.h.bf16 %v5716_v37  ;;  %v2071_v37 = vld [vmem:[%s6254_s1 + $0x280] sm:$0xff] }
 0x1c6   :  { %v2779_v5 = vpop.xlane.xlu1 %2778  ;;  %v2734_v19 = vpop.xlane.xlu0 %2733  ;;  %4081 = vmatpush1.bf16.msra.mxu0 %v4080_v4  ;;  %v4086_v0 = vpack.c.bf16 %v2072_v33, %v2071_v37  ;;  %v2888_v37 = vld [vmem:[%s6254_s1 + $0x348] sm:$0xff] }
 0x1c7   :  { %v5801_v12 = vsel %vm873_vm2, %v3054_v40, %v5684_v60  ;;  %v5805_v35 = vsel %vm880_vm3, %v2980_v11, %v5658_v45  ;;  %v2861_v15 = vmul.f32 0.020408163, %v2779_v5  ;;  %v2846_v47 = vmul.f32 0.020408163, %v2734_v19  ;;  %4111 = vmatpush1.bf16.msra.mxu1 %v4110_v6  ;;  %4082 = vmatprep.subr.bf16.mxu0 %v6317_v8  ;;  %v2070_v45 = vld [vmem:[%s6254_s1 + $0x278] sm:$0xff]  ;;  %v2881_v60 = vld [vmem:[%s6254_s1 + $0x310] sm:$0xff] }
 0x1c8   :  { %v4083_v14 = vpack.c.bf16 %v2070_v45, %v2069_v22  ;;  %4112 = vmatprep.subr.bf16.mxu1 %v6317_v8  ;;  %v4113_v29 = vpack.c.bf16 %v2882_v57, %v2881_v60  ;;  %v2717_v40 = vsel %vm134_vm0, %v3784_v21, 0.0  ;;  %v2672_v11 = vsel %vm134_vm0, %v3753_v41, 0.0  ;;  %v2886_v22 = vld [vmem:[%s6254_s1 + $0x338] sm:$0xff]  ;;  %v3957_v21 = vld [vmem:[%s6253_s0 + $0x380] sm:$0xff]  }
 0x1c9   :  { %v3202_v7 = vrot.slane %v2861_v15, %v6315_v48  ;;  %v3128_v28 = vrot.slane %v2846_v47, %v6316_v13  ;;  %2805 = vadd.xlane.f32.xlu1 %v2804_v54  ;;  %2760 = vadd.xlane.f32.xlu0 %v2759_v55  ;;  %v5834_v48 = vld [vmem:[%s6253_s0 + $0x3b8] sm:$0xff]   ;;  %v5876_v55 = vld [vmem:[%s6253_s0 + $0x1a0] sm:$0xff]  }
 0x1ca   :  { %v1876_v17 = vpop.xlane.xlu1 %1875  ;;  %v1831_v51 = vpop.xlane.xlu0 %1830  ;;  %4084 = vmatpush1.bf16.msra.mxu0 %v4083_v14  ;;  %v3844_v52 = vunpack.c.l.bf16 %v5834_v48  ;;  %v4119_v14 = vpack.c.bf16 %v2886_v22, %v2885_v30 }
 0x1cb   :  { %v5839_v43 = vsel %vm873_vm2, %v3202_v7, %v5711_v46  ;;  %v5843_v10 = vsel %vm880_vm3, %v3128_v28, %v5681_v26  ;;  %v2012_v34 = vmul.f32 0.020408163, %v1876_v17  ;;  %v1997_v16 = vmul.f32 0.020408163, %v1831_v51  ;;  %4114 = vmatpush1.bf16.msra.mxu1 %v4113_v29  ;;  %4085 = vmatprep.subr.bf16.mxu0 %v6317_v8  ;;  %v2883_v46 = vld [vmem:[%s6254_s1 + $0x320] sm:$0xff]  ;;  %vm6322_vm2 = vmmov %vm6321_vm1 }
 0x1cc   :  { %4115 = vmatprep.subr.bf16.mxu1 %v6317_v8  ;;  %v4116_v4 = vpack.c.bf16 %v2884_v32, %v2883_v46  ;;  %v2807_v15 = vsel %vm134_vm0, %v3844_v52, 0.0  ;;  %v2762_v7 = vsel %vm134_vm0, %v3813_v53, 0.0  ;;  %v3785_v28 = vunpack.c.h.bf16 %v5810_v50  ;;  %v2075_v50 = vld [vmem:[%s6254_s1 + $0x2a0] sm:$0xff] }
 0x1cd   :  { %v2247_v26 = vrot.slane %v2012_v34, %v6319_v1  ;;  %v2173_v36 = vrot.slane %v1997_v16, %v6320_v20  ;;  %1947 = vadd.xlane.f32.xlu1 %v1946_v23  ;;  %1857 = vadd.xlane.f32.xlu0 %v1856_v61  ;;  %v3756_v23 = vunpack.c.l.bf16 %v5876_v55  ;;  %v3845_v34 = vunpack.c.h.bf16 %v5834_v48 }
 0x1ce   :  { %v1966_v63 = vpop.xlane.xlu1 %1965  ;;  %v1921_v58 = vpop.xlane.xlu0 %1920  ;;  %4087 = vmatpush1.bf16.msra.mxu0 %v4086_v0  ;;  %v3816_v52 = vunpack.c.l.bf16 %v3957_v21 }
 0x1cf   :  { %v5867_v31 = vsel %vm894_vm5, %v2247_v26, %v5740_v27  ;;  %v5871_v5 = vsel %vm6321_vm1, %v2173_v36, %v5744_v3  ;;  %v2042_v19 = vmul.f32 0.020408163, %v1966_v63  ;;  %v2027_v54 = vmul.f32 0.020408163, %v1921_v58  ;;  %4117 = vmatpush1.bf16.msra.mxu1 %v4116_v4  ;;  %4088 = vmatprep.subr.bf16.mxu0 %v6317_v8  ;;  %v2073_v27 = vld [vmem:[%s6254_s1 + $0x290] sm:$0xff]  ;;  %v2074_v3 = vld [vmem:[%s6254_s1 + $0x298] sm:$0xff] }
 0x1d0   :  { %v4089_v47 = vpack.c.bf16 %v2074_v3, %v2073_v27  ;;  %4118 = vmatprep.subr.bf16.mxu1 %v6317_v8  ;;  %v2720_v26 = vsel %vm134_vm0, %v3785_v28, 0.0  ;;  %v2675_v36 = vsel %vm134_vm0, %v3756_v23, 0.0  ;;  %v2810_v4 = vsel %vm134_vm0, %v3845_v34, 0.0 }
 0x1d1   :  { %v2395_v59 = vrot.slane %v2042_v19, %v6319_v1  ;;  %v2321_v6 = vrot.slane %v2027_v54, %v6320_v20  ;;  %2718 = vadd.xlane.f32.xlu1 %v2717_v40  ;;  %2673 = vadd.xlane.f32.xlu0 %v2672_v11  ;;  %v2077_v40 = vld [vmem:[%s6254_s1 + $0x2b0] sm:$0xff]  ;;  %v2078_v11 = vld [vmem:[%s6254_s1 + $0x2b8] sm:$0xff]  ;;  %v2765_v30 = vsel %vm134_vm0, %v3816_v52, 0.0 }
 0x1d2   :  { %v2692_v45 = vpop.xlane.xlu1 %2691  ;;  %v2647_v60 = vpop.xlane.xlu0 %2646  ;;  %4090 = vmatpush1.bf16.msra.mxu0 %v4089_v47  ;;  %v4095_v19 = vpack.c.bf16 %v2078_v11, %v2077_v40  ;;  %v2890_v54 = vld [vmem:[%s6254_s1 + $0x358] sm:$0xff]  ;;  %v2895_v40 = vld [vmem:[%s6254_s1 + $0x380] sm:$0xff]  ;;  %v2896_v11 = vld [vmem:[%s6254_s1 + $0x388] sm:$0xff] }
 0x1d3   :  { %v5900_v57 = vsel %vm894_vm5, %v2395_v59, %v5773_v9  ;;  %v5904_v17 = vsel %vm6322_vm2, %v2321_v6, %v5777_v39  ;;  %v2832_v51 = vmul.f32 0.020408163, %v2692_v45  ;;  %v2817_v61 = vmul.f32 0.020408163, %v2647_v60  ;;  %4120 = vmatpush1.bf16.msra.mxu1 %v4119_v14  ;;  %4091 = vmatprep.subr.bf16.mxu0 %v6317_v8  ;;  %v2076_v9 = vld [vmem:[%s6254_s1 + $0x2a8] sm:$0xff]  ;;  %v2887_v39 = vld [vmem:[%s6254_s1 + $0x340] sm:$0xff] }
 0x1d4   :  { %v4092_v16 = vpack.c.bf16 %v2076_v9, %v2075_v50  ;;  %4121 = vmatprep.subr.bf16.mxu1 %v6317_v8  ;;  %v4122_v0 = vpack.c.bf16 %v2888_v37, %v2887_v39  ;;  %v3817_v59 = vunpack.c.h.bf16 %v3957_v21  ;;  %v3757_v6 = vunpack.c.h.bf16 %v5876_v55  ;;  %v2892_v21 = vld [vmem:[%s6254_s1 + $0x368] sm:$0xff]  ;;  %v2893_v37 = vld [vmem:[%s6254_s1 + $0x370] sm:$0xff] }
 0x1d5   :  { %v3059_v41 = vrot.slane %v2832_v51, %v6316_v13  ;;  %v2985_v29 = vrot.slane %v2817_v61, %v6318_v56  ;;  %2808 = vadd.xlane.f32.xlu1 %v2807_v15  ;;  %2763 = vadd.xlane.f32.xlu0 %v2762_v7  ;;  %v2891_v7 = vld [vmem:[%s6254_s1 + $0x360] sm:$0xff] }
 0x1d6   :  { %v2782_v33 = vpop.xlane.xlu1 %2781  ;;  %v2737_v46 = vpop.xlane.xlu0 %2736  ;;  %4093 = vmatpush1.bf16.msra.mxu0 %v4092_v16  ;;  %v2768_v14 = vsel %vm134_vm0, %v3817_v59, 0.0  ;;  %v2678_v51 = vsel %vm134_vm0, %v3757_v6, 0.0  ;;  %vm6325_vm0 = vmmov %vm6321_vm1 }
 0x1d7   :  { %v5930_v32 = vsel %vm880_vm3, %v3059_v41, %v5801_v12  ;;  %v5934_v48 = vsel %vm887_vm4, %v2985_v29, %v5805_v35  ;;  %v2862_v63 = vmul.f32 0.020408163, %v2782_v33  ;;  %v2847_v58 = vmul.f32 0.020408163, %v2737_v46  ;;  %4123 = vmatpush1.bf16.msra.mxu1 %v4122_v0  ;;  %4094 = vmatprep.subr.bf16.mxu0 %v6317_v8  ;;  %v2889_v12 = vld [vmem:[%s6254_s1 + $0x350] sm:$0xff] }
 0x1d8   :  { %4124 = vmatprep.subr.bf16.mxu1 %v6317_v8  ;;  %v4128_v29 = vpack.c.bf16 %v2892_v21, %v2891_v7  ;;  %v2901_v21 = vld [vmem:[%s6254_s1 + $0x3b0] sm:$0xff] }
 0x1d9   :  { %v3207_v35 = vrot.slane %v2862_v63, %v6316_v13  ;;  %v3133_v53 = vrot.slane %v2847_v58, %v6318_v56  ;;  %2721 = vadd.xlane.f32.xlu1 %v2720_v26  ;;  %2676 = vadd.xlane.f32.xlu0 %v2675_v36  ;;  %v4125_v13 = vpack.c.bf16 %v2890_v54, %v2889_v12 }
 0x1da   :  { %v1879_v27 = vpop.xlane.xlu1 %1878  ;;  %v1834_v3 = vpop.xlane.xlu0 %1833  ;;  %4096 = vmatpush1.bf16.msra.mxu0 %v4095_v19 }
 0x1db   :  { %v5957_v15 = vsel %vm880_vm3, %v3207_v35, %v5839_v43  ;;  %v5961_v47 = vsel %vm887_vm4, %v3133_v53, %v5843_v10  ;;  %v2013_v22 = vmul.f32 0.020408163, %v1879_v27  ;;  %v1998_v45 = vmul.f32 0.020408163, %v1834_v3  ;;  %4126 = vmatpush1.bf16.msra.mxu1 %v4125_v13  ;;  %4097 = vmatprep.subr.bf16.mxu0 %v6317_v8  ;;  %v2079_v43 = vld [vmem:[%s6254_s1 + $0x2c0] sm:$0xff]  ;;  %v2080_v10 = vld [vmem:[%s6254_s1 + $0x2c8] sm:$0xff]  ;;  %vm6323_vm3 = vmmov %vm6321_vm1 }
 0x1dc   :  { %4127 = vmatprep.subr.bf16.mxu1 %v6317_v8  ;;  %v4098_v61 = vpack.c.bf16 %v2080_v10, %v2079_v43  ;;  %v2897_v3 = vld [vmem:[%s6254_s1 + $0x390] sm:$0xff]  ;;  %v2900_v43 = vld [vmem:[%s6254_s1 + $0x3a8] sm:$0xff]  ;;  %vm6328_vm1 = vcmask 589312  }
 0x1dd   :  { %v2252_v60 = vrot.slane %v2013_v22, %v6320_v20  ;;  %v2178_v55 = vrot.slane %v1998_v45, %v4424_v42  ;;  %2811 = vadd.xlane.f32.xlu1 %v2810_v4  ;;  %2766 = vadd.xlane.f32.xlu0 %v2765_v30  ;;  %v2898_v30 = vld [vmem:[%s6254_s1 + $0x398] sm:$0xff] }
 0x1de   :  { %v1969_v28 = vpop.xlane.xlu1 %1968  ;;  %v1924_v23 = vpop.xlane.xlu0 %1923  ;;  %4099 = vmatpush1.bf16.msra.mxu0 %v4098_v61 }
 0x1df   :  { %v2253_v50 = vsel %vm6323_vm3, %v2252_v60, %v5867_v31  ;;  %v2179_v9 = vsel %vm6324_vm8, %v2178_v55, %v5871_v5  ;;  %v2043_v39 = vmul.f32 0.020408163, %v1969_v28  ;;  %v2028_v41 = vmul.f32 0.020408163, %v1924_v23  ;;  %v2894_v31 = vld [vmem:[%s6254_s1 + $0x378] sm:$0xff]  ;;  %4129 = vmatpush1.bf16.msra.mxu1 %v4128_v29  ;;  %v2899_v55 = vld [vmem:[%s6254_s1 + $0x3a0] sm:$0xff]  ;;  %vm6330_vm3 = vmmov %vm6328_vm1 }
 0x1e0   :  { %v4131_v46 = vpack.c.bf16 %v2894_v31, %v2893_v37  ;;  %4130 = vmatprep.subr.bf16.mxu1 %v6317_v8  ;;  %vm6331_vm8 = vmmov %vm6325_vm0 }
 0x1e1   :  { %v2400_v34 = vrot.slane %v2043_v39, %v6320_v20  ;;  %v2326_v16 = vrot.slane %v2028_v41, %v4424_v42  ;;  %2769 = vadd.xlane.f32.xlu1 %v2768_v14  ;;  %2679 = vadd.xlane.f32.xlu0 %v2678_v51  ;;  %v2902_v39 = vld [vmem:[%s6254_s1 + $0x3b8] sm:$0xff] }
 0x1e2   :  { %v2695_v33 = vpop.xlane.xlu1 %2694  ;;  %v2650_v5 = vpop.xlane.xlu0 %2649 }
 0x1e3   :  { %v2401_v26 = vsel %vm6325_vm0, %v2400_v34, %v5900_v57  ;;  %v2327_v36 = vsel %vm6326_vm6, %v2326_v16, %v5904_v17  ;;  %v2833_v52 = vmul.f32 0.020408163, %v2695_v33  ;;  %v2818_v0 = vmul.f32 0.020408163, %v2650_v5  ;;  %4132 = vmatpush1.bf16.msra.mxu1 %v4131_v46 }
 0x1e4   :  { %v4134_v17 = vpack.c.bf16 %v2896_v11, %v2895_v40  ;;  %4133 = vmatprep.subr.bf16.mxu1 %v6317_v8 }
 0x1e5   :  { %v3064_v63 = vrot.slane %v2833_v52, %v6318_v56  ;;  %v2990_v58 = vrot.slane %v2818_v0, %v6319_v1 }
 0x1e6   :  { %v2785_v57 = vpop.xlane.xlu1 %2784  ;;  %v2740_v12 = vpop.xlane.xlu0 %2739 }
 0x1e7   :  { %v3065_v35 = vsel %vm887_vm4, %v3064_v63, %v5930_v32  ;;  %v2991_v53 = vsel %vm894_vm5, %v2990_v58, %v5934_v48  ;;  %v2863_v4 = vmul.f32 0.020408163, %v2785_v57  ;;  %v2848_v19 = vmul.f32 0.020408163, %v2740_v12  ;;  %4135 = vmatpush1.bf16.msra.mxu1 %v4134_v17 }
 0x1e8   :  { %v4137_v48 = vpack.c.bf16 %v2898_v30, %v2897_v3  ;;  %4136 = vmatprep.subr.bf16.mxu1 %v6317_v8 }
 0x1e9   :  { %v3212_v54 = vrot.slane %v2863_v4, %v6318_v56  ;;  %v3138_v27 = vrot.slane %v2848_v19, %v6319_v1 }
 0x1ea   :  { %v1882_v32 = vpop.xlane.xlu1 %1881  ;;  %v1837_v59 = vpop.xlane.xlu0 %1836 }
 0x1eb   :  { %v3213_v6 = vsel %vm887_vm4, %v3212_v54, %v5957_v15  ;;  %v3139_v56 = vsel %vm894_vm5, %v3138_v27, %v5961_v47  ;;  %v2014_v13 = vmul.f32 0.020408163, %v1882_v32  ;;  %v1999_v22 = vmul.f32 0.020408163, %v1837_v59  ;;  %4138 = vmatpush1.bf16.msra.mxu1 %v4137_v48  ;;  %vm6327_vm4 = vmmov %vm6326_vm6 }
 0x1ec   :  { %v4140_v47 = vpack.c.bf16 %v2900_v43, %v2899_v55  ;;  %4139 = vmatprep.subr.bf16.mxu1 %v6317_v8  ;;  %vm6329_vm2 = vmmov %vm6327_vm4 }
 0x1ed   :  { %v2257_v45 = vrot.slane %v2014_v13, %v4424_v42  ;;  %v2183_v60 = vrot.slane %v1999_v22, %v4452_v2  ;;  %vm6332_vm6 = vmmov %vm6328_vm1 }
 0x1ee   :  { %v1972_v15 = vpop.xlane.xlu1 %1971  ;;  %v1927_v10 = vpop.xlane.xlu0 %1926 }
 0x1ef   :  { %v2258_v7 = vsel %vm6327_vm4, %v2257_v45, %v2253_v50  ;;  %v2184_v28 = vsel %vm6328_vm1, %v2183_v60, %v2179_v9  ;;  %v2044_v23 = vmul.f32 0.020408163, %v1972_v15  ;;  %v2029_v14 = vmul.f32 0.020408163, %v1927_v10  ;;  %4141 = vmatpush1.bf16.msra.mxu1 %v4140_v47  ;;  %vm6334_vm4 = vmmov %vm6325_vm0 }
 0x1f0   :  { %v4143_v9 = vpack.c.bf16 %v2902_v39, %v2901_v21  ;;  %4142 = vmatprep.subr.bf16.mxu1 %v6317_v8 }
 0x1f1   :  { %v2405_v51 = vrot.slane %v2044_v23, %v4424_v42  ;;  %v2331_v61 = vrot.slane %v2029_v14, %v4452_v2 }
 0x1f2   :  { %v2698_v41 = vpop.xlane.xlu1 %2697  ;;  %v2653_v50 = vpop.xlane.xlu0 %2652 }
 0x1f3   :  { %v2406_v29 = vsel %vm6329_vm2, %v2405_v51, %v2401_v26  ;;  %v2332_v34 = vsel %vm6330_vm3, %v2331_v61, %v2327_v36  ;;  %v2834_v16 = vmul.f32 0.020408163, %v2698_v41  ;;  %v2819_v37 = vmul.f32 0.020408163, %v2653_v50  ;;  %4144 = vmatpush1.bf16.msra.mxu1 %v4143_v9 }
 0x1f5   :  { %v3069_v31 = vrot.slane %v2834_v16, %v6319_v1  ;;  %v2995_v33 = vrot.slane %v2819_v37, %v6320_v20 }
 0x1f6   :  { %v2788_v5 = vpop.xlane.xlu1 %2787  ;;  %v2743_v46 = vpop.xlane.xlu0 %2742 }
 0x1f7   :  { %v3070_v52 = vsel %vm894_vm5, %v3069_v31, %v3065_v35  ;;  %v2996_v0 = vsel %vm6331_vm8, %v2995_v33, %v2991_v53  ;;  %v2864_v63 = vmul.f32 0.020408163, %v2788_v5  ;;  %v2849_v58 = vmul.f32 0.020408163, %v2743_v46 }
 0x1f9   :  { %v3217_v26 = vrot.slane %v2864_v63, %v6319_v1  ;;  %v3143_v36 = vrot.slane %v2849_v58, %v6320_v20 }
 0x1fa   :  { %v1885_v40 = vpop.xlane.xlu1 %1884  ;;  %v1840_v11 = vpop.xlane.xlu0 %1839 }
 0x1fb   :  { %v3218_v8 = vsel %vm894_vm5, %v3217_v26, %v3213_v6  ;;  %v3144_v57 = vsel %vm6325_vm0, %v3143_v36, %v3139_v56  ;;  %v2015_v12 = vmul.f32 0.020408163, %v1885_v40  ;;  %v2000_v17 = vmul.f32 0.020408163, %v1840_v11  ;;  %vm6333_vm5 = vmmov %vm6328_vm1 }
 0x1fc   :  { %vm6335_vm1 = vmmov %vm6329_vm2 }
 0x1fd   :  { %v2262_v4 = vrot.slane %v2015_v12, %v4452_v2  ;;  %v2188_v35 = vrot.slane %v2000_v17, %v4446_v62  ;;  %vm6336_vm2 = vmmov %vm6325_vm0 }
 0x1fe   :  { %v1975_v19 = vpop.xlane.xlu1 %1974  ;;  %v1930_v53 = vpop.xlane.xlu0 %1929  ;;  %vm6337_vm3 = vmmov %vm6335_vm1 }
 0x1ff   :  { %v2263_v54 = vsel %vm6332_vm6, %v2262_v4, %v2258_v7  ;;  %v2189_v1 = vsel %vm922_vm9, %v2188_v35, %v2184_v28  ;;  %v2045_v27 = vmul.f32 0.020408163, %v1975_v19  ;;  %v2030_v3 = vmul.f32 0.020408163, %v1930_v53  ;;  %vm6338_vm8 = vmmov %vm6335_vm1 }
 0x200   :  { %vm6339_vm0 = vmmov %vm6333_vm5 }
 0x201   :  { %v2410_v30 = vrot.slane %v2045_v27, %v4452_v2  ;;  %v2336_v32 = vrot.slane %v2030_v3, %v4446_v62  ;;  %vm6340_vm6 = vmmov %vm6335_vm1 }
 0x202   :  { %v2701_v59 = vpop.xlane.xlu1 %2700  ;;  %v2656_v48 = vpop.xlane.xlu0 %2655 }
 0x203   :  { %v6061_v6 = vsel %vm6333_vm5, %v2410_v30, %v2406_v29  ;;  %v2337_v56 = vsel %vm922_vm9, %v2336_v32, %v2332_v34  ;;  %v2835_v13 = vmul.f32 0.020408163, %v2701_v59  ;;  %v2820_v22 = vmul.f32 0.020408163, %v2656_v48  ;;  %vm6341_vm5 = vmmov %vm6339_vm0 }
 0x205   :  { %v3074_v45 = vrot.slane %v2835_v13, %v6320_v20  ;;  %v3000_v60 = vrot.slane %v2820_v22, %v4424_v42 }
 0x206   :  { %v2791_v55 = vpop.xlane.xlu1 %2790  ;;  %v2746_v43 = vpop.xlane.xlu0 %2745 }
 0x207   :  { %v3075_v15 = vsel %vm6334_vm4, %v3074_v45, %v3070_v52  ;;  %v3001_v10 = vsel %vm6335_vm1, %v3000_v60, %v2996_v0  ;;  %v2865_v47 = vmul.f32 0.020408163, %v2791_v55  ;;  %v2850_v7 = vmul.f32 0.020408163, %v2746_v43  ;;  %vm6342_vm4 = vmmov %vm6339_vm0 }
 0x208   :  { %vm6343_vm1 = vmmov %vm6339_vm0 }
 0x209   :  { %v3222_v28 = vrot.slane %v2865_v47, %v6320_v20  ;;  %v3148_v23 = vrot.slane %v2850_v7, %v4424_v42 }
 0x20a   :  { %v1888_v14 = vpop.xlane.xlu1 %1887  ;;  %v1843_v51 = vpop.xlane.xlu0 %1842 }
 0x20b   :  { %v3223_v61 = vsel %vm6336_vm2, %v3222_v28, %v3218_v8  ;;  %v3149_v21 = vsel %vm6337_vm3, %v3148_v23, %v3144_v57  ;;  %v2016_v39 = vmul.f32 0.020408163, %v1888_v14  ;;  %v2001_v41 = vmul.f32 0.020408163, %v1843_v51 }
 0x20c   :  { %vm6344_vm2 = vcmask 917312  }
 0x20d   :  { %v2267_v50 = vrot.slane %v2016_v39, %v4446_v62  ;;  %v2193_v9 = vrot.slane %v2001_v41, %v4473_v24  ;;  %vm6345_vm3 = vmmov %vm6344_vm2 }
 0x20e   :  { %v1978_v29 = vpop.xlane.xlu1 %1977  ;;  %v1933_v34 = vpop.xlane.xlu0 %1932 }
 0x20f   :  { %v6075_v16 = vsel %vm922_vm9, %v2267_v50, %v2263_v54  ;;  %v6078_v20 = vsel %vm929_vm10, %v2193_v9, %v2189_v1  ;;  %v2031_v37 = vmul.f32 0.020408163, %v1933_v34 }
 0x211   :  { %v2341_v31 = vrot.slane %v2031_v37, %v4473_v24 }
 0x212   :  { %v2704_v33 = vpop.xlane.xlu1 %2703  ;;  %v2659_v5 = vpop.xlane.xlu0 %2658 }
 0x213   :  { %v6082_v46 = vsel %vm929_vm10, %v2341_v31, %v2337_v56  ;;  %v2836_v52 = vmul.f32 0.020408163, %v2704_v33  ;;  %v2821_v0 = vmul.f32 0.020408163, %v2659_v5  ;;  %v2046_v33 = vmul.f32 0.020408163, %v1978_v29 }
 0x215   :  { %v3079_v63 = vrot.slane %v2836_v52, %v4424_v42  ;;  %v3005_v58 = vrot.slane %v2821_v0, %v4452_v2 }
 0x216   :  { %v2794_v26 = vpop.xlane.xlu1 %2793  ;;  %v2749_v36 = vpop.xlane.xlu0 %2748 }
 0x217   :  { %v3080_v40 = vsel %vm6338_vm8, %v3079_v63, %v3075_v15  ;;  %v3006_v11 = vsel %vm6339_vm0, %v3005_v58, %v3001_v10  ;;  %v2866_v8 = vmul.f32 0.020408163, %v2794_v26  ;;  %v2851_v57 = vmul.f32 0.020408163, %v2749_v36  ;;  %vm6346_vm8 = vmmov %vm6344_vm2 }
 0x218   :  { %vm6347_vm0 = vmmov %vm6344_vm2 }
 0x219   :  { %v3227_v12 = vrot.slane %v2866_v8, %v4424_v42  ;;  %v3153_v17 = vrot.slane %v2851_v57, %v4452_v2 }
 0x21a   :  { %v1891_v4 = vpop.xlane.xlu1 %1890  ;;  %v6090_v35 = vpop.xlane.xlu0 %1845 }
 0x21b   :  { %v3228_v19 = vsel %vm6340_vm6, %v3227_v12, %v3223_v61  ;;  %v3154_v53 = vsel %vm6341_vm5, %v3153_v17, %v3149_v21  ;;  %v2017_v5 = vmul.f32 0.020408163, %v1891_v4  ;;  %vm6350_vm6 = vmmov %vm6347_vm0 }
 0x21c   :  { %vm6351_vm5 = vmmov %vm6347_vm0 }
 0x21d   :  { %v2272_v57 = vrot.slane %v2017_v5, %v4473_v24 }
 0x21e   :  { %v1981_v54 = vpop.xlane.xlu1 %1980  ;;  %v6094_v1 = vpop.xlane.xlu0 %1935 }
 0x21f   :  { %v2047_v52 = vmul.f32 0.020408163, %v1981_v54 }
 0x221   :  { %v2420_v12 = vrot.slane %v2047_v52, %v4473_v24 }
 0x222   :  { %v2707_v27 = vpop.xlane.xlu1 %2706  ;;  %v2662_v3 = vpop.xlane.xlu0 %2661 }
 0x223   :  { %v2837_v30 = vmul.f32 0.020408163, %v2707_v27  ;;  %v2822_v32 = vmul.f32 0.020408163, %v2662_v3 }
 0x225   :  { %v3084_v59 = vrot.slane %v2837_v30, %v4452_v2  ;;  %v3010_v42 = vrot.slane %v2822_v32, %v4446_v62  ;;  %v2273_v32 = vsel %vm929_vm10, %v2272_v57, %v6075_v16  ;;  %v2032_v16 = vmul.f32 0.020408163, %v6094_v1 }
 0x226   :  { %v2797_v48 = vpop.xlane.xlu1 %2796  ;;  %v2752_v56 = vpop.xlane.xlu0 %2751 }
 0x227   :  { %v6099_v13 = vsel %vm6342_vm4, %v3084_v59, %v3080_v40  ;;  %v6102_v22 = vsel %vm922_vm9, %v3010_v42, %v3006_v11  ;;  %v2867_v45 = vmul.f32 0.020408163, %v2797_v48  ;;  %v2852_v60 = vmul.f32 0.020408163, %v2752_v56 }
 0x228   :  { %v2415_v11 = vrot.slane %v2046_v33, %v4446_v62 }
 0x229   :  { %v3232_v55 = vrot.slane %v2867_v45, %v4452_v2  ;;  %v3158_v43 = vrot.slane %v2852_v60, %v4446_v62 }
 0x22a   :  { %v1894_v15 = vpop.xlane.xlu1 %1893  ;;  %v1849_v10 = vpop.xlane.xlu0 %1848  ;;  %v2416_v27 = vsel %vm922_vm9, %v2415_v11, %v6061_v6 }
 0x22b   :  { %v6107_v47 = vsel %vm6343_vm1, %v3232_v55, %v3228_v19  ;;  %v6110_v7 = vsel %vm922_vm9, %v3158_v43, %v3154_v53  ;;  %v2018_v0 = vmul.f32 0.020408163, %v1894_v15  ;;  %v2421_v59 = vsel %vm929_vm10, %v2420_v12, %v2416_v27 }
 0x22c   :  { %v2003_v33 = vmul.f32 0.020408163, %v1849_v10 }
 0x22d   :  { %v2277_v17 = vrot.slane %v2018_v0, %v4467_v18 }
 0x22e   :  { %v1984_v28 = vpop.xlane.xlu1 %1983  ;;  %v1939_v23 = vpop.xlane.xlu0 %1938 }
 0x22f   :  { %v2048_v63 = vmul.f32 0.020408163, %v1984_v28  ;;  %v2278_v42 = vsel %vm936_vm11, %v2277_v17, %v2273_v32 }
 0x231   :  { %v2425_v19 = vrot.slane %v2048_v63, %v4467_v18 }
 0x232   :  { %v6112_v14 = vpop.xlane.xlu1 %2709  ;;  %v6114_v51 = vpop.xlane.xlu0 %2664 }
 0x233   :  { %v2426_v48 = vsel %vm936_vm11, %v2425_v19, %v2421_v59 }
 0x236   :  { %v6116_v61 = vpop.xlane.xlu1 %2799  ;;  %v6118_v21 = vpop.xlane.xlu0 %2754 }
 0x23a   :  { %v1897_v2 = vpop.xlane.xlu1 %1896  ;;  %v1852_v39 = vpop.xlane.xlu0 %1851 }
 0x23b   :  { %v2019_v58 = vmul.f32 0.020408163, %v1897_v2  ;;  %v2002_v2 = vmul.f32 0.020408163, %v6090_v35  ;;  %v2004_v63 = vmul.f32 0.020408163, %v1852_v39  ;;  %v2203_v35 = vrot.slane %v2003_v33, %v4494_v44 }
 0x23d   :  { %v2282_v29 = vrot.slane %v2019_v58, %v4494_v44  ;;  %v2198_v11 = vrot.slane %v2002_v2, %v4467_v18 }
 0x23e   :  { %v1987_v41 = vpop.xlane.xlu1 %1986  ;;  %v1942_v50 = vpop.xlane.xlu0 %1941 }
 0x23f   :  { %v2049_v26 = vmul.f32 0.020408163, %v1987_v41  ;;  %v2283_v45 = vsel %vm943_vm12, %v2282_v29, %v2278_v42  ;;  %v2033_v41 = vmul.f32 0.020408163, %v1939_v23  ;;  %v2034_v5 = vmul.f32 0.020408163, %v1942_v50 }
 0x240   :  { %v2208_v50 = vrot.slane %v2004_v63, %v4488_v38  ;;  %v2838_v42 = vmul.f32 0.020408163, %v6112_v14 }
 0x241   :  { %v2430_v4 = vrot.slane %v2049_v26, %v4494_v44  ;;  %v2346_v26 = vrot.slane %v2032_v16, %v4467_v18  ;;  %v2351_v1 = vrot.slane %v2033_v41, %v4494_v44  ;;  %v2356_v23 = vrot.slane %v2034_v5, %v4488_v38 }
 0x242   :  { %v6120_v9 = vpop.xlane.xlu1 %2712  ;;  %v6122_v34 = vpop.xlane.xlu0 %2667  ;;  %v3089_v41 = vrot.slane %v2838_v42, %v4446_v62 }
 0x243   :  { %v2431_v60 = vsel %vm943_vm12, %v2430_v4, %v2426_v48  ;;  %v2839_v33 = vmul.f32 0.020408163, %v6120_v9 }
 0x244   :  { %v3090_v9 = vsel %vm922_vm9, %v3089_v41, %v6099_v13 }
 0x246   :  { %v6124_v37 = vpop.xlane.xlu1 %2802  ;;  %v6126_v31 = vpop.xlane.xlu0 %2757 }
 0x247   :  { %v2869_v63 = vmul.f32 0.020408163, %v6124_v37 }
 0x24a   :  { %v1900_v36 = vpop.xlane.xlu1 %1899  ;;  %v1855_v40 = vpop.xlane.xlu0 %1854 }
 0x24b   :  { %v2020_v8 = vmul.f32 0.020408163, %v1900_v36  ;;  %v2005_v36 = vmul.f32 0.020408163, %v1855_v40  ;;  %v2347_v40 = vsel %vm936_vm11, %v2346_v26, %v6082_v46 }
 0x24c   :  { %v2352_v27 = vsel %vm943_vm12, %v2351_v1, %v2347_v40 }
 0x24d   :  { %v2287_v3 = vrot.slane %v2020_v8, %v4488_v38  ;;  %v2213_v29 = vrot.slane %v2005_v36, %v6303_v49  ;;  %v2357_v32 = vsel %vm6346_vm8, %v2356_v23, %v2352_v27  ;;  %v2824_v36 = vmul.f32 0.020408163, %v6122_v34 }
 0x24e   :  { %v1990_v53 = vpop.xlane.xlu1 %1989  ;;  %v1945_v54 = vpop.xlane.xlu0 %1944 }
 0x24f   :  { %v2050_v30 = vmul.f32 0.020408163, %v1990_v53  ;;  %v2288_v43 = vsel %vm6344_vm2, %v2287_v3, %v2283_v45  ;;  %v2035_v58 = vmul.f32 0.020408163, %v1945_v54  ;;  %v2199_v54 = vsel %vm936_vm11, %v2198_v11, %v6078_v20 }
 0x250   :  { %v2823_v20 = vmul.f32 0.020408163, %v6114_v51 }
 0x251   :  { %v2435_v56 = vrot.slane %v2050_v30, %v4488_v38  ;;  %v2361_v12 = vrot.slane %v2035_v58, %v6303_v49  ;;  %v2204_v30 = vsel %vm943_vm12, %v2203_v35, %v2199_v54 }
 0x252   :  { %v2716_v55 = vpop.xlane.xlu1 %2715  ;;  %v6146_v6 = vpop.xlane.xlu0 %2670  ;;  %v2209_v46 = vsel %vm6347_vm0, %v2208_v50, %v2204_v30  ;;  %v3015_v51 = vrot.slane %v2823_v20, %v4473_v24 }
 0x253   :  { %v2436_v15 = vsel %vm6345_vm3, %v2435_v56, %v2431_v60  ;;  %v2362_v48 = vsel %vm957_vm14, %v2361_v12, %v2357_v32  ;;  %v2868_v60 = vmul.f32 0.020408163, %v6116_v61  ;;  %v2840_v11 = vmul.f32 0.020408163, %v2716_v55 }
 0x254   :  { %v2438_v28 = vsel %vm1183_vm13, %v2436_v15, %v2288_v43  ;;  %v2214_v43 = vsel %vm957_vm14, %v2213_v29, %v2209_v46  ;;  %v3020_v12 = vrot.slane %v2824_v36, %v4467_v18 }
 0x255   :  { %3363 = vmatprep.mubr.msk.f32.mxu0 %vm1187_vm7, %v2438_v28  ;;  %v2853_v28 = vmul.f32 0.020408163, %v6118_v21  ;;  %v3237_v61 = vrot.slane %v2868_v60, %v4446_v62  ;;  %v2854_v21 = vmul.f32 0.020408163, %v6126_v31  ;;  %v3016_v62 = vsel %vm929_vm10, %v3015_v51, %v6102_v22 }
 0x256   :  { %v2806_v52 = vpop.xlane.xlu1 %2805  ;;  %v6154_v0 = vpop.xlane.xlu0 %2760  ;;  %v3242_v31 = vrot.slane %v2869_v63, %v4473_v24  ;;  %v3099_v22 = vrot.slane %v2840_v11, %v4467_v18 }
 0x257   :  { %v3163_v26 = vrot.slane %v2853_v28, %v4473_v24  ;;  %v2870_v1 = vmul.f32 0.020408163, %v2806_v52  ;;  %v3238_v37 = vsel %vm922_vm9, %v3237_v61, %v6107_v47  ;;  %v3168_v13 = vrot.slane %v2854_v21, %v4467_v18  ;;  %vm6348_vm9 = vmmov %vm6347_vm0 }
 0x258   :  { %v2825_v52 = vmul.f32 0.020408163, %v6146_v6  ;;  %v2855_v50 = vmul.f32 0.020408163, %v6154_v0 }
 0x259   :  { %v1256_v8 = vpop.f32.mrb[0].mxu0  ;;  %v3164_v55 = vsel %vm929_vm10, %v3163_v26, %v6110_v7 }
 0x25a   :  { %v1258_v57 = vpop.f32.mrb[1].mxu0  ;;  %v1687_v10 = vpop.f32.mrb[0].mxu1  ;;  %v3169_v27 = vsel %vm936_vm11, %v3168_v13, %v3164_v55 }
 0x25b   :  { %v6163_v39 = vadd.f32 %v1687_v10, %v1256_v8  ;;  %v1948_v17 = vpop.xlane.xlu1 %1947  ;;  %v1689_v19 = vpop.f32.mrb[1].mxu1  ;;  %v3094_v8 = vrot.slane %v2839_v33, %v4473_v24 }
 0x25c   :  { %v2036_v4 = vmul.f32 0.020408163, %v1948_v17  ;;  %v1858_v53 = vpop.xlane.xlu0 %1857  ;;  %v3247_v17 = vrot.slane %v2870_v1, %v4467_v18  ;;  %v3025_v18 = vrot.slane %v2825_v52, %v4494_v44 }
 0x25d   :  { %v2006_v3 = vmul.f32 0.020408163, %v1858_v53  ;;  %v3095_v24 = vsel %vm929_vm10, %v3094_v8, %v3090_v9  ;;  %v6352_v8 = vld [vmem:[#allocation2_spill] sm:$0xff] }
 0x25e   :  { %v2366_v59 = vrot.slane %v2036_v4, %v6305_v25  ;;  %v3243_v4 = vsel %vm929_vm10, %v3242_v31, %v3238_v37  ;;  %v3100_v32 = vsel %vm936_vm11, %v3099_v22, %v3095_v24  ;;  %vm6349_vm10 = vmmov %vm6347_vm0 }
 0x25f   :  { %v2218_v56 = vrot.slane %v2006_v3, %v6305_v25  ;;  %v2719_v45 = vpop.xlane.xlu1 %2718  ;;  %v3173_v3 = vrot.slane %v2855_v50, %v4494_v44 }
 0x260   :  { %v2674_v15 = vpop.xlane.xlu0 %2673  ;;  %v2367_v16 = vsel %vm964_vm15, %v2366_v59, %v2362_v48  ;;  %v2841_v35 = vmul.f32 0.020408163, %v2719_v45  ;;  %v3248_v59 = vsel %vm936_vm11, %v3247_v17, %v3243_v4 }
 0x261   :  { %v2219_v14 = vsel %vm964_vm15, %v2218_v56, %v2214_v43  ;;  %v2826_v40 = vmul.f32 0.020408163, %v2674_v15 }
 0x262   :  { %v2437_v2 = vsel %vm1183_vm13, %v2367_v16, %v2219_v14  ;;  %v3104_v19 = vrot.slane %v2841_v35, %v4494_v44  ;;  %v3021_v14 = vsel %vm936_vm11, %v3020_v12, %v3016_v62  ;;  %vm3344_vm11 = vcmp.lt.s32.totalorder %v6352_v8, 53 }
 0x263   :  { %2507 = vmatmul.mubr.f32.vlgmr.msra.gmra.mrb[2].mxu0 %v2437_v2  ;;  %v2809_v5 = vpop.xlane.xlu1 %2808  ;;  %v3030_v56 = vrot.slane %v2826_v40, %v4488_v38  ;;  %v3174_v2 = vsel %vm943_vm12, %v3173_v3, %v3169_v27  ;;  %v3026_v33 = vsel %vm943_vm12, %v3025_v18, %v3021_v14  ;;  %v4149_v35 = vmov inf  }
 0x264   :  { %v2764_v58 = vpop.xlane.xlu0 %2763  ;;  %v2871_v23 = vmul.f32 0.020408163, %v2809_v5  ;;  %v3105_v48 = vsel %vm943_vm12, %v3104_v19, %v3100_v32 }
 0x265   :  { %v2856_v47 = vmul.f32 0.020408163, %v2764_v58 }
 0x266   :  { %v3252_v7 = vrot.slane %v2871_v23, %v4494_v44 }
 0x267   :  { %v2722_v57 = vpop.xlane.xlu1 %2721  ;;  %v3178_v42 = vrot.slane %v2856_v47, %v4488_v38 }
 0x268   :  { %v2842_v10 = vmul.f32 0.020408163, %v2722_v57  ;;  %v2677_v34 = vpop.xlane.xlu0 %2676  ;;  %v3253_v45 = vsel %vm943_vm12, %v3252_v7, %v3248_v59  ;;  %vm3349_vm12 = vcmp.lt.s32.totalorder %v6352_v8, 52 }
 0x269   :  { %v2827_v0 = vmul.f32 0.020408163, %v2677_v34  ;;  %v3179_v5 = vsel %vm6350_vm6, %v3178_v42, %v3174_v2 }
 0x26a   :  { %v3109_v6 = vrot.slane %v2842_v10, %v4488_v38 }
 0x26b   :  { %v2812_v29 = vpop.xlane.xlu1 %2811  ;;  %v3035_v44 = vrot.slane %v2827_v0, %v6303_v49 }
 0x26c   :  { %v2872_v53 = vmul.f32 0.020408163, %v2812_v29  ;;  %v2767_v54 = vpop.xlane.xlu0 %2766  ;;  %v3110_v16 = vsel %vm6348_vm9, %v3109_v6, %v3105_v48 }
 0x26d   :  { %v2857_v30 = vmul.f32 0.020408163, %v2767_v54 }
 0x26e   :  { %v3257_v46 = vrot.slane %v2872_v53, %v4488_v38 }
 0x26f   :  { %v3183_v20 = vrot.slane %v2857_v30, %v6303_v49  ;;  %v2770_v60 = vpop.xlane.xlu1 %2769  ;;  %v3031_v49 = vsel %vm6351_vm5, %v3030_v56, %v3026_v33 }
 0x270   :  { %v2858_v43 = vmul.f32 0.020408163, %v2770_v60  ;;  %v2680_v15 = vpop.xlane.xlu0 %2679  ;;  %v3258_v28 = vsel %vm6349_vm10, %v3257_v46, %v3253_v45  ;;  %v3036_v58 = vsel %vm957_vm14, %v3035_v44, %v3031_v49 }
 0x271   :  { %v2828_v41 = vmul.f32 0.020408163, %v2680_v15  ;;  %v3260_v38 = vsel %vm1183_vm13, %v3258_v28, %v3110_v16  ;;  %v3184_v61 = vsel %vm957_vm14, %v3183_v20, %v3179_v5  ;;  %vm3343_vm14 = vcmp.lt.s32.totalorder %v6352_v8, 50 }
 0x272   :  { %v3188_v51 = vrot.slane %v2858_v43, %v6305_v25  ;;  %3364 = vmatprep.mubr.msk.f32.mxu1 %vm1187_vm7, %v3260_v38  ;;  %vm3345_vm7 = vcmp.lt.s32.totalorder %v6352_v8, 55 }
 0x273   :  { %v3040_v63 = vrot.slane %v2828_v41, %v6305_v25  ;;  %v3350_v23 = vsel %vm3345_vm7, 0.2, %v4149_v35  ;;  %v4150_v25 = vmov -inf  }
 0x274   :  { %v3189_v26 = vsel %vm964_vm15, %v3188_v51, %v3184_v61  ;;  %v3346_v57 = vsel %vm3345_vm7, -0.2, %v4150_v25  ;;  %v3351_v62 = vsel %vm3344_vm11, inf, %v3350_v23 }
 0x275   :  { %v3041_v21 = vsel %vm964_vm15, %v3040_v63, %v3036_v58  ;;  %v3347_v37 = vsel %vm3344_vm11, 0.0, %v3346_v57  ;;  %v3352_v34 = vsel %vm3349_vm12, 1.0, %v3351_v62 }
 0x276   :  { %v3259_v36 = vsel %vm1183_vm13, %v3189_v26, %v3041_v21  ;;  %v3348_v13 = vsel %vm3343_vm14, -inf, %v3347_v37  ;;  %v3353_v50 = vsel %vm3343_vm14, inf, %v3352_v34 }
 0x277   :  { %3329 = vmatmul.mubr.f32.vlgmr.msra.gmra.mrb[2].mxu1 %v3259_v36 }
 0x336   :  { %v2508_v11 = vpop.f32.mrb[2].mxu0 }
 0x337   :  { %v2512_v1 = vadd.f32 %v2508_v11, %v6163_v39  ;;  %v2510_v9 = vpop.f32.mrb[3].mxu0  ;;  %v3365_v39 = vld [vmem:[%s6255_s2] ss:$0 sm:$0xff] }
 0x34a   :  { %v3330_v31 = vpop.f32.mrb[2].mxu1 }
 0x34b   :  { %v3334_v10 = vadd.f32 %v3330_v31, %v2512_v1  ;;  %v3332_v55 = vpop.f32.mrb[3].mxu1 }
 0x34d   :  { %v3342_v52 = vadd.f32 %v3365_v39, %v3334_v10 }
 0x34f   :  { %v3354_v12 = vmax.f32 %v3348_v13, %v3342_v52 }
 0x351   :  { %v3355_v22 = vmin.f32 %v3353_v50, %v3354_v12 }
 0x353   :  { %3356 = vst [vmem:[%s6256_s3] sm:$0x3] %v3355_v22 }

</bundles_post_ra>
